<compile_context>
chip_gen: v5e
topology: v5e:2x2
jax: 0.10.0
libtpu: 0.0.40
codegen_flags: <defaults>
</compile_context>

<pallas_src>
import math
from functools import partial

import jax
import jax.numpy as jnp
from jax import lax
from jax.experimental import pallas as pl
from jax.experimental.pallas import tpu as pltpu


# ----------------------------------------------------------------------------
# chip-aware sizing
# ----------------------------------------------------------------------------
try:
    _VMEM_CAP = int(pltpu.get_tpu_info().vmem_capacity_bytes)
except Exception:  # pragma: no cover - fallback if query unavailable
    _VMEM_CAP = 128 * 1024 * 1024
_BIG_VMEM = _VMEM_CAP >= 100 * 1024 * 1024          # v5e / v6e (128 MiB) vs v7x (64 MiB)
_VMEM_LIMIT = int(min(96 * 1024 * 1024, (_VMEM_CAP * 3) // 4))

_ROW_CANDS = (1024, 512, 256, 128, 64, 32, 16, 8) if _BIG_VMEM else (512, 256, 128, 64, 32, 16, 8)
_LANE_CANDS = (1024, 512, 256, 128) if _BIG_VMEM else (512, 256, 128)
_FFN_TF_CAP = 512 if _BIG_VMEM else 256             # bound double-buffered W1/W2 tiles


def _row_tile(m, cap=None):
    """Sublane-axis tile: multiple of 8 dividing m, else full m."""
    for c in _ROW_CANDS:
        if cap is not None and c > cap:
            continue
        if m >= c and m % c == 0:
            return c
    return m


def _lane_tile(n, cap=None):
    """Lane-axis tile: multiple of 128 dividing n, else full n."""
    for c in _LANE_CANDS:
        if cap is not None and c > cap:
            continue
        if n >= c and n % c == 0:
            return c
    return n


def _cparams(sem):
    return pltpu.CompilerParams(dimension_semantics=sem,
                                vmem_limit_bytes=_VMEM_LIMIT)


# ----------------------------------------------------------------------------
# Pallas kernels
# ----------------------------------------------------------------------------
def _linear_kernel(x_ref, w_ref, b_ref, o_ref):
    """out = x @ W + b, accumulated directly into the resident f32 output block."""
    k = pl.program_id(2)

    @pl.when(k == 0)
    def _():
        o_ref[...] = jnp.zeros_like(o_ref)

    o_ref[...] += jnp.dot(x_ref[...].astype(jnp.bfloat16), w_ref[...],
                          preferred_element_type=jnp.float32)

    @pl.when(k == pl.num_programs(2) - 1)
    def _():
        o_ref[...] += b_ref[...]


def linear(x, w, b):
    """x: (M, K) f32, w PRE-TRANSPOSED (K, N) bf16, b: (N,) f32 -> (M, N) f32."""
    M, K = x.shape
    N = w.shape[1]
    tm, tn, tk = _row_tile(M), _lane_tile(N), _lane_tile(K)
    return pl.pallas_call(
        _linear_kernel,
        out_shape=jax.ShapeDtypeStruct((M, N), jnp.float32),
        grid=(M // tm, N // tn, K // tk),
        in_specs=[
            pl.BlockSpec((tm, tk), lambda i, j, k: (i, k)),
            pl.BlockSpec((tk, tn), lambda i, j, k: (k, j)),
            pl.BlockSpec((1, tn), lambda i, j, k: (0, j)),
        ],
        out_specs=pl.BlockSpec((tm, tn), lambda i, j, k: (i, j)),
        compiler_params=_cparams(("parallel", "parallel", "arbitrary")),
    )(x, w, b.reshape(1, N))


def _linear_res_ln_kernel(x_ref, w_ref, b_ref, r_ref, g_ref, bt_ref, o_ref, *, eps):
    """out = LayerNorm(res + (x @ W + b)); LN fused into the last-k epilogue."""
    k = pl.program_id(1)

    @pl.when(k == 0)
    def _():
        o_ref[...] = jnp.zeros_like(o_ref)

    o_ref[...] += jnp.dot(x_ref[...].astype(jnp.bfloat16), w_ref[...],
                          preferred_element_type=jnp.float32)

    @pl.when(k == pl.num_programs(1) - 1)
    def _():
        y = o_ref[...] + b_ref[...] + r_ref[...]
        mean = jnp.mean(y, axis=-1, keepdims=True)
        cent = y - mean
        var = jnp.mean(cent * cent, axis=-1, keepdims=True)
        o_ref[...] = cent * lax.rsqrt(var + eps) * g_ref[...] + bt_ref[...]


def linear_residual_ln(x, w, b, res, gamma, beta, eps=1e-5):
    """LayerNorm(res + x @ W + b).  x: (M, K), w: (K, N) bf16, res: (M, N).
    Requires the full output row (N) in one tile (true for d_model <= lane cap)."""
    M, K = x.shape
    N = w.shape[1]
    tm, tk = _row_tile(M), _lane_tile(K)
    return pl.pallas_call(
        partial(_linear_res_ln_kernel, eps=eps),
        out_shape=jax.ShapeDtypeStruct((M, N), jnp.float32),
        grid=(M // tm, K // tk),
        in_specs=[
            pl.BlockSpec((tm, tk), lambda i, k: (i, k)),
            pl.BlockSpec((tk, N), lambda i, k: (k, 0)),
            pl.BlockSpec((1, N), lambda i, k: (0, 0)),
            pl.BlockSpec((tm, N), lambda i, k: (i, 0)),
            pl.BlockSpec((1, N), lambda i, k: (0, 0)),
            pl.BlockSpec((1, N), lambda i, k: (0, 0)),
        ],
        out_specs=pl.BlockSpec((tm, N), lambda i, k: (i, 0)),
        compiler_params=_cparams(("parallel", "arbitrary")),
    )(x, w, b.reshape(1, N), res, gamma.reshape(1, N), beta.reshape(1, N))


def _ffn_res_ln_kernel(x_ref, w1_ref, b1_ref, w2_ref, b2_ref, g_ref, bt_ref,
                       o_ref, *, eps):
    """out = LayerNorm(x + relu(x @ W1 + b1) @ W2 + b2), dim_ff chunked ("arbitrary")."""
    f = pl.program_id(1)

    @pl.when(f == 0)
    def _():
        o_ref[...] = jnp.zeros_like(o_ref)

    xb = x_ref[...].astype(jnp.bfloat16)
    h = jnp.dot(xb, w1_ref[...], preferred_element_type=jnp.float32) + b1_ref[...]
    h = jnp.maximum(h, 0.0).astype(jnp.bfloat16)
    o_ref[...] += jnp.dot(h, w2_ref[...], preferred_element_type=jnp.float32)

    @pl.when(f == pl.num_programs(1) - 1)
    def _():
        y = o_ref[...] + b2_ref[...] + x_ref[...]          # residual = the FFN input
        mean = jnp.mean(y, axis=-1, keepdims=True)
        cent = y - mean
        var = jnp.mean(cent * cent, axis=-1, keepdims=True)
        o_ref[...] = cent * lax.rsqrt(var + eps) * g_ref[...] + bt_ref[...]


def ffn_residual_ln(x, w1, b1, w2, b2, gamma, beta, eps=1e-5):
    """Fused feed-forward + residual + LayerNorm.  x: (M, d), w1: (d, F), w2: (F, d)."""
    M, d = x.shape
    F = w1.shape[1]
    tm = _row_tile(M)
    tf = _lane_tile(F, cap=_FFN_TF_CAP)
    return pl.pallas_call(
        partial(_ffn_res_ln_kernel, eps=eps),
        out_shape=jax.ShapeDtypeStruct((M, d), jnp.float32),
        grid=(M // tm, F // tf),
        in_specs=[
            pl.BlockSpec((tm, d), lambda i, f: (i, 0)),
            pl.BlockSpec((d, tf), lambda i, f: (0, f)),
            pl.BlockSpec((1, tf), lambda i, f: (0, f)),
            pl.BlockSpec((tf, d), lambda i, f: (f, 0)),
            pl.BlockSpec((1, d), lambda i, f: (0, 0)),
            pl.BlockSpec((1, d), lambda i, f: (0, 0)),
            pl.BlockSpec((1, d), lambda i, f: (0, 0)),
        ],
        out_specs=pl.BlockSpec((tm, d), lambda i, f: (i, 0)),
        compiler_params=_cparams(("parallel", "arbitrary")),
    )(x, w1, b1.reshape(1, F), w2, b2.reshape(1, d),
      gamma.reshape(1, d), beta.reshape(1, d))


def _proj_pe_kernel(x_ref, w_ref, b_ref, pe_ref, o_ref):
    """out = x @ W + b + pe  (input projection fused with positional encoding)."""
    xb = x_ref[0].astype(jnp.bfloat16)
    o_ref[0] = (jnp.dot(xb, w_ref[...], preferred_element_type=jnp.float32)
                + b_ref[...] + pe_ref[...])


def input_proj_pe(x, w, b, pe):
    """x: (B, L, I), w: (I, d) bf16, b: (d,), pe: (L, d) -> (B, L, d) f32."""
    B, L, I = x.shape
    d = w.shape[1]
    tl = _row_tile(L)
    return pl.pallas_call(
        _proj_pe_kernel,
        out_shape=jax.ShapeDtypeStruct((B, L, d), jnp.float32),
        grid=(B, L // tl),
        in_specs=[
            pl.BlockSpec((1, tl, I), lambda b, l: (b, l, 0)),
            pl.BlockSpec((I, d), lambda b, l: (0, 0)),
            pl.BlockSpec((1, d), lambda b, l: (0, 0)),
            pl.BlockSpec((tl, d), lambda b, l: (l, 0)),
        ],
        out_specs=pl.BlockSpec((1, tl, d), lambda b, l: (b, l, 0)),
        compiler_params=_cparams(("parallel", "parallel")),
    )(x, w, b.reshape(1, d), pe)


def _ln_kernel(x_ref, g_ref, b_ref, o_ref, *, eps):
    x = x_ref[...]
    mean = jnp.mean(x, axis=-1, keepdims=True)
    cent = x - mean
    var = jnp.mean(cent * cent, axis=-1, keepdims=True)
    o_ref[...] = cent * lax.rsqrt(var + eps) * g_ref[...] + b_ref[...]


def layernorm(x, gamma, beta, eps=1e-5):
    """LayerNorm over the last axis (the final encoder/decoder norms)."""
    M, D = x.shape
    tm = _row_tile(M)
    return pl.pallas_call(
        partial(_ln_kernel, eps=eps),
        out_shape=jax.ShapeDtypeStruct((M, D), jnp.float32),
        grid=(M // tm,),
        in_specs=[
            pl.BlockSpec((tm, D), lambda i: (i, 0)),
            pl.BlockSpec((1, D), lambda i: (0, 0)),
            pl.BlockSpec((1, D), lambda i: (0, 0)),
        ],
        out_specs=pl.BlockSpec((tm, D), lambda i: (i, 0)),
        compiler_params=_cparams(("parallel",)),
    )(x, gamma.reshape(1, D), beta.reshape(1, D))


def _mha_kernel(q_ref, kv_ref, o_ref, *, nhead, head_dim, scale,
                q_off, k_off, v_off):
    """One (batch, q-block) step.  q_ref: (1, tq, Wq), kv_ref: (1, Lk, Wkv).
    Q/K/V are static lane slices of the (possibly fused) projection tensors;
    each head is computed and stored into its own lane slice of o_ref
    (one head live at a time -> no concat, no vreg spills)."""
    for h in range(nhead):                       # static unroll over heads
        qs = q_off + h * head_dim
        ks = k_off + h * head_dim
        vs = v_off + h * head_dim
        qh = q_ref[0, :, qs:qs + head_dim].astype(jnp.bfloat16)   # (tq, hd)
        kh = kv_ref[0, :, ks:ks + head_dim].astype(jnp.bfloat16)  # (Lk, hd)
        vh = kv_ref[0, :, vs:vs + head_dim].astype(jnp.bfloat16)  # (Lk, hd)
        # q @ k^T via dot_general contracting the last dims (no explicit .T)
        s = lax.dot_general(qh, kh, (((1,), (1,)), ((), ())),
                            preferred_element_type=jnp.float32) * scale
        m = jnp.max(s, axis=-1, keepdims=True)
        p = jnp.exp(s - m)
        denom = jnp.sum(p, axis=-1, keepdims=True)
        p = p * pl.reciprocal(denom, approx=True)
        oh = lax.dot_general(p.astype(jnp.bfloat16), vh, (((1,), (0,)), ((), ())),
                             preferred_element_type=jnp.float32)
        o_ref[0, :, h * head_dim:(h + 1) * head_dim] = oh


def attention(q_src, kv_src, nhead, d, *, q_off, k_off, v_off):
    """q_src: (B, Lq, Wq), kv_src: (B, Lk, Wkv); Q/K/V live at lane offsets
    q_off / k_off / v_off of those tensors.  Returns (B, Lq, d) f32.
    No masks (matches the reference module as written)."""
    # TODO(synk): for very long Lk on v7x (64 MiB VMEM) add a KV grid axis with
    # flash-style online softmax instead of holding full K/V per batch step.
    B, Lq, Wq = q_src.shape
    _, Lk, Wkv = kv_src.shape
    hd = d // nhead
    tq = _row_tile(Lq, cap=512)
    return pl.pallas_call(
        partial(_mha_kernel, nhead=nhead, head_dim=hd, scale=1.0 / math.sqrt(hd),
                q_off=q_off, k_off=k_off, v_off=v_off),
        out_shape=jax.ShapeDtypeStruct((B, Lq, d), jnp.float32),
        grid=(B, Lq // tq),
        in_specs=[
            pl.BlockSpec((1, tq, Wq), lambda b, i: (b, i, 0)),
            pl.BlockSpec((1, Lk, Wkv), lambda b, i: (b, 0, 0)),
        ],
        out_specs=pl.BlockSpec((1, tq, d), lambda b, i: (b, i, 0)),
        compiler_params=_cparams(("parallel", "parallel")),
    )(q_src, kv_src)


# ----------------------------------------------------------------------------
# Transformer building blocks (batch-first layout throughout -> no permutes)
# ----------------------------------------------------------------------------
def encoder_layer(x, p, nhead):
    B, L, d = x.shape
    M = B * L
    x_flat = x.reshape(M, d)
    # self-attention: fused QKV projection, Q/K/V carved inside the attn kernel
    qkv = linear(x_flat, p["self_attn"]["w_qkv"], p["self_attn"]["b_qkv"])
    qkv = qkv.reshape(B, L, 3 * d)
    attn = attention(qkv, qkv, nhead, d, q_off=0, k_off=d, v_off=2 * d)
    # out-projection fused with residual-add + LayerNorm (norm1)
    x2 = linear_residual_ln(attn.reshape(M, d),
                            p["self_attn"]["w_out"], p["self_attn"]["b_out"],
                            x_flat, p["norm1_g"], p["norm1_b"])
    # FFN fused with residual-add + LayerNorm (norm2)
    x3 = ffn_residual_ln(x2, p["lin1_w"], p["lin1_b"], p["lin2_w"], p["lin2_b"],
                         p["norm2_g"], p["norm2_b"])
    return x3.reshape(B, L, d)


def decoder_layer(x, mem, p, nhead):
    # TODO(synk): no causal/padding masks — matches the reference module, which
    # calls the decoder without tgt_mask / memory_mask.
    B, L, d = x.shape
    Lk = mem.shape[1]
    M = B * L
    x_flat = x.reshape(M, d)
    # masked(-less) self-attention
    qkv = linear(x_flat, p["self_attn"]["w_qkv"], p["self_attn"]["b_qkv"])
    qkv = qkv.reshape(B, L, 3 * d)
    sa = attention(qkv, qkv, nhead, d, q_off=0, k_off=d, v_off=2 * d)
    x2 = linear_residual_ln(sa.reshape(M, d),
                            p["self_attn"]["w_out"], p["self_attn"]["b_out"],
                            x_flat, p["norm1_g"], p["norm1_b"])
    # cross-attention: fused KV projection of memory, Q projection of x2
    q = linear(x2, p["cross_attn"]["w_q"], p["cross_attn"]["b_q"]).reshape(B, L, d)
    kv = linear(mem.reshape(B * Lk, d),
                p["cross_attn"]["w_kv"], p["cross_attn"]["b_kv"]).reshape(B, Lk, 2 * d)
    ca = attention(q, kv, nhead, d, q_off=0, k_off=0, v_off=d)
    x3 = linear_residual_ln(ca.reshape(M, d),
                            p["cross_attn"]["w_out"], p["cross_attn"]["b_out"],
                            x2, p["norm2_g"], p["norm2_b"])
    # FFN + residual + norm3
    x4 = ffn_residual_ln(x3, p["lin1_w"], p["lin1_b"], p["lin2_w"], p["lin2_b"],
                         p["norm3_g"], p["norm3_b"])
    return x4.reshape(B, L, d)


def make_positional_encoding(max_len, dim):
    position = jnp.arange(max_len, dtype=jnp.float32)[:, None]
    div_term = jnp.exp(jnp.arange(0, dim, 2, dtype=jnp.float32)
                       * (-math.log(10000.0) / dim))
    pe = jnp.zeros((max_len, dim), jnp.float32)
    pe = pe.at[:, 0::2].set(jnp.sin(position * div_term))
    pe = pe.at[:, 1::2].set(jnp.cos(position * div_term))
    return pe


def transformer_forward(params, src, tgt=None, *, nhead):
    """src/tgt: (B, L, input_size) -> (B, Lt, hidden_size).  Eval-mode semantics
    (dropout p=0.1 in PE and the layers is identity)."""
    if tgt is None:
        tgt = src
    B, Ls, _ = src.shape
    Lt = tgt.shape[1]
    d = params["src_fc_w"].shape[1]
    pe = params["pe"]

    # --- encoder: input projection fused with positional encoding
    mem = input_proj_pe(src, params["src_fc_w"], params["src_fc_b"], pe[:Ls])
    for lp in params["enc_layers"]:
        mem = encoder_layer(mem, lp, nhead)
    mem = layernorm(mem.reshape(B * Ls, d),
                    params["enc_norm_g"], params["enc_norm_b"]).reshape(B, Ls, d)

    # --- decoder
    out = input_proj_pe(tgt, params["tgt_fc_w"], params["tgt_fc_b"], pe[:Lt])
    for lp in params["dec_layers"]:
        out = decoder_layer(out, mem, lp, nhead)
    out = layernorm(out.reshape(B * Lt, d),
                    params["dec_norm_g"], params["dec_norm_b"])
    return out.reshape(B, Lt, d)


# ----------------------------------------------------------------------------
# Deterministic parameter construction.  Matmul weights stored PRE-TRANSPOSED
# (in_features, out_features) and in bf16 (MXU operands); biases / LN params /
# PE stay f32; all accumulation inside kernels is f32.
# ----------------------------------------------------------------------------
def init_params(key, input_size, hidden_size, num_layers, nhead, dim_ff=2048):
    keys = iter(jax.random.split(key, 8 + 16 * num_layers))

    def w(shape, scale=0.02):
        return (jax.random.normal(next(keys), shape, jnp.float32) * scale
                ).astype(jnp.bfloat16)

    d = hidden_size

    def self_attn_params():
        return {
            "w_qkv": w((d, 3 * d)), "b_qkv": jnp.zeros((3 * d,), jnp.float32),
            "w_out": w((d, d)), "b_out": jnp.zeros((d,), jnp.float32),
        }

    def cross_attn_params():
        return {
            "w_q": w((d, d)), "b_q": jnp.zeros((d,), jnp.float32),
            "w_kv": w((d, 2 * d)), "b_kv": jnp.zeros((2 * d,), jnp.float32),
            "w_out": w((d, d)), "b_out": jnp.zeros((d,), jnp.float32),
        }

    params = {
        "src_fc_w": w((input_size, d)), "src_fc_b": jnp.zeros((d,), jnp.float32),
        "tgt_fc_w": w((input_size, d)), "tgt_fc_b": jnp.zeros((d,), jnp.float32),
        "pe": make_positional_encoding(5000, d),
        "enc_norm_g": jnp.ones((d,), jnp.float32), "enc_norm_b": jnp.zeros((d,), jnp.float32),
        "dec_norm_g": jnp.ones((d,), jnp.float32), "dec_norm_b": jnp.zeros((d,), jnp.float32),
        "enc_layers": [], "dec_layers": [],
    }
    for _ in range(num_layers):
        params["enc_layers"].append({
            "self_attn": self_attn_params(),
            "lin1_w": w((d, dim_ff)), "lin1_b": jnp.zeros((dim_ff,), jnp.float32),
            "lin2_w": w((dim_ff, d)), "lin2_b": jnp.zeros((d,), jnp.float32),
            "norm1_g": jnp.ones((d,), jnp.float32), "norm1_b": jnp.zeros((d,), jnp.float32),
            "norm2_g": jnp.ones((d,), jnp.float32), "norm2_b": jnp.zeros((d,), jnp.float32),
        })
    for _ in range(num_layers):
        params["dec_layers"].append({
            "self_attn": self_attn_params(),
            "cross_attn": cross_attn_params(),
            "lin1_w": w((d, dim_ff)), "lin1_b": jnp.zeros((dim_ff,), jnp.float32),
            "lin2_w": w((dim_ff, d)), "lin2_b": jnp.zeros((d,), jnp.float32),
            "norm1_g": jnp.ones((d,), jnp.float32), "norm1_b": jnp.zeros((d,), jnp.float32),
            "norm2_g": jnp.ones((d,), jnp.float32), "norm2_b": jnp.zeros((d,), jnp.float32),
            "norm3_g": jnp.ones((d,), jnp.float32), "norm3_b": jnp.zeros((d,), jnp.float32),
        })
    return params


# ----------------------------------------------------------------------------
if __name__ == "__main__":
    B, seq, input_size = 2, 8, 16
    hidden_size, num_layers, nhead = 32, 2, 4

    key = jax.random.PRNGKey(0)
    pkey, xkey = jax.random.split(key)
    params = init_params(pkey, input_size, hidden_size, num_layers, nhead)
    src = jax.random.normal(xkey, (B, seq, input_size), jnp.float32)

    # tgt=None -> tgt = src, matching the PyTorch module's default path.
    # TODO(synk): dropout layers (p=0.1) are modeled in eval mode (identity).
    fwd = jax.jit(partial(transformer_forward, nhead=nhead))
    out = fwd(params, src)
    out = jax.block_until_ready(out)

    assert out.shape == (B, seq, hidden_size), out.shape
    assert jnp.all(jnp.isfinite(out))
    print("KERNEL_OK")
</pallas_src>

<mosaic_0001>
module attributes {stable_mosaic.version = 11 : i64} {
  func.func @_proj_pe_kernel(%arg0: i32, %arg1: i32, %arg2: memref<1x8x16xf32, #tpu.memory_space<vmem>>, %arg3: memref<16x32xbf16, #tpu.memory_space<vmem>>, %arg4: memref<1x32xf32, #tpu.memory_space<vmem>>, %arg5: memref<8x32xf32, #tpu.memory_space<vmem>>, %arg6: memref<1x8x32xf32, #tpu.memory_space<vmem>>) attributes {dimension_semantics = [#tpu.dimension_semantics<parallel>, #tpu.dimension_semantics<parallel>], iteration_bounds = array<i64: 2, 1>, scalar_prefetch = 0 : i64, scratch_operands = 0 : i64, tpu.core_type = #tpu.core_type<tc>, window_params = [{transform_indices = @transform_0, window_bounds = array<i64: 1, 8, 16>}, {pipeline_mode = #tpu.pipeline_mode<synchronous>, transform_indices = @transform_1, window_bounds = array<i64: 16, 32>}, {pipeline_mode = #tpu.pipeline_mode<synchronous>, transform_indices = @transform_2, window_bounds = array<i64: 1, 32>}, {transform_indices = @transform_3, window_bounds = array<i64: 8, 32>}, {transform_indices = @transform_4, window_bounds = array<i64: 1, 8, 32>}]} {
    %c0 = arith.constant 0 : index
    %c0_0 = arith.constant 0 : index
    %c0_1 = arith.constant 0 : index
    %0 = vector.load %arg2[%c0, %c0_0, %c0_1] : memref<1x8x16xf32, #tpu.memory_space<vmem>>, vector<1x8x16xf32>
    %1 = vector.shape_cast %0 : vector<1x8x16xf32> to vector<8x16xf32>
    %2 = arith.truncf %1 : vector<8x16xf32> to vector<8x16xbf16>
    %c0_2 = arith.constant 0 : index
    %c0_3 = arith.constant 0 : index
    %3 = vector.load %arg3[%c0_2, %c0_3] : memref<16x32xbf16, #tpu.memory_space<vmem>>, vector<16x32xbf16>
    %cst = arith.constant dense<0.000000e+00> : vector<8x32xf32>
    %4 = tpu.matmul %2, %3, %cst {dimension_numbers = #tpu.dot_dimension_numbers<[1], [0], [0], [1], [0, 0, 1, 1], [], []>} : vector<8x16xbf16>, vector<16x32xbf16>, vector<8x32xf32> -> vector<8x32xf32>
    %c0_4 = arith.constant 0 : index
    %c0_5 = arith.constant 0 : index
    %5 = vector.load %arg4[%c0_4, %c0_5] : memref<1x32xf32, #tpu.memory_space<vmem>>, vector<1x32xf32>
    %6 = vector.broadcast %5 : vector<1x32xf32> to vector<8x32xf32>
    %7 = arith.addf %4, %6 : vector<8x32xf32>
    %c0_6 = arith.constant 0 : index
    %c0_7 = arith.constant 0 : index
    %8 = vector.load %arg5[%c0_6, %c0_7] : memref<8x32xf32, #tpu.memory_space<vmem>>, vector<8x32xf32>
    %9 = arith.addf %7, %8 : vector<8x32xf32>
    %c0_8 = arith.constant 0 : index
    %c0_9 = arith.constant 0 : index
    %c0_10 = arith.constant 0 : index
    %10 = vector.load %arg6[%c0_8, %c0_9, %c0_10] : memref<1x8x32xf32, #tpu.memory_space<vmem>>, vector<1x8x32xf32>
    %11 = vector.shape_cast %10 : vector<1x8x32xf32> to vector<8x32xf32>
    %12 = vector.shape_cast %9 : vector<8x32xf32> to vector<1x8x32xf32>
    tpu.vector_store %arg6[%c0_8, %c0_9, %c0_10], %12 {strides = array<i32>} : memref<1x8x32xf32, #tpu.memory_space<vmem>>, vector<1x8x32xf32>,
    return
  }
  func.func @transform_0(%arg0: i32, %arg1: i32) -> (i32, i32, i32) {
    %c0_i32 = arith.constant 0 : i32
    %c0_i32_0 = arith.constant 0 : i32
    return %arg0, %arg1, %c0_i32 : i32, i32, i32
  }
  func.func @transform_1(%arg0: i32, %arg1: i32) -> (i32, i32) {
    %c0_i32 = arith.constant 0 : i32
    %c0_i32_0 = arith.constant 0 : i32
    %c0_i32_1 = arith.constant 0 : i32
    return %c0_i32, %c0_i32_0 : i32, i32
  }
  func.func @transform_2(%arg0: i32, %arg1: i32) -> (i32, i32) {
    %c0_i32 = arith.constant 0 : i32
    %c0_i32_0 = arith.constant 0 : i32
    %c0_i32_1 = arith.constant 0 : i32
    return %c0_i32, %c0_i32_0 : i32, i32
  }
  func.func @transform_3(%arg0: i32, %arg1: i32) -> (i32, i32) {
    %c0_i32 = arith.constant 0 : i32
    %c0_i32_0 = arith.constant 0 : i32
    return %arg1, %c0_i32 : i32, i32
  }
  func.func @transform_4(%arg0: i32, %arg1: i32) -> (i32, i32, i32) {
    %c0_i32 = arith.constant 0 : i32
    %c0_i32_0 = arith.constant 0 : i32
    return %arg0, %arg1, %c0_i32 : i32, i32, i32
  }
}

module attributes {stable_mosaic.version = 11 : i64} {
  func.func @_linear_kernel(%arg0: i32, %arg1: i32, %arg2: i32, %arg3: memref<16x32xf32, #tpu.memory_space<vmem>>, %arg4: memref<32x96xbf16, #tpu.memory_space<vmem>>, %arg5: memref<1x96xf32, #tpu.memory_space<vmem>>, %arg6: memref<16x96xf32, #tpu.memory_space<vmem>>) attributes {dimension_semantics = [#tpu.dimension_semantics<parallel>, #tpu.dimension_semantics<parallel>, #tpu.dimension_semantics<arbitrary>], iteration_bounds = array<i64: 1, 1, 1>, scalar_prefetch = 0 : i64, scratch_operands = 0 : i64, tpu.core_type = #tpu.core_type<tc>, window_params = [{transform_indices = @transform_0, window_bounds = array<i64: 16, 32>}, {transform_indices = @transform_1, window_bounds = array<i64: 32, 96>}, {transform_indices = @transform_2, window_bounds = array<i64: 1, 96>}, {transform_indices = @transform_3, window_bounds = array<i64: 16, 96>}]} {
    %c0_i32 = arith.constant 0 : i32
    %0 = arith.cmpi eq, %arg2, %c0_i32 : i32
    %1 = arith.extui %0 : i1 to i32
    %c0_i32_0 = arith.constant 0 : i32
    %2 = arith.cmpi ne, %1, %c0_i32_0 : i32
    scf.if %2 {
      %cst_10 = arith.constant 0.000000e+00 : f32
      %13 = vector.broadcast %cst_10 : f32 to vector<16x96xf32>
      %c0_11 = arith.constant 0 : index
      %c0_12 = arith.constant 0 : index
      %14 = vector.load %arg6[%c0_11, %c0_12] : memref<16x96xf32, #tpu.memory_space<vmem>>, vector<16x96xf32>
      tpu.vector_store %arg6[%c0_11, %c0_12], %13 {strides = array<i32>} : memref<16x96xf32, #tpu.memory_space<vmem>>, vector<16x96xf32>,
    } else {
    }
    %c0 = arith.constant 0 : index
    %c0_1 = arith.constant 0 : index
    %3 = vector.load %arg6[%c0, %c0_1] : memref<16x96xf32, #tpu.memory_space<vmem>>, vector<16x96xf32>
    %c0_2 = arith.constant 0 : index
    %c0_3 = arith.constant 0 : index
    %4 = vector.load %arg3[%c0_2, %c0_3] : memref<16x32xf32, #tpu.memory_space<vmem>>, vector<16x32xf32>
    %5 = arith.truncf %4 : vector<16x32xf32> to vector<16x32xbf16>
    %c0_4 = arith.constant 0 : index
    %c0_5 = arith.constant 0 : index
    %6 = vector.load %arg4[%c0_4, %c0_5] : memref<32x96xbf16, #tpu.memory_space<vmem>>, vector<32x96xbf16>
    %cst = arith.constant dense<0.000000e+00> : vector<16x96xf32>
    %7 = tpu.matmul %5, %6, %cst {dimension_numbers = #tpu.dot_dimension_numbers<[1], [0], [0], [1], [0, 0, 1, 1], [], []>} : vector<16x32xbf16>, vector<32x96xbf16>, vector<16x96xf32> -> vector<16x96xf32>
    %8 = arith.addf %3, %7 : vector<16x96xf32>
    %c0_6 = arith.constant 0 : index
    %c0_7 = arith.constant 0 : index
    %9 = vector.load %arg6[%c0_6, %c0_7] : memref<16x96xf32, #tpu.memory_space<vmem>>, vector<16x96xf32>
    tpu.vector_store %arg6[%c0_6, %c0_7], %8 {strides = array<i32>} : memref<16x96xf32, #tpu.memory_space<vmem>>, vector<16x96xf32>,
    %c0_i32_8 = arith.constant 0 : i32
    %10 = arith.cmpi eq, %arg2, %c0_i32_8 : i32
    %11 = arith.extui %10 : i1 to i32
    %c0_i32_9 = arith.constant 0 : i32
    %12 = arith.cmpi ne, %11, %c0_i32_9 : i32
    scf.if %12 {
      %c0_10 = arith.constant 0 : index
      %c0_11 = arith.constant 0 : index
      %13 = vector.load %arg6[%c0_10, %c0_11] : memref<16x96xf32, #tpu.memory_space<vmem>>, vector<16x96xf32>
      %c0_12 = arith.constant 0 : index
      %c0_13 = arith.constant 0 : index
      %14 = vector.load %arg5[%c0_12, %c0_13] : memref<1x96xf32, #tpu.memory_space<vmem>>, vector<1x96xf32>
      %15 = vector.broadcast %14 : vector<1x96xf32> to vector<16x96xf32>
      %16 = arith.addf %13, %15 : vector<16x96xf32>
      %c0_14 = arith.constant 0 : index
      %c0_15 = arith.constant 0 : index
      %17 = vector.load %arg6[%c0_14, %c0_15] : memref<16x96xf32, #tpu.memory_space<vmem>>, vector<16x96xf32>
      tpu.vector_store %arg6[%c0_14, %c0_15], %16 {strides = array<i32>} : memref<16x96xf32, #tpu.memory_space<vmem>>, vector<16x96xf32>,
    } else {
    }
    return
  }
  func.func @transform_0(%arg0: i32, %arg1: i32, %arg2: i32) -> (i32, i32) {
    %c0_i32 = arith.constant 0 : i32
    return %arg0, %arg2 : i32, i32
  }
  func.func @transform_1(%arg0: i32, %arg1: i32, %arg2: i32) -> (i32, i32) {
    %c0_i32 = arith.constant 0 : i32
    return %arg2, %arg1 : i32, i32
  }
  func.func @transform_2(%arg0: i32, %arg1: i32, %arg2: i32) -> (i32, i32) {
    %c0_i32 = arith.constant 0 : i32
    %c0_i32_0 = arith.constant 0 : i32
    return %c0_i32, %arg1 : i32, i32
  }
  func.func @transform_3(%arg0: i32, %arg1: i32, %arg2: i32) -> (i32, i32) {
    %c0_i32 = arith.constant 0 : i32
    return %arg0, %arg1 : i32, i32
  }
}

module attributes {stable_mosaic.version = 11 : i64} {
  func.func @_mha_kernel(%arg0: i32, %arg1: i32, %arg2: memref<1x8x96xf32, #tpu.memory_space<vmem>>, %arg3: memref<1x8x96xf32, #tpu.memory_space<vmem>>, %arg4: memref<1x8x32xf32, #tpu.memory_space<vmem>>) attributes {dimension_semantics = [#tpu.dimension_semantics<parallel>, #tpu.dimension_semantics<parallel>], iteration_bounds = array<i64: 2, 1>, scalar_prefetch = 0 : i64, scratch_operands = 0 : i64, tpu.core_type = #tpu.core_type<tc>, window_params = [{transform_indices = @transform_0, window_bounds = array<i64: 1, 8, 96>}, {transform_indices = @transform_1, window_bounds = array<i64: 1, 8, 96>}, {transform_indices = @transform_2, window_bounds = array<i64: 1, 8, 32>}]} {
    %c0 = arith.constant 0 : index
    %c0_0 = arith.constant 0 : index
    %c0_1 = arith.constant 0 : index
    %0 = vector.load %arg2[%c0, %c0_0, %c0_1] : memref<1x8x96xf32, #tpu.memory_space<vmem>>, vector<1x8x8xf32>
    %1 = vector.shape_cast %0 : vector<1x8x8xf32> to vector<8x8xf32>
    %2 = arith.truncf %1 : vector<8x8xf32> to vector<8x8xbf16>
    %c0_2 = arith.constant 0 : index
    %c0_3 = arith.constant 0 : index
    %c32 = arith.constant 32 : index
    %3 = vector.load %arg3[%c0_2, %c0_3, %c32] : memref<1x8x96xf32, #tpu.memory_space<vmem>>, vector<1x8x8xf32>
    %4 = vector.shape_cast %3 : vector<1x8x8xf32> to vector<8x8xf32>
    %5 = arith.truncf %4 : vector<8x8xf32> to vector<8x8xbf16>
    %c0_4 = arith.constant 0 : index
    %c0_5 = arith.constant 0 : index
    %c64 = arith.constant 64 : index
    %6 = vector.load %arg3[%c0_4, %c0_5, %c64] : memref<1x8x96xf32, #tpu.memory_space<vmem>>, vector<1x8x8xf32>
    %7 = vector.shape_cast %6 : vector<1x8x8xf32> to vector<8x8xf32>
    %8 = arith.truncf %7 : vector<8x8xf32> to vector<8x8xbf16>
    %cst = arith.constant dense<0.000000e+00> : vector<8x8xf32>
    %9 = tpu.matmul %2, %5, %cst {dimension_numbers = #tpu.dot_dimension_numbers<[1], [1], [0], [0], [0, 0, 1, 0], [], []>} : vector<8x8xbf16>, vector<8x8xbf16>, vector<8x8xf32> -> vector<8x8xf32>
    %cst_6 = arith.constant 0.353553385 : f32
    %10 = vector.broadcast %cst_6 : f32 to vector<8x8xf32>
    %11 = arith.mulf %9, %10 : vector<8x8xf32>
    %cst_7 = arith.constant dense<0xFF800000> : vector<8xf32>
    %12 = vector.multi_reduction <maximumf>, %11, %cst_7 [1] : vector<8x8xf32> to vector<8xf32>
    %13 = vector.shape_cast %12 : vector<8xf32> to vector<8x1xf32>
    %14 = vector.broadcast %13 : vector<8x1xf32> to vector<8x8xf32>
    %15 = arith.subf %11, %14 : vector<8x8xf32>
    %16 = math.exp %15 : vector<8x8xf32>
    %cst_8 = arith.constant dense<0.000000e+00> : vector<8xf32>
    %17 = vector.multi_reduction <add>, %16, %cst_8 [1] : vector<8x8xf32> to vector<8xf32>
    %18 = vector.shape_cast %17 : vector<8xf32> to vector<8x1xf32>
    %19 = tpu.reciprocal %18 {approx = true} : vector<8x1xf32> -> vector<8x1xf32>
    %20 = vector.broadcast %19 : vector<8x1xf32> to vector<8x8xf32>
    %21 = arith.mulf %16, %20 : vector<8x8xf32>
    %22 = arith.truncf %21 : vector<8x8xf32> to vector<8x8xbf16>
    %cst_9 = arith.constant dense<0.000000e+00> : vector<8x8xf32>
    %23 = tpu.matmul %22, %8, %cst_9 {dimension_numbers = #tpu.dot_dimension_numbers<[1], [0], [0], [1], [0, 0, 1, 1], [], []>} : vector<8x8xbf16>, vector<8x8xbf16>, vector<8x8xf32> -> vector<8x8xf32>
    %c0_10 = arith.constant 0 : index
    %c0_11 = arith.constant 0 : index
    %c0_12 = arith.constant 0 : index
    %24 = vector.load %arg4[%c0_10, %c0_11, %c0_12] : memref<1x8x32xf32, #tpu.memory_space<vmem>>, vector<1x8x8xf32>
    %25 = vector.shape_cast %24 : vector<1x8x8xf32> to vector<8x8xf32>
    %26 = vector.shape_cast %23 : vector<8x8xf32> to vector<1x8x8xf32>
    tpu.vector_store %arg4[%c0_10, %c0_11, %c0_12], %26 {strides = array<i32>} : memref<1x8x32xf32, #tpu.memory_space<vmem>>, vector<1x8x8xf32>,
    %c0_13 = arith.constant 0 : index
    %c0_14 = arith.constant 0 : index
    %c8 = arith.constant 8 : index
    %27 = vector.load %arg2[%c0_13, %c0_14, %c8] : memref<1x8x96xf32, #tpu.memory_space<vmem>>, vector<1x8x8xf32>
    %28 = vector.shape_cast %27 : vector<1x8x8xf32> to vector<8x8xf32>
    %29 = arith.truncf %28 : vector<8x8xf32> to vector<8x8xbf16>
    %c0_15 = arith.constant 0 : index
    %c0_16 = arith.constant 0 : index
    %c40 = arith.constant 40 : index
    %30 = vector.load %arg3[%c0_15, %c0_16, %c40] : memref<1x8x96xf32, #tpu.memory_space<vmem>>, vector<1x8x8xf32>
    %31 = vector.shape_cast %30 : vector<1x8x8xf32> to vector<8x8xf32>
    %32 = arith.truncf %31 : vector<8x8xf32> to vector<8x8xbf16>
    %c0_17 = arith.constant 0 : index
    %c0_18 = arith.constant 0 : index
    %c72 = arith.constant 72 : index
    %33 = vector.load %arg3[%c0_17, %c0_18, %c72] : memref<1x8x96xf32, #tpu.memory_space<vmem>>, vector<1x8x8xf32>
    %34 = vector.shape_cast %33 : vector<1x8x8xf32> to vector<8x8xf32>
    %35 = arith.truncf %34 : vector<8x8xf32> to vector<8x8xbf16>
    %cst_19 = arith.constant dense<0.000000e+00> : vector<8x8xf32>
    %36 = tpu.matmul %29, %32, %cst_19 {dimension_numbers = #tpu.dot_dimension_numbers<[1], [1], [0], [0], [0, 0, 1, 0], [], []>} : vector<8x8xbf16>, vector<8x8xbf16>, vector<8x8xf32> -> vector<8x8xf32>
    %cst_20 = arith.constant 0.353553385 : f32
    %37 = vector.broadcast %cst_20 : f32 to vector<8x8xf32>
    %38 = arith.mulf %36, %37 : vector<8x8xf32>
    %cst_21 = arith.constant dense<0xFF800000> : vector<8xf32>
    %39 = vector.multi_reduction <maximumf>, %38, %cst_21 [1] : vector<8x8xf32> to vector<8xf32>
    %40 = vector.shape_cast %39 : vector<8xf32> to vector<8x1xf32>
    %41 = vector.broadcast %40 : vector<8x1xf32> to vector<8x8xf32>
    %42 = arith.subf %38, %41 : vector<8x8xf32>
    %43 = math.exp %42 : vector<8x8xf32>
    %cst_22 = arith.constant dense<0.000000e+00> : vector<8xf32>
    %44 = vector.multi_reduction <add>, %43, %cst_22 [1] : vector<8x8xf32> to vector<8xf32>
    %45 = vector.shape_cast %44 : vector<8xf32> to vector<8x1xf32>
    %46 = tpu.reciprocal %45 {approx = true} : vector<8x1xf32> -> vector<8x1xf32>
    %47 = vector.broadcast %46 : vector<8x1xf32> to vector<8x8xf32>
    %48 = arith.mulf %43, %47 : vector<8x8xf32>
    %49 = arith.truncf %48 : vector<8x8xf32> to vector<8x8xbf16>
    %cst_23 = arith.constant dense<0.000000e+00> : vector<8x8xf32>
    %50 = tpu.matmul %49, %35, %cst_23 {dimension_numbers = #tpu.dot_dimension_numbers<[1], [0], [0], [1], [0, 0, 1, 1], [], []>} : vector<8x8xbf16>, vector<8x8xbf16>, vector<8x8xf32> -> vector<8x8xf32>
    %c0_24 = arith.constant 0 : index
    %c0_25 = arith.constant 0 : index
    %c8_26 = arith.constant 8 : index
    %51 = vector.load %arg4[%c0_24, %c0_25, %c8_26] : memref<1x8x32xf32, #tpu.memory_space<vmem>>, vector<1x8x8xf32>
    %52 = vector.shape_cast %51 : vector<1x8x8xf32> to vector<8x8xf32>
    %53 = vector.shape_cast %50 : vector<8x8xf32> to vector<1x8x8xf32>
    tpu.vector_store %arg4[%c0_24, %c0_25, %c8_26], %53 {strides = array<i32>} : memref<1x8x32xf32, #tpu.memory_space<vmem>>, vector<1x8x8xf32>,
    %c0_27 = arith.constant 0 : index
    %c0_28 = arith.constant 0 : index
    %c16 = arith.constant 16 : index
    %54 = vector.load %arg2[%c0_27, %c0_28, %c16] : memref<1x8x96xf32, #tpu.memory_space<vmem>>, vector<1x8x8xf32>
    %55 = vector.shape_cast %54 : vector<1x8x8xf32> to vector<8x8xf32>
    %56 = arith.truncf %55 : vector<8x8xf32> to vector<8x8xbf16>
    %c0_29 = arith.constant 0 : index
    %c0_30 = arith.constant 0 : index
    %c48 = arith.constant 48 : index
    %57 = vector.load %arg3[%c0_29, %c0_30, %c48] : memref<1x8x96xf32, #tpu.memory_space<vmem>>, vector<1x8x8xf32>
    %58 = vector.shape_cast %57 : vector<1x8x8xf32> to vector<8x8xf32>
    %59 = arith.truncf %58 : vector<8x8xf32> to vector<8x8xbf16>
    %c0_31 = arith.constant 0 : index
    %c0_32 = arith.constant 0 : index
    %c80 = arith.constant 80 : index
    %60 = vector.load %arg3[%c0_31, %c0_32, %c80] : memref<1x8x96xf32, #tpu.memory_space<vmem>>, vector<1x8x8xf32>
    %61 = vector.shape_cast %60 : vector<1x8x8xf32> to vector<8x8xf32>
    %62 = arith.truncf %61 : vector<8x8xf32> to vector<8x8xbf16>
    %cst_33 = arith.constant dense<0.000000e+00> : vector<8x8xf32>
    %63 = tpu.matmul %56, %59, %cst_33 {dimension_numbers = #tpu.dot_dimension_numbers<[1], [1], [0], [0], [0, 0, 1, 0], [], []>} : vector<8x8xbf16>, vector<8x8xbf16>, vector<8x8xf32> -> vector<8x8xf32>
    %cst_34 = arith.constant 0.353553385 : f32
    %64 = vector.broadcast %cst_34 : f32 to vector<8x8xf32>
    %65 = arith.mulf %63, %64 : vector<8x8xf32>
    %cst_35 = arith.constant dense<0xFF800000> : vector<8xf32>
    %66 = vector.multi_reduction <maximumf>, %65, %cst_35 [1] : vector<8x8xf32> to vector<8xf32>
    %67 = vector.shape_cast %66 : vector<8xf32> to vector<8x1xf32>
    %68 = vector.broadcast %67 : vector<8x1xf32> to vector<8x8xf32>
    %69 = arith.subf %65, %68 : vector<8x8xf32>
    %70 = math.exp %69 : vector<8x8xf32>
    %cst_36 = arith.constant dense<0.000000e+00> : vector<8xf32>
    %71 = vector.multi_reduction <add>, %70, %cst_36 [1] : vector<8x8xf32> to vector<8xf32>
    %72 = vector.shape_cast %71 : vector<8xf32> to vector<8x1xf32>
    %73 = tpu.reciprocal %72 {approx = true} : vector<8x1xf32> -> vector<8x1xf32>
    %74 = vector.broadcast %73 : vector<8x1xf32> to vector<8x8xf32>
    %75 = arith.mulf %70, %74 : vector<8x8xf32>
    %76 = arith.truncf %75 : vector<8x8xf32> to vector<8x8xbf16>
    %cst_37 = arith.constant dense<0.000000e+00> : vector<8x8xf32>
    %77 = tpu.matmul %76, %62, %cst_37 {dimension_numbers = #tpu.dot_dimension_numbers<[1], [0], [0], [1], [0, 0, 1, 1], [], []>} : vector<8x8xbf16>, vector<8x8xbf16>, vector<8x8xf32> -> vector<8x8xf32>
    %c0_38 = arith.constant 0 : index
    %c0_39 = arith.constant 0 : index
    %c16_40 = arith.constant 16 : index
    %78 = vector.load %arg4[%c0_38, %c0_39, %c16_40] : memref<1x8x32xf32, #tpu.memory_space<vmem>>, vector<1x8x8xf32>
    %79 = vector.shape_cast %78 : vector<1x8x8xf32> to vector<8x8xf32>
    %80 = vector.shape_cast %77 : vector<8x8xf32> to vector<1x8x8xf32>
    tpu.vector_store %arg4[%c0_38, %c0_39, %c16_40], %80 {strides = array<i32>} : memref<1x8x32xf32, #tpu.memory_space<vmem>>, vector<1x8x8xf32>,
    %c0_41 = arith.constant 0 : index
    %c0_42 = arith.constant 0 : index
    %c24 = arith.constant 24 : index
    %81 = vector.load %arg2[%c0_41, %c0_42, %c24] : memref<1x8x96xf32, #tpu.memory_space<vmem>>, vector<1x8x8xf32>
    %82 = vector.shape_cast %81 : vector<1x8x8xf32> to vector<8x8xf32>
    %83 = arith.truncf %82 : vector<8x8xf32> to vector<8x8xbf16>
    %c0_43 = arith.constant 0 : index
    %c0_44 = arith.constant 0 : index
    %c56 = arith.constant 56 : index
    %84 = vector.load %arg3[%c0_43, %c0_44, %c56] : memref<1x8x96xf32, #tpu.memory_space<vmem>>, vector<1x8x8xf32>
    %85 = vector.shape_cast %84 : vector<1x8x8xf32> to vector<8x8xf32>
    %86 = arith.truncf %85 : vector<8x8xf32> to vector<8x8xbf16>
    %c0_45 = arith.constant 0 : index
    %c0_46 = arith.constant 0 : index
    %c88 = arith.constant 88 : index
    %87 = vector.load %arg3[%c0_45, %c0_46, %c88] : memref<1x8x96xf32, #tpu.memory_space<vmem>>, vector<1x8x8xf32>
    %88 = vector.shape_cast %87 : vector<1x8x8xf32> to vector<8x8xf32>
    %89 = arith.truncf %88 : vector<8x8xf32> to vector<8x8xbf16>
    %cst_47 = arith.constant dense<0.000000e+00> : vector<8x8xf32>
    %90 = tpu.matmul %83, %86, %cst_47 {dimension_numbers = #tpu.dot_dimension_numbers<[1], [1], [0], [0], [0, 0, 1, 0], [], []>} : vector<8x8xbf16>, vector<8x8xbf16>, vector<8x8xf32> -> vector<8x8xf32>
    %cst_48 = arith.constant 0.353553385 : f32
    %91 = vector.broadcast %cst_48 : f32 to vector<8x8xf32>
    %92 = arith.mulf %90, %91 : vector<8x8xf32>
    %cst_49 = arith.constant dense<0xFF800000> : vector<8xf32>
    %93 = vector.multi_reduction <maximumf>, %92, %cst_49 [1] : vector<8x8xf32> to vector<8xf32>
    %94 = vector.shape_cast %93 : vector<8xf32> to vector<8x1xf32>
    %95 = vector.broadcast %94 : vector<8x1xf32> to vector<8x8xf32>
    %96 = arith.subf %92, %95 : vector<8x8xf32>
    %97 = math.exp %96 : vector<8x8xf32>
    %cst_50 = arith.constant dense<0.000000e+00> : vector<8xf32>
    %98 = vector.multi_reduction <add>, %97, %cst_50 [1] : vector<8x8xf32> to vector<8xf32>
    %99 = vector.shape_cast %98 : vector<8xf32> to vector<8x1xf32>
    %100 = tpu.reciprocal %99 {approx = true} : vector<8x1xf32> -> vector<8x1xf32>
    %101 = vector.broadcast %100 : vector<8x1xf32> to vector<8x8xf32>
    %102 = arith.mulf %97, %101 : vector<8x8xf32>
    %103 = arith.truncf %102 : vector<8x8xf32> to vector<8x8xbf16>
    %cst_51 = arith.constant dense<0.000000e+00> : vector<8x8xf32>
    %104 = tpu.matmul %103, %89, %cst_51 {dimension_numbers = #tpu.dot_dimension_numbers<[1], [0], [0], [1], [0, 0, 1, 1], [], []>} : vector<8x8xbf16>, vector<8x8xbf16>, vector<8x8xf32> -> vector<8x8xf32>
    %c0_52 = arith.constant 0 : index
    %c0_53 = arith.constant 0 : index
    %c24_54 = arith.constant 24 : index
    %105 = vector.load %arg4[%c0_52, %c0_53, %c24_54] : memref<1x8x32xf32, #tpu.memory_space<vmem>>, vector<1x8x8xf32>
    %106 = vector.shape_cast %105 : vector<1x8x8xf32> to vector<8x8xf32>
    %107 = vector.shape_cast %104 : vector<8x8xf32> to vector<1x8x8xf32>
    tpu.vector_store %arg4[%c0_52, %c0_53, %c24_54], %107 {strides = array<i32>} : memref<1x8x32xf32, #tpu.memory_space<vmem>>, vector<1x8x8xf32>,
    return
  }
  func.func @transform_0(%arg0: i32, %arg1: i32) -> (i32, i32, i32) {
    %c0_i32 = arith.constant 0 : i32
    %c0_i32_0 = arith.constant 0 : i32
    return %arg0, %arg1, %c0_i32 : i32, i32, i32
  }
  func.func @transform_1(%arg0: i32, %arg1: i32) -> (i32, i32, i32) {
    %c0_i32 = arith.constant 0 : i32
    %c0_i32_0 = arith.constant 0 : i32
    %c0_i32_1 = arith.constant 0 : i32
    return %arg0, %c0_i32, %c0_i32_0 : i32, i32, i32
  }
  func.func @transform_2(%arg0: i32, %arg1: i32) -> (i32, i32, i32) {
    %c0_i32 = arith.constant 0 : i32
    %c0_i32_0 = arith.constant 0 : i32
    return %arg0, %arg1, %c0_i32 : i32, i32, i32
  }
}

module attributes {stable_mosaic.version = 11 : i64} {
  func.func @_linear_res_ln_kernel(%arg0: i32, %arg1: i32, %arg2: memref<16x32xf32, #tpu.memory_space<vmem>>, %arg3: memref<32x32xbf16, #tpu.memory_space<vmem>>, %arg4: memref<1x32xf32, #tpu.memory_space<vmem>>, %arg5: memref<16x32xf32, #tpu.memory_space<vmem>>, %arg6: memref<1x32xf32, #tpu.memory_space<vmem>>, %arg7: memref<1x32xf32, #tpu.memory_space<vmem>>, %arg8: memref<16x32xf32, #tpu.memory_space<vmem>>) attributes {dimension_semantics = [#tpu.dimension_semantics<parallel>, #tpu.dimension_semantics<arbitrary>], iteration_bounds = array<i64: 1, 1>, scalar_prefetch = 0 : i64, scratch_operands = 0 : i64, tpu.core_type = #tpu.core_type<tc>, window_params = [{transform_indices = @transform_0, window_bounds = array<i64: 16, 32>}, {transform_indices = @transform_1, window_bounds = array<i64: 32, 32>}, {pipeline_mode = #tpu.pipeline_mode<synchronous>, transform_indices = @transform_2, window_bounds = array<i64: 1, 32>}, {transform_indices = @transform_3, window_bounds = array<i64: 16, 32>}, {pipeline_mode = #tpu.pipeline_mode<synchronous>, transform_indices = @transform_4, window_bounds = array<i64: 1, 32>}, {pipeline_mode = #tpu.pipeline_mode<synchronous>, transform_indices = @transform_5, window_bounds = array<i64: 1, 32>}, {transform_indices = @transform_6, window_bounds = array<i64: 16, 32>}]} {
    %c0_i32 = arith.constant 0 : i32
    %0 = arith.cmpi eq, %arg1, %c0_i32 : i32
    %1 = arith.extui %0 : i1 to i32
    %c0_i32_0 = arith.constant 0 : i32
    %2 = arith.cmpi ne, %1, %c0_i32_0 : i32
    scf.if %2 {
      %cst_10 = arith.constant 0.000000e+00 : f32
      %13 = vector.broadcast %cst_10 : f32 to vector<16x32xf32>
      %c0_11 = arith.constant 0 : index
      %c0_12 = arith.constant 0 : index
      %14 = vector.load %arg8[%c0_11, %c0_12] : memref<16x32xf32, #tpu.memory_space<vmem>>, vector<16x32xf32>
      tpu.vector_store %arg8[%c0_11, %c0_12], %13 {strides = array<i32>} : memref<16x32xf32, #tpu.memory_space<vmem>>, vector<16x32xf32>,
    } else {
    }
    %c0 = arith.constant 0 : index
    %c0_1 = arith.constant 0 : index
    %3 = vector.load %arg8[%c0, %c0_1] : memref<16x32xf32, #tpu.memory_space<vmem>>, vector<16x32xf32>
    %c0_2 = arith.constant 0 : index
    %c0_3 = arith.constant 0 : index
    %4 = vector.load %arg2[%c0_2, %c0_3] : memref<16x32xf32, #tpu.memory_space<vmem>>, vector<16x32xf32>
    %5 = arith.truncf %4 : vector<16x32xf32> to vector<16x32xbf16>
    %c0_4 = arith.constant 0 : index
    %c0_5 = arith.constant 0 : index
    %6 = vector.load %arg3[%c0_4, %c0_5] : memref<32x32xbf16, #tpu.memory_space<vmem>>, vector<32x32xbf16>
    %cst = arith.constant dense<0.000000e+00> : vector<16x32xf32>
    %7 = tpu.matmul %5, %6, %cst {dimension_numbers = #tpu.dot_dimension_numbers<[1], [0], [0], [1], [0, 0, 1, 1], [], []>} : vector<16x32xbf16>, vector<32x32xbf16>, vector<16x32xf32> -> vector<16x32xf32>
    %8 = arith.addf %3, %7 : vector<16x32xf32>
    %c0_6 = arith.constant 0 : index
    %c0_7 = arith.constant 0 : index
    %9 = vector.load %arg8[%c0_6, %c0_7] : memref<16x32xf32, #tpu.memory_space<vmem>>, vector<16x32xf32>
    tpu.vector_store %arg8[%c0_6, %c0_7], %8 {strides = array<i32>} : memref<16x32xf32, #tpu.memory_space<vmem>>, vector<16x32xf32>,
    %c0_i32_8 = arith.constant 0 : i32
    %10 = arith.cmpi eq, %arg1, %c0_i32_8 : i32
    %11 = arith.extui %10 : i1 to i32
    %c0_i32_9 = arith.constant 0 : i32
    %12 = arith.cmpi ne, %11, %c0_i32_9 : i32
    scf.if %12 {
      %c0_10 = arith.constant 0 : index
      %c0_11 = arith.constant 0 : index
      %13 = vector.load %arg8[%c0_10, %c0_11] : memref<16x32xf32, #tpu.memory_space<vmem>>, vector<16x32xf32>
      %c0_12 = arith.constant 0 : index
      %c0_13 = arith.constant 0 : index
      %14 = vector.load %arg4[%c0_12, %c0_13] : memref<1x32xf32, #tpu.memory_space<vmem>>, vector<1x32xf32>
      %15 = vector.broadcast %14 : vector<1x32xf32> to vector<16x32xf32>
      %16 = arith.addf %13, %15 : vector<16x32xf32>
      %c0_14 = arith.constant 0 : index
      %c0_15 = arith.constant 0 : index
      %17 = vector.load %arg5[%c0_14, %c0_15] : memref<16x32xf32, #tpu.memory_space<vmem>>, vector<16x32xf32>
      %18 = arith.addf %16, %17 : vector<16x32xf32>
      %cst_16 = arith.constant dense<0.000000e+00> : vector<16xf32>
      %19 = vector.multi_reduction <add>, %18, %cst_16 [1] : vector<16x32xf32> to vector<16xf32>
      %20 = vector.shape_cast %19 : vector<16xf32> to vector<16x1xf32>
      %cst_17 = arith.constant 3.200000e+01 : f32
      %21 = vector.broadcast %cst_17 : f32 to vector<16x1xf32>
      %22 = arith.divf %20, %21 : vector<16x1xf32>
      %23 = vector.broadcast %22 : vector<16x1xf32> to vector<16x32xf32>
      %24 = arith.subf %18, %23 : vector<16x32xf32>
      %25 = arith.mulf %24, %24 : vector<16x32xf32>
      %cst_18 = arith.constant dense<0.000000e+00> : vector<16xf32>
      %26 = vector.multi_reduction <add>, %25, %cst_18 [1] : vector<16x32xf32> to vector<16xf32>
      %27 = vector.shape_cast %26 : vector<16xf32> to vector<16x1xf32>
      %cst_19 = arith.constant 3.200000e+01 : f32
      %28 = vector.broadcast %cst_19 : f32 to vector<16x1xf32>
      %29 = arith.divf %27, %28 : vector<16x1xf32>
      %cst_20 = arith.constant 9.99999974E-6 : f32
      %30 = vector.broadcast %cst_20 : f32 to vector<16x1xf32>
      %31 = arith.addf %29, %30 : vector<16x1xf32>
      %32 = math.rsqrt %31 : vector<16x1xf32>
      %33 = vector.broadcast %32 : vector<16x1xf32> to vector<16x32xf32>
      %34 = arith.mulf %24, %33 : vector<16x32xf32>
      %c0_21 = arith.constant 0 : index
      %c0_22 = arith.constant 0 : index
      %35 = vector.load %arg6[%c0_21, %c0_22] : memref<1x32xf32, #tpu.memory_space<vmem>>, vector<1x32xf32>
      %36 = vector.broadcast %35 : vector<1x32xf32> to vector<16x32xf32>
      %37 = arith.mulf %34, %36 : vector<16x32xf32>
      %c0_23 = arith.constant 0 : index
      %c0_24 = arith.constant 0 : index
      %38 = vector.load %arg7[%c0_23, %c0_24] : memref<1x32xf32, #tpu.memory_space<vmem>>, vector<1x32xf32>
      %39 = vector.broadcast %38 : vector<1x32xf32> to vector<16x32xf32>
      %40 = arith.addf %37, %39 : vector<16x32xf32>
      %c0_25 = arith.constant 0 : index
      %c0_26 = arith.constant 0 : index
      %41 = vector.load %arg8[%c0_25, %c0_26] : memref<16x32xf32, #tpu.memory_space<vmem>>, vector<16x32xf32>
      tpu.vector_store %arg8[%c0_25, %c0_26], %40 {strides = array<i32>} : memref<16x32xf32, #tpu.memory_space<vmem>>, vector<16x32xf32>,
    } else {
    }
    return
  }
  func.func @transform_0(%arg0: i32, %arg1: i32) -> (i32, i32) {
    %c0_i32 = arith.constant 0 : i32
    return %arg0, %arg1 : i32, i32
  }
  func.func @transform_1(%arg0: i32, %arg1: i32) -> (i32, i32) {
    %c0_i32 = arith.constant 0 : i32
    %c0_i32_0 = arith.constant 0 : i32
    return %arg1, %c0_i32 : i32, i32
  }
  func.func @transform_2(%arg0: i32, %arg1: i32) -> (i32, i32) {
    %c0_i32 = arith.constant 0 : i32
    %c0_i32_0 = arith.constant 0 : i32
    %c0_i32_1 = arith.constant 0 : i32
    return %c0_i32, %c0_i32_0 : i32, i32
  }
  func.func @transform_3(%arg0: i32, %arg1: i32) -> (i32, i32) {
    %c0_i32 = arith.constant 0 : i32
    %c0_i32_0 = arith.constant 0 : i32
    return %arg0, %c0_i32 : i32, i32
  }
  func.func @transform_4(%arg0: i32, %arg1: i32) -> (i32, i32) {
    %c0_i32 = arith.constant 0 : i32
    %c0_i32_0 = arith.constant 0 : i32
    %c0_i32_1 = arith.constant 0 : i32
    return %c0_i32, %c0_i32_0 : i32, i32
  }
  func.func @transform_5(%arg0: i32, %arg1: i32) -> (i32, i32) {
    %c0_i32 = arith.constant 0 : i32
    %c0_i32_0 = arith.constant 0 : i32
    %c0_i32_1 = arith.constant 0 : i32
    return %c0_i32, %c0_i32_0 : i32, i32
  }
  func.func @transform_6(%arg0: i32, %arg1: i32) -> (i32, i32) {
    %c0_i32 = arith.constant 0 : i32
    %c0_i32_0 = arith.constant 0 : i32
    return %arg0, %c0_i32 : i32, i32
  }
}

module attributes {stable_mosaic.version = 11 : i64} {
  func.func @_ffn_res_ln_kernel(%arg0: i32, %arg1: i32, %arg2: memref<16x32xf32, #tpu.memory_space<vmem>>, %arg3: memref<32x512xbf16, #tpu.memory_space<vmem>>, %arg4: memref<1x512xf32, #tpu.memory_space<vmem>>, %arg5: memref<512x32xbf16, #tpu.memory_space<vmem>>, %arg6: memref<1x32xf32, #tpu.memory_space<vmem>>, %arg7: memref<1x32xf32, #tpu.memory_space<vmem>>, %arg8: memref<1x32xf32, #tpu.memory_space<vmem>>, %arg9: memref<16x32xf32, #tpu.memory_space<vmem>>) attributes {dimension_semantics = [#tpu.dimension_semantics<parallel>, #tpu.dimension_semantics<arbitrary>], iteration_bounds = array<i64: 1, 4>, scalar_prefetch = 0 : i64, scratch_operands = 0 : i64, tpu.core_type = #tpu.core_type<tc>, window_params = [{transform_indices = @transform_0, window_bounds = array<i64: 16, 32>}, {transform_indices = @transform_1, window_bounds = array<i64: 32, 512>}, {transform_indices = @transform_2, window_bounds = array<i64: 1, 512>}, {transform_indices = @transform_3, window_bounds = array<i64: 512, 32>}, {pipeline_mode = #tpu.pipeline_mode<synchronous>, transform_indices = @transform_4, window_bounds = array<i64: 1, 32>}, {pipeline_mode = #tpu.pipeline_mode<synchronous>, transform_indices = @transform_5, window_bounds = array<i64: 1, 32>}, {pipeline_mode = #tpu.pipeline_mode<synchronous>, transform_indices = @transform_6, window_bounds = array<i64: 1, 32>}, {transform_indices = @transform_7, window_bounds = array<i64: 16, 32>}]} {
    %c0_i32 = arith.constant 0 : i32
    %0 = arith.cmpi eq, %arg1, %c0_i32 : i32
    %1 = arith.extui %0 : i1 to i32
    %c0_i32_0 = arith.constant 0 : i32
    %2 = arith.cmpi ne, %1, %c0_i32_0 : i32
    scf.if %2 {
      %cst_15 = arith.constant 0.000000e+00 : f32
      %21 = vector.broadcast %cst_15 : f32 to vector<16x32xf32>
      %c0_16 = arith.constant 0 : index
      %c0_17 = arith.constant 0 : index
      %22 = vector.load %arg9[%c0_16, %c0_17] : memref<16x32xf32, #tpu.memory_space<vmem>>, vector<16x32xf32>
      tpu.vector_store %arg9[%c0_16, %c0_17], %21 {strides = array<i32>} : memref<16x32xf32, #tpu.memory_space<vmem>>, vector<16x32xf32>,
    } else {
    }
    %c0 = arith.constant 0 : index
    %c0_1 = arith.constant 0 : index
    %3 = vector.load %arg2[%c0, %c0_1] : memref<16x32xf32, #tpu.memory_space<vmem>>, vector<16x32xf32>
    %4 = arith.truncf %3 : vector<16x32xf32> to vector<16x32xbf16>
    %c0_2 = arith.constant 0 : index
    %c0_3 = arith.constant 0 : index
    %5 = vector.load %arg3[%c0_2, %c0_3] : memref<32x512xbf16, #tpu.memory_space<vmem>>, vector<32x512xbf16>
    %cst = arith.constant dense<0.000000e+00> : vector<16x512xf32>
    %6 = tpu.matmul %4, %5, %cst {dimension_numbers = #tpu.dot_dimension_numbers<[1], [0], [0], [1], [0, 0, 1, 1], [], []>} : vector<16x32xbf16>, vector<32x512xbf16>, vector<16x512xf32> -> vector<16x512xf32>
    %c0_4 = arith.constant 0 : index
    %c0_5 = arith.constant 0 : index
    %7 = vector.load %arg4[%c0_4, %c0_5] : memref<1x512xf32, #tpu.memory_space<vmem>>, vector<1x512xf32>
    %8 = vector.broadcast %7 : vector<1x512xf32> to vector<16x512xf32>
    %9 = arith.addf %6, %8 : vector<16x512xf32>
    %cst_6 = arith.constant 0.000000e+00 : f32
    %10 = vector.broadcast %cst_6 : f32 to vector<16x512xf32>
    %11 = arith.maximumf %9, %10 : vector<16x512xf32>
    %12 = arith.truncf %11 : vector<16x512xf32> to vector<16x512xbf16>
    %c0_7 = arith.constant 0 : index
    %c0_8 = arith.constant 0 : index
    %13 = vector.load %arg9[%c0_7, %c0_8] : memref<16x32xf32, #tpu.memory_space<vmem>>, vector<16x32xf32>
    %c0_9 = arith.constant 0 : index
    %c0_10 = arith.constant 0 : index
    %14 = vector.load %arg5[%c0_9, %c0_10] : memref<512x32xbf16, #tpu.memory_space<vmem>>, vector<512x32xbf16>
    %cst_11 = arith.constant dense<0.000000e+00> : vector<16x32xf32>
    %15 = tpu.matmul %12, %14, %cst_11 {dimension_numbers = #tpu.dot_dimension_numbers<[1], [0], [0], [1], [0, 0, 1, 1], [], []>} : vector<16x512xbf16>, vector<512x32xbf16>, vector<16x32xf32> -> vector<16x32xf32>
    %16 = arith.addf %13, %15 : vector<16x32xf32>
    %c0_12 = arith.constant 0 : index
    %c0_13 = arith.constant 0 : index
    %17 = vector.load %arg9[%c0_12, %c0_13] : memref<16x32xf32, #tpu.memory_space<vmem>>, vector<16x32xf32>
    tpu.vector_store %arg9[%c0_12, %c0_13], %16 {strides = array<i32>} : memref<16x32xf32, #tpu.memory_space<vmem>>, vector<16x32xf32>,
    %c3_i32 = arith.constant 3 : i32
    %18 = arith.cmpi eq, %arg1, %c3_i32 : i32
    %19 = arith.extui %18 : i1 to i32
    %c0_i32_14 = arith.constant 0 : i32
    %20 = arith.cmpi ne, %19, %c0_i32_14 : i32
    scf.if %20 {
      %c0_15 = arith.constant 0 : index
      %c0_16 = arith.constant 0 : index
      %21 = vector.load %arg9[%c0_15, %c0_16] : memref<16x32xf32, #tpu.memory_space<vmem>>, vector<16x32xf32>
      %c0_17 = arith.constant 0 : index
      %c0_18 = arith.constant 0 : index
      %22 = vector.load %arg6[%c0_17, %c0_18] : memref<1x32xf32, #tpu.memory_space<vmem>>, vector<1x32xf32>
      %23 = vector.broadcast %22 : vector<1x32xf32> to vector<16x32xf32>
      %24 = arith.addf %21, %23 : vector<16x32xf32>
      %c0_19 = arith.constant 0 : index
      %c0_20 = arith.constant 0 : index
      %25 = vector.load %arg2[%c0_19, %c0_20] : memref<16x32xf32, #tpu.memory_space<vmem>>, vector<16x32xf32>
      %26 = arith.addf %24, %25 : vector<16x32xf32>
      %cst_21 = arith.constant dense<0.000000e+00> : vector<16xf32>
      %27 = vector.multi_reduction <add>, %26, %cst_21 [1] : vector<16x32xf32> to vector<16xf32>
      %28 = vector.shape_cast %27 : vector<16xf32> to vector<16x1xf32>
      %cst_22 = arith.constant 3.200000e+01 : f32
      %29 = vector.broadcast %cst_22 : f32 to vector<16x1xf32>
      %30 = arith.divf %28, %29 : vector<16x1xf32>
      %31 = vector.broadcast %30 : vector<16x1xf32> to vector<16x32xf32>
      %32 = arith.subf %26, %31 : vector<16x32xf32>
      %33 = arith.mulf %32, %32 : vector<16x32xf32>
      %cst_23 = arith.constant dense<0.000000e+00> : vector<16xf32>
      %34 = vector.multi_reduction <add>, %33, %cst_23 [1] : vector<16x32xf32> to vector<16xf32>
      %35 = vector.shape_cast %34 : vector<16xf32> to vector<16x1xf32>
      %cst_24 = arith.constant 3.200000e+01 : f32
      %36 = vector.broadcast %cst_24 : f32 to vector<16x1xf32>
      %37 = arith.divf %35, %36 : vector<16x1xf32>
      %cst_25 = arith.constant 9.99999974E-6 : f32
      %38 = vector.broadcast %cst_25 : f32 to vector<16x1xf32>
      %39 = arith.addf %37, %38 : vector<16x1xf32>
      %40 = math.rsqrt %39 : vector<16x1xf32>
      %41 = vector.broadcast %40 : vector<16x1xf32> to vector<16x32xf32>
      %42 = arith.mulf %32, %41 : vector<16x32xf32>
      %c0_26 = arith.constant 0 : index
      %c0_27 = arith.constant 0 : index
      %43 = vector.load %arg7[%c0_26, %c0_27] : memref<1x32xf32, #tpu.memory_space<vmem>>, vector<1x32xf32>
      %44 = vector.broadcast %43 : vector<1x32xf32> to vector<16x32xf32>
      %45 = arith.mulf %42, %44 : vector<16x32xf32>
      %c0_28 = arith.constant 0 : index
      %c0_29 = arith.constant 0 : index
      %46 = vector.load %arg8[%c0_28, %c0_29] : memref<1x32xf32, #tpu.memory_space<vmem>>, vector<1x32xf32>
      %47 = vector.broadcast %46 : vector<1x32xf32> to vector<16x32xf32>
      %48 = arith.addf %45, %47 : vector<16x32xf32>
      %c0_30 = arith.constant 0 : index
      %c0_31 = arith.constant 0 : index
      %49 = vector.load %arg9[%c0_30, %c0_31] : memref<16x32xf32, #tpu.memory_space<vmem>>, vector<16x32xf32>
      tpu.vector_store %arg9[%c0_30, %c0_31], %48 {strides = array<i32>} : memref<16x32xf32, #tpu.memory_space<vmem>>, vector<16x32xf32>,
    } else {
    }
    return
  }
  func.func @transform_0(%arg0: i32, %arg1: i32) -> (i32, i32) {
    %c0_i32 = arith.constant 0 : i32
    %c0_i32_0 = arith.constant 0 : i32
    return %arg0, %c0_i32 : i32, i32
  }
  func.func @transform_1(%arg0: i32, %arg1: i32) -> (i32, i32) {
    %c0_i32 = arith.constant 0 : i32
    %c0_i32_0 = arith.constant 0 : i32
    return %c0_i32, %arg1 : i32, i32
  }
  func.func @transform_2(%arg0: i32, %arg1: i32) -> (i32, i32) {
    %c0_i32 = arith.constant 0 : i32
    %c0_i32_0 = arith.constant 0 : i32
    return %c0_i32, %arg1 : i32, i32
  }
  func.func @transform_3(%arg0: i32, %arg1: i32) -> (i32, i32) {
    %c0_i32 = arith.constant 0 : i32
    %c0_i32_0 = arith.constant 0 : i32
    return %arg1, %c0_i32 : i32, i32
  }
  func.func @transform_4(%arg0: i32, %arg1: i32) -> (i32, i32) {
    %c0_i32 = arith.constant 0 : i32
    %c0_i32_0 = arith.constant 0 : i32
    %c0_i32_1 = arith.constant 0 : i32
    return %c0_i32, %c0_i32_0 : i32, i32
  }
  func.func @transform_5(%arg0: i32, %arg1: i32) -> (i32, i32) {
    %c0_i32 = arith.constant 0 : i32
    %c0_i32_0 = arith.constant 0 : i32
    %c0_i32_1 = arith.constant 0 : i32
    return %c0_i32, %c0_i32_0 : i32, i32
  }
  func.func @transform_6(%arg0: i32, %arg1: i32) -> (i32, i32) {
    %c0_i32 = arith.constant 0 : i32
    %c0_i32_0 = arith.constant 0 : i32
    %c0_i32_1 = arith.constant 0 : i32
    return %c0_i32, %c0_i32_0 : i32, i32
  }
  func.func @transform_7(%arg0: i32, %arg1: i32) -> (i32, i32) {
    %c0_i32 = arith.constant 0 : i32
    %c0_i32_0 = arith.constant 0 : i32
    return %arg0, %c0_i32 : i32, i32
  }
}

module attributes {stable_mosaic.version = 11 : i64} {
  func.func @_ln_kernel(%arg0: i32, %arg1: memref<16x32xf32, #tpu.memory_space<vmem>>, %arg2: memref<1x32xf32, #tpu.memory_space<vmem>>, %arg3: memref<1x32xf32, #tpu.memory_space<vmem>>, %arg4: memref<16x32xf32, #tpu.memory_space<vmem>>) attributes {dimension_semantics = [#tpu.dimension_semantics<parallel>], iteration_bounds = array<i64: 1>, scalar_prefetch = 0 : i64, scratch_operands = 0 : i64, tpu.core_type = #tpu.core_type<tc>, window_params = [{transform_indices = @transform_0, window_bounds = array<i64: 16, 32>}, {pipeline_mode = #tpu.pipeline_mode<synchronous>, transform_indices = @transform_1, window_bounds = array<i64: 1, 32>}, {pipeline_mode = #tpu.pipeline_mode<synchronous>, transform_indices = @transform_2, window_bounds = array<i64: 1, 32>}, {transform_indices = @transform_3, window_bounds = array<i64: 16, 32>}]} {
    %c0 = arith.constant 0 : index
    %c0_0 = arith.constant 0 : index
    %0 = vector.load %arg1[%c0, %c0_0] : memref<16x32xf32, #tpu.memory_space<vmem>>, vector<16x32xf32>
    %cst = arith.constant dense<0.000000e+00> : vector<16xf32>
    %1 = vector.multi_reduction <add>, %0, %cst [1] : vector<16x32xf32> to vector<16xf32>
    %2 = vector.shape_cast %1 : vector<16xf32> to vector<16x1xf32>
    %cst_1 = arith.constant 3.200000e+01 : f32
    %3 = vector.broadcast %cst_1 : f32 to vector<16x1xf32>
    %4 = arith.divf %2, %3 : vector<16x1xf32>
    %5 = vector.broadcast %4 : vector<16x1xf32> to vector<16x32xf32>
    %6 = arith.subf %0, %5 : vector<16x32xf32>
    %7 = arith.mulf %6, %6 : vector<16x32xf32>
    %cst_2 = arith.constant dense<0.000000e+00> : vector<16xf32>
    %8 = vector.multi_reduction <add>, %7, %cst_2 [1] : vector<16x32xf32> to vector<16xf32>
    %9 = vector.shape_cast %8 : vector<16xf32> to vector<16x1xf32>
    %cst_3 = arith.constant 3.200000e+01 : f32
    %10 = vector.broadcast %cst_3 : f32 to vector<16x1xf32>
    %11 = arith.divf %9, %10 : vector<16x1xf32>
    %cst_4 = arith.constant 9.99999974E-6 : f32
    %12 = vector.broadcast %cst_4 : f32 to vector<16x1xf32>
    %13 = arith.addf %11, %12 : vector<16x1xf32>
    %14 = math.rsqrt %13 : vector<16x1xf32>
    %15 = vector.broadcast %14 : vector<16x1xf32> to vector<16x32xf32>
    %16 = arith.mulf %6, %15 : vector<16x32xf32>
    %c0_5 = arith.constant 0 : index
    %c0_6 = arith.constant 0 : index
    %17 = vector.load %arg2[%c0_5, %c0_6] : memref<1x32xf32, #tpu.memory_space<vmem>>, vector<1x32xf32>
    %18 = vector.broadcast %17 : vector<1x32xf32> to vector<16x32xf32>
    %19 = arith.mulf %16, %18 : vector<16x32xf32>
    %c0_7 = arith.constant 0 : index
    %c0_8 = arith.constant 0 : index
    %20 = vector.load %arg3[%c0_7, %c0_8] : memref<1x32xf32, #tpu.memory_space<vmem>>, vector<1x32xf32>
    %21 = vector.broadcast %20 : vector<1x32xf32> to vector<16x32xf32>
    %22 = arith.addf %19, %21 : vector<16x32xf32>
    %c0_9 = arith.constant 0 : index
    %c0_10 = arith.constant 0 : index
    %23 = vector.load %arg4[%c0_9, %c0_10] : memref<16x32xf32, #tpu.memory_space<vmem>>, vector<16x32xf32>
    tpu.vector_store %arg4[%c0_9, %c0_10], %22 {strides = array<i32>} : memref<16x32xf32, #tpu.memory_space<vmem>>, vector<16x32xf32>,
    return
  }
  func.func @transform_0(%arg0: i32) -> (i32, i32) {
    %c0_i32 = arith.constant 0 : i32
    %c0_i32_0 = arith.constant 0 : i32
    return %arg0, %c0_i32 : i32, i32
  }
  func.func @transform_1(%arg0: i32) -> (i32, i32) {
    %c0_i32 = arith.constant 0 : i32
    %c0_i32_0 = arith.constant 0 : i32
    %c0_i32_1 = arith.constant 0 : i32
    return %c0_i32, %c0_i32_0 : i32, i32
  }
  func.func @transform_2(%arg0: i32) -> (i32, i32) {
    %c0_i32 = arith.constant 0 : i32
    %c0_i32_0 = arith.constant 0 : i32
    %c0_i32_1 = arith.constant 0 : i32
    return %c0_i32, %c0_i32_0 : i32, i32
  }
  func.func @transform_3(%arg0: i32) -> (i32, i32) {
    %c0_i32 = arith.constant 0 : i32
    %c0_i32_0 = arith.constant 0 : i32
    return %arg0, %c0_i32 : i32, i32
  }
}

module attributes {stable_mosaic.version = 11 : i64} {
  func.func @_linear_kernel(%arg0: i32, %arg1: i32, %arg2: i32, %arg3: memref<16x32xf32, #tpu.memory_space<vmem>>, %arg4: memref<32x64xbf16, #tpu.memory_space<vmem>>, %arg5: memref<1x64xf32, #tpu.memory_space<vmem>>, %arg6: memref<16x64xf32, #tpu.memory_space<vmem>>) attributes {dimension_semantics = [#tpu.dimension_semantics<parallel>, #tpu.dimension_semantics<parallel>, #tpu.dimension_semantics<arbitrary>], iteration_bounds = array<i64: 1, 1, 1>, scalar_prefetch = 0 : i64, scratch_operands = 0 : i64, tpu.core_type = #tpu.core_type<tc>, window_params = [{transform_indices = @transform_0, window_bounds = array<i64: 16, 32>}, {transform_indices = @transform_1, window_bounds = array<i64: 32, 64>}, {transform_indices = @transform_2, window_bounds = array<i64: 1, 64>}, {transform_indices = @transform_3, window_bounds = array<i64: 16, 64>}]} {
    %c0_i32 = arith.constant 0 : i32
    %0 = arith.cmpi eq, %arg2, %c0_i32 : i32
    %1 = arith.extui %0 : i1 to i32
    %c0_i32_0 = arith.constant 0 : i32
    %2 = arith.cmpi ne, %1, %c0_i32_0 : i32
    scf.if %2 {
      %cst_10 = arith.constant 0.000000e+00 : f32
      %13 = vector.broadcast %cst_10 : f32 to vector<16x64xf32>
      %c0_11 = arith.constant 0 : index
      %c0_12 = arith.constant 0 : index
      %14 = vector.load %arg6[%c0_11, %c0_12] : memref<16x64xf32, #tpu.memory_space<vmem>>, vector<16x64xf32>
      tpu.vector_store %arg6[%c0_11, %c0_12], %13 {strides = array<i32>} : memref<16x64xf32, #tpu.memory_space<vmem>>, vector<16x64xf32>,
    } else {
    }
    %c0 = arith.constant 0 : index
    %c0_1 = arith.constant 0 : index
    %3 = vector.load %arg6[%c0, %c0_1] : memref<16x64xf32, #tpu.memory_space<vmem>>, vector<16x64xf32>
    %c0_2 = arith.constant 0 : index
    %c0_3 = arith.constant 0 : index
    %4 = vector.load %arg3[%c0_2, %c0_3] : memref<16x32xf32, #tpu.memory_space<vmem>>, vector<16x32xf32>
    %5 = arith.truncf %4 : vector<16x32xf32> to vector<16x32xbf16>
    %c0_4 = arith.constant 0 : index
    %c0_5 = arith.constant 0 : index
    %6 = vector.load %arg4[%c0_4, %c0_5] : memref<32x64xbf16, #tpu.memory_space<vmem>>, vector<32x64xbf16>
    %cst = arith.constant dense<0.000000e+00> : vector<16x64xf32>
    %7 = tpu.matmul %5, %6, %cst {dimension_numbers = #tpu.dot_dimension_numbers<[1], [0], [0], [1], [0, 0, 1, 1], [], []>} : vector<16x32xbf16>, vector<32x64xbf16>, vector<16x64xf32> -> vector<16x64xf32>
    %8 = arith.addf %3, %7 : vector<16x64xf32>
    %c0_6 = arith.constant 0 : index
    %c0_7 = arith.constant 0 : index
    %9 = vector.load %arg6[%c0_6, %c0_7] : memref<16x64xf32, #tpu.memory_space<vmem>>, vector<16x64xf32>
    tpu.vector_store %arg6[%c0_6, %c0_7], %8 {strides = array<i32>} : memref<16x64xf32, #tpu.memory_space<vmem>>, vector<16x64xf32>,
    %c0_i32_8 = arith.constant 0 : i32
    %10 = arith.cmpi eq, %arg2, %c0_i32_8 : i32
    %11 = arith.extui %10 : i1 to i32
    %c0_i32_9 = arith.constant 0 : i32
    %12 = arith.cmpi ne, %11, %c0_i32_9 : i32
    scf.if %12 {
      %c0_10 = arith.constant 0 : index
      %c0_11 = arith.constant 0 : index
      %13 = vector.load %arg6[%c0_10, %c0_11] : memref<16x64xf32, #tpu.memory_space<vmem>>, vector<16x64xf32>
      %c0_12 = arith.constant 0 : index
      %c0_13 = arith.constant 0 : index
      %14 = vector.load %arg5[%c0_12, %c0_13] : memref<1x64xf32, #tpu.memory_space<vmem>>, vector<1x64xf32>
      %15 = vector.broadcast %14 : vector<1x64xf32> to vector<16x64xf32>
      %16 = arith.addf %13, %15 : vector<16x64xf32>
      %c0_14 = arith.constant 0 : index
      %c0_15 = arith.constant 0 : index
      %17 = vector.load %arg6[%c0_14, %c0_15] : memref<16x64xf32, #tpu.memory_space<vmem>>, vector<16x64xf32>
      tpu.vector_store %arg6[%c0_14, %c0_15], %16 {strides = array<i32>} : memref<16x64xf32, #tpu.memory_space<vmem>>, vector<16x64xf32>,
    } else {
    }
    return
  }
  func.func @transform_0(%arg0: i32, %arg1: i32, %arg2: i32) -> (i32, i32) {
    %c0_i32 = arith.constant 0 : i32
    return %arg0, %arg2 : i32, i32
  }
  func.func @transform_1(%arg0: i32, %arg1: i32, %arg2: i32) -> (i32, i32) {
    %c0_i32 = arith.constant 0 : i32
    return %arg2, %arg1 : i32, i32
  }
  func.func @transform_2(%arg0: i32, %arg1: i32, %arg2: i32) -> (i32, i32) {
    %c0_i32 = arith.constant 0 : i32
    %c0_i32_0 = arith.constant 0 : i32
    return %c0_i32, %arg1 : i32, i32
  }
  func.func @transform_3(%arg0: i32, %arg1: i32, %arg2: i32) -> (i32, i32) {
    %c0_i32 = arith.constant 0 : i32
    return %arg0, %arg1 : i32, i32
  }
}

module attributes {stable_mosaic.version = 11 : i64} {
  func.func @_linear_kernel(%arg0: i32, %arg1: i32, %arg2: i32, %arg3: memref<16x32xf32, #tpu.memory_space<vmem>>, %arg4: memref<32x32xbf16, #tpu.memory_space<vmem>>, %arg5: memref<1x32xf32, #tpu.memory_space<vmem>>, %arg6: memref<16x32xf32, #tpu.memory_space<vmem>>) attributes {dimension_semantics = [#tpu.dimension_semantics<parallel>, #tpu.dimension_semantics<parallel>, #tpu.dimension_semantics<arbitrary>], iteration_bounds = array<i64: 1, 1, 1>, scalar_prefetch = 0 : i64, scratch_operands = 0 : i64, tpu.core_type = #tpu.core_type<tc>, window_params = [{transform_indices = @transform_0, window_bounds = array<i64: 16, 32>}, {transform_indices = @transform_1, window_bounds = array<i64: 32, 32>}, {transform_indices = @transform_2, window_bounds = array<i64: 1, 32>}, {transform_indices = @transform_3, window_bounds = array<i64: 16, 32>}]} {
    %c0_i32 = arith.constant 0 : i32
    %0 = arith.cmpi eq, %arg2, %c0_i32 : i32
    %1 = arith.extui %0 : i1 to i32
    %c0_i32_0 = arith.constant 0 : i32
    %2 = arith.cmpi ne, %1, %c0_i32_0 : i32
    scf.if %2 {
      %cst_10 = arith.constant 0.000000e+00 : f32
      %13 = vector.broadcast %cst_10 : f32 to vector<16x32xf32>
      %c0_11 = arith.constant 0 : index
      %c0_12 = arith.constant 0 : index
      %14 = vector.load %arg6[%c0_11, %c0_12] : memref<16x32xf32, #tpu.memory_space<vmem>>, vector<16x32xf32>
      tpu.vector_store %arg6[%c0_11, %c0_12], %13 {strides = array<i32>} : memref<16x32xf32, #tpu.memory_space<vmem>>, vector<16x32xf32>,
    } else {
    }
    %c0 = arith.constant 0 : index
    %c0_1 = arith.constant 0 : index
    %3 = vector.load %arg6[%c0, %c0_1] : memref<16x32xf32, #tpu.memory_space<vmem>>, vector<16x32xf32>
    %c0_2 = arith.constant 0 : index
    %c0_3 = arith.constant 0 : index
    %4 = vector.load %arg3[%c0_2, %c0_3] : memref<16x32xf32, #tpu.memory_space<vmem>>, vector<16x32xf32>
    %5 = arith.truncf %4 : vector<16x32xf32> to vector<16x32xbf16>
    %c0_4 = arith.constant 0 : index
    %c0_5 = arith.constant 0 : index
    %6 = vector.load %arg4[%c0_4, %c0_5] : memref<32x32xbf16, #tpu.memory_space<vmem>>, vector<32x32xbf16>
    %cst = arith.constant dense<0.000000e+00> : vector<16x32xf32>
    %7 = tpu.matmul %5, %6, %cst {dimension_numbers = #tpu.dot_dimension_numbers<[1], [0], [0], [1], [0, 0, 1, 1], [], []>} : vector<16x32xbf16>, vector<32x32xbf16>, vector<16x32xf32> -> vector<16x32xf32>
    %8 = arith.addf %3, %7 : vector<16x32xf32>
    %c0_6 = arith.constant 0 : index
    %c0_7 = arith.constant 0 : index
    %9 = vector.load %arg6[%c0_6, %c0_7] : memref<16x32xf32, #tpu.memory_space<vmem>>, vector<16x32xf32>
    tpu.vector_store %arg6[%c0_6, %c0_7], %8 {strides = array<i32>} : memref<16x32xf32, #tpu.memory_space<vmem>>, vector<16x32xf32>,
    %c0_i32_8 = arith.constant 0 : i32
    %10 = arith.cmpi eq, %arg2, %c0_i32_8 : i32
    %11 = arith.extui %10 : i1 to i32
    %c0_i32_9 = arith.constant 0 : i32
    %12 = arith.cmpi ne, %11, %c0_i32_9 : i32
    scf.if %12 {
      %c0_10 = arith.constant 0 : index
      %c0_11 = arith.constant 0 : index
      %13 = vector.load %arg6[%c0_10, %c0_11] : memref<16x32xf32, #tpu.memory_space<vmem>>, vector<16x32xf32>
      %c0_12 = arith.constant 0 : index
      %c0_13 = arith.constant 0 : index
      %14 = vector.load %arg5[%c0_12, %c0_13] : memref<1x32xf32, #tpu.memory_space<vmem>>, vector<1x32xf32>
      %15 = vector.broadcast %14 : vector<1x32xf32> to vector<16x32xf32>
      %16 = arith.addf %13, %15 : vector<16x32xf32>
      %c0_14 = arith.constant 0 : index
      %c0_15 = arith.constant 0 : index
      %17 = vector.load %arg6[%c0_14, %c0_15] : memref<16x32xf32, #tpu.memory_space<vmem>>, vector<16x32xf32>
      tpu.vector_store %arg6[%c0_14, %c0_15], %16 {strides = array<i32>} : memref<16x32xf32, #tpu.memory_space<vmem>>, vector<16x32xf32>,
    } else {
    }
    return
  }
  func.func @transform_0(%arg0: i32, %arg1: i32, %arg2: i32) -> (i32, i32) {
    %c0_i32 = arith.constant 0 : i32
    return %arg0, %arg2 : i32, i32
  }
  func.func @transform_1(%arg0: i32, %arg1: i32, %arg2: i32) -> (i32, i32) {
    %c0_i32 = arith.constant 0 : i32
    return %arg2, %arg1 : i32, i32
  }
  func.func @transform_2(%arg0: i32, %arg1: i32, %arg2: i32) -> (i32, i32) {
    %c0_i32 = arith.constant 0 : i32
    %c0_i32_0 = arith.constant 0 : i32
    return %c0_i32, %arg1 : i32, i32
  }
  func.func @transform_3(%arg0: i32, %arg1: i32, %arg2: i32) -> (i32, i32) {
    %c0_i32 = arith.constant 0 : i32
    return %arg0, %arg1 : i32, i32
  }
}

module attributes {stable_mosaic.version = 11 : i64} {
  func.func @_mha_kernel(%arg0: i32, %arg1: i32, %arg2: memref<1x8x32xf32, #tpu.memory_space<vmem>>, %arg3: memref<1x8x64xf32, #tpu.memory_space<vmem>>, %arg4: memref<1x8x32xf32, #tpu.memory_space<vmem>>) attributes {dimension_semantics = [#tpu.dimension_semantics<parallel>, #tpu.dimension_semantics<parallel>], iteration_bounds = array<i64: 2, 1>, scalar_prefetch = 0 : i64, scratch_operands = 0 : i64, tpu.core_type = #tpu.core_type<tc>, window_params = [{transform_indices = @transform_0, window_bounds = array<i64: 1, 8, 32>}, {transform_indices = @transform_1, window_bounds = array<i64: 1, 8, 64>}, {transform_indices = @transform_2, window_bounds = array<i64: 1, 8, 32>}]} {
    %c0 = arith.constant 0 : index
    %c0_0 = arith.constant 0 : index
    %c0_1 = arith.constant 0 : index
    %0 = vector.load %arg2[%c0, %c0_0, %c0_1] : memref<1x8x32xf32, #tpu.memory_space<vmem>>, vector<1x8x8xf32>
    %1 = vector.shape_cast %0 : vector<1x8x8xf32> to vector<8x8xf32>
    %2 = arith.truncf %1 : vector<8x8xf32> to vector<8x8xbf16>
    %c0_2 = arith.constant 0 : index
    %c0_3 = arith.constant 0 : index
    %c0_4 = arith.constant 0 : index
    %3 = vector.load %arg3[%c0_2, %c0_3, %c0_4] : memref<1x8x64xf32, #tpu.memory_space<vmem>>, vector<1x8x8xf32>
    %4 = vector.shape_cast %3 : vector<1x8x8xf32> to vector<8x8xf32>
    %5 = arith.truncf %4 : vector<8x8xf32> to vector<8x8xbf16>
    %c0_5 = arith.constant 0 : index
    %c0_6 = arith.constant 0 : index
    %c32 = arith.constant 32 : index
    %6 = vector.load %arg3[%c0_5, %c0_6, %c32] : memref<1x8x64xf32, #tpu.memory_space<vmem>>, vector<1x8x8xf32>
    %7 = vector.shape_cast %6 : vector<1x8x8xf32> to vector<8x8xf32>
    %8 = arith.truncf %7 : vector<8x8xf32> to vector<8x8xbf16>
    %cst = arith.constant dense<0.000000e+00> : vector<8x8xf32>
    %9 = tpu.matmul %2, %5, %cst {dimension_numbers = #tpu.dot_dimension_numbers<[1], [1], [0], [0], [0, 0, 1, 0], [], []>} : vector<8x8xbf16>, vector<8x8xbf16>, vector<8x8xf32> -> vector<8x8xf32>
    %cst_7 = arith.constant 0.353553385 : f32
    %10 = vector.broadcast %cst_7 : f32 to vector<8x8xf32>
    %11 = arith.mulf %9, %10 : vector<8x8xf32>
    %cst_8 = arith.constant dense<0xFF800000> : vector<8xf32>
    %12 = vector.multi_reduction <maximumf>, %11, %cst_8 [1] : vector<8x8xf32> to vector<8xf32>
    %13 = vector.shape_cast %12 : vector<8xf32> to vector<8x1xf32>
    %14 = vector.broadcast %13 : vector<8x1xf32> to vector<8x8xf32>
    %15 = arith.subf %11, %14 : vector<8x8xf32>
    %16 = math.exp %15 : vector<8x8xf32>
    %cst_9 = arith.constant dense<0.000000e+00> : vector<8xf32>
    %17 = vector.multi_reduction <add>, %16, %cst_9 [1] : vector<8x8xf32> to vector<8xf32>
    %18 = vector.shape_cast %17 : vector<8xf32> to vector<8x1xf32>
    %19 = tpu.reciprocal %18 {approx = true} : vector<8x1xf32> -> vector<8x1xf32>
    %20 = vector.broadcast %19 : vector<8x1xf32> to vector<8x8xf32>
    %21 = arith.mulf %16, %20 : vector<8x8xf32>
    %22 = arith.truncf %21 : vector<8x8xf32> to vector<8x8xbf16>
    %cst_10 = arith.constant dense<0.000000e+00> : vector<8x8xf32>
    %23 = tpu.matmul %22, %8, %cst_10 {dimension_numbers = #tpu.dot_dimension_numbers<[1], [0], [0], [1], [0, 0, 1, 1], [], []>} : vector<8x8xbf16>, vector<8x8xbf16>, vector<8x8xf32> -> vector<8x8xf32>
    %c0_11 = arith.constant 0 : index
    %c0_12 = arith.constant 0 : index
    %c0_13 = arith.constant 0 : index
    %24 = vector.load %arg4[%c0_11, %c0_12, %c0_13] : memref<1x8x32xf32, #tpu.memory_space<vmem>>, vector<1x8x8xf32>
    %25 = vector.shape_cast %24 : vector<1x8x8xf32> to vector<8x8xf32>
    %26 = vector.shape_cast %23 : vector<8x8xf32> to vector<1x8x8xf32>
    tpu.vector_store %arg4[%c0_11, %c0_12, %c0_13], %26 {strides = array<i32>} : memref<1x8x32xf32, #tpu.memory_space<vmem>>, vector<1x8x8xf32>,
    %c0_14 = arith.constant 0 : index
    %c0_15 = arith.constant 0 : index
    %c8 = arith.constant 8 : index
    %27 = vector.load %arg2[%c0_14, %c0_15, %c8] : memref<1x8x32xf32, #tpu.memory_space<vmem>>, vector<1x8x8xf32>
    %28 = vector.shape_cast %27 : vector<1x8x8xf32> to vector<8x8xf32>
    %29 = arith.truncf %28 : vector<8x8xf32> to vector<8x8xbf16>
    %c0_16 = arith.constant 0 : index
    %c0_17 = arith.constant 0 : index
    %c8_18 = arith.constant 8 : index
    %30 = vector.load %arg3[%c0_16, %c0_17, %c8_18] : memref<1x8x64xf32, #tpu.memory_space<vmem>>, vector<1x8x8xf32>
    %31 = vector.shape_cast %30 : vector<1x8x8xf32> to vector<8x8xf32>
    %32 = arith.truncf %31 : vector<8x8xf32> to vector<8x8xbf16>
    %c0_19 = arith.constant 0 : index
    %c0_20 = arith.constant 0 : index
    %c40 = arith.constant 40 : index
    %33 = vector.load %arg3[%c0_19, %c0_20, %c40] : memref<1x8x64xf32, #tpu.memory_space<vmem>>, vector<1x8x8xf32>
    %34 = vector.shape_cast %33 : vector<1x8x8xf32> to vector<8x8xf32>
    %35 = arith.truncf %34 : vector<8x8xf32> to vector<8x8xbf16>
    %cst_21 = arith.constant dense<0.000000e+00> : vector<8x8xf32>
    %36 = tpu.matmul %29, %32, %cst_21 {dimension_numbers = #tpu.dot_dimension_numbers<[1], [1], [0], [0], [0, 0, 1, 0], [], []>} : vector<8x8xbf16>, vector<8x8xbf16>, vector<8x8xf32> -> vector<8x8xf32>
    %cst_22 = arith.constant 0.353553385 : f32
    %37 = vector.broadcast %cst_22 : f32 to vector<8x8xf32>
    %38 = arith.mulf %36, %37 : vector<8x8xf32>
    %cst_23 = arith.constant dense<0xFF800000> : vector<8xf32>
    %39 = vector.multi_reduction <maximumf>, %38, %cst_23 [1] : vector<8x8xf32> to vector<8xf32>
    %40 = vector.shape_cast %39 : vector<8xf32> to vector<8x1xf32>
    %41 = vector.broadcast %40 : vector<8x1xf32> to vector<8x8xf32>
    %42 = arith.subf %38, %41 : vector<8x8xf32>
    %43 = math.exp %42 : vector<8x8xf32>
    %cst_24 = arith.constant dense<0.000000e+00> : vector<8xf32>
    %44 = vector.multi_reduction <add>, %43, %cst_24 [1] : vector<8x8xf32> to vector<8xf32>
    %45 = vector.shape_cast %44 : vector<8xf32> to vector<8x1xf32>
    %46 = tpu.reciprocal %45 {approx = true} : vector<8x1xf32> -> vector<8x1xf32>
    %47 = vector.broadcast %46 : vector<8x1xf32> to vector<8x8xf32>
    %48 = arith.mulf %43, %47 : vector<8x8xf32>
    %49 = arith.truncf %48 : vector<8x8xf32> to vector<8x8xbf16>
    %cst_25 = arith.constant dense<0.000000e+00> : vector<8x8xf32>
    %50 = tpu.matmul %49, %35, %cst_25 {dimension_numbers = #tpu.dot_dimension_numbers<[1], [0], [0], [1], [0, 0, 1, 1], [], []>} : vector<8x8xbf16>, vector<8x8xbf16>, vector<8x8xf32> -> vector<8x8xf32>
    %c0_26 = arith.constant 0 : index
    %c0_27 = arith.constant 0 : index
    %c8_28 = arith.constant 8 : index
    %51 = vector.load %arg4[%c0_26, %c0_27, %c8_28] : memref<1x8x32xf32, #tpu.memory_space<vmem>>, vector<1x8x8xf32>
    %52 = vector.shape_cast %51 : vector<1x8x8xf32> to vector<8x8xf32>
    %53 = vector.shape_cast %50 : vector<8x8xf32> to vector<1x8x8xf32>
    tpu.vector_store %arg4[%c0_26, %c0_27, %c8_28], %53 {strides = array<i32>} : memref<1x8x32xf32, #tpu.memory_space<vmem>>, vector<1x8x8xf32>,
    %c0_29 = arith.constant 0 : index
    %c0_30 = arith.constant 0 : index
    %c16 = arith.constant 16 : index
    %54 = vector.load %arg2[%c0_29, %c0_30, %c16] : memref<1x8x32xf32, #tpu.memory_space<vmem>>, vector<1x8x8xf32>
    %55 = vector.shape_cast %54 : vector<1x8x8xf32> to vector<8x8xf32>
    %56 = arith.truncf %55 : vector<8x8xf32> to vector<8x8xbf16>
    %c0_31 = arith.constant 0 : index
    %c0_32 = arith.constant 0 : index
    %c16_33 = arith.constant 16 : index
    %57 = vector.load %arg3[%c0_31, %c0_32, %c16_33] : memref<1x8x64xf32, #tpu.memory_space<vmem>>, vector<1x8x8xf32>
    %58 = vector.shape_cast %57 : vector<1x8x8xf32> to vector<8x8xf32>
    %59 = arith.truncf %58 : vector<8x8xf32> to vector<8x8xbf16>
    %c0_34 = arith.constant 0 : index
    %c0_35 = arith.constant 0 : index
    %c48 = arith.constant 48 : index
    %60 = vector.load %arg3[%c0_34, %c0_35, %c48] : memref<1x8x64xf32, #tpu.memory_space<vmem>>, vector<1x8x8xf32>
    %61 = vector.shape_cast %60 : vector<1x8x8xf32> to vector<8x8xf32>
    %62 = arith.truncf %61 : vector<8x8xf32> to vector<8x8xbf16>
    %cst_36 = arith.constant dense<0.000000e+00> : vector<8x8xf32>
    %63 = tpu.matmul %56, %59, %cst_36 {dimension_numbers = #tpu.dot_dimension_numbers<[1], [1], [0], [0], [0, 0, 1, 0], [], []>} : vector<8x8xbf16>, vector<8x8xbf16>, vector<8x8xf32> -> vector<8x8xf32>
    %cst_37 = arith.constant 0.353553385 : f32
    %64 = vector.broadcast %cst_37 : f32 to vector<8x8xf32>
    %65 = arith.mulf %63, %64 : vector<8x8xf32>
    %cst_38 = arith.constant dense<0xFF800000> : vector<8xf32>
    %66 = vector.multi_reduction <maximumf>, %65, %cst_38 [1] : vector<8x8xf32> to vector<8xf32>
    %67 = vector.shape_cast %66 : vector<8xf32> to vector<8x1xf32>
    %68 = vector.broadcast %67 : vector<8x1xf32> to vector<8x8xf32>
    %69 = arith.subf %65, %68 : vector<8x8xf32>
    %70 = math.exp %69 : vector<8x8xf32>
    %cst_39 = arith.constant dense<0.000000e+00> : vector<8xf32>
    %71 = vector.multi_reduction <add>, %70, %cst_39 [1] : vector<8x8xf32> to vector<8xf32>
    %72 = vector.shape_cast %71 : vector<8xf32> to vector<8x1xf32>
    %73 = tpu.reciprocal %72 {approx = true} : vector<8x1xf32> -> vector<8x1xf32>
    %74 = vector.broadcast %73 : vector<8x1xf32> to vector<8x8xf32>
    %75 = arith.mulf %70, %74 : vector<8x8xf32>
    %76 = arith.truncf %75 : vector<8x8xf32> to vector<8x8xbf16>
    %cst_40 = arith.constant dense<0.000000e+00> : vector<8x8xf32>
    %77 = tpu.matmul %76, %62, %cst_40 {dimension_numbers = #tpu.dot_dimension_numbers<[1], [0], [0], [1], [0, 0, 1, 1], [], []>} : vector<8x8xbf16>, vector<8x8xbf16>, vector<8x8xf32> -> vector<8x8xf32>
    %c0_41 = arith.constant 0 : index
    %c0_42 = arith.constant 0 : index
    %c16_43 = arith.constant 16 : index
    %78 = vector.load %arg4[%c0_41, %c0_42, %c16_43] : memref<1x8x32xf32, #tpu.memory_space<vmem>>, vector<1x8x8xf32>
    %79 = vector.shape_cast %78 : vector<1x8x8xf32> to vector<8x8xf32>
    %80 = vector.shape_cast %77 : vector<8x8xf32> to vector<1x8x8xf32>
    tpu.vector_store %arg4[%c0_41, %c0_42, %c16_43], %80 {strides = array<i32>} : memref<1x8x32xf32, #tpu.memory_space<vmem>>, vector<1x8x8xf32>,
    %c0_44 = arith.constant 0 : index
    %c0_45 = arith.constant 0 : index
    %c24 = arith.constant 24 : index
    %81 = vector.load %arg2[%c0_44, %c0_45, %c24] : memref<1x8x32xf32, #tpu.memory_space<vmem>>, vector<1x8x8xf32>
    %82 = vector.shape_cast %81 : vector<1x8x8xf32> to vector<8x8xf32>
    %83 = arith.truncf %82 : vector<8x8xf32> to vector<8x8xbf16>
    %c0_46 = arith.constant 0 : index
    %c0_47 = arith.constant 0 : index
    %c24_48 = arith.constant 24 : index
    %84 = vector.load %arg3[%c0_46, %c0_47, %c24_48] : memref<1x8x64xf32, #tpu.memory_space<vmem>>, vector<1x8x8xf32>
    %85 = vector.shape_cast %84 : vector<1x8x8xf32> to vector<8x8xf32>
    %86 = arith.truncf %85 : vector<8x8xf32> to vector<8x8xbf16>
    %c0_49 = arith.constant 0 : index
    %c0_50 = arith.constant 0 : index
    %c56 = arith.constant 56 : index
    %87 = vector.load %arg3[%c0_49, %c0_50, %c56] : memref<1x8x64xf32, #tpu.memory_space<vmem>>, vector<1x8x8xf32>
    %88 = vector.shape_cast %87 : vector<1x8x8xf32> to vector<8x8xf32>
    %89 = arith.truncf %88 : vector<8x8xf32> to vector<8x8xbf16>
    %cst_51 = arith.constant dense<0.000000e+00> : vector<8x8xf32>
    %90 = tpu.matmul %83, %86, %cst_51 {dimension_numbers = #tpu.dot_dimension_numbers<[1], [1], [0], [0], [0, 0, 1, 0], [], []>} : vector<8x8xbf16>, vector<8x8xbf16>, vector<8x8xf32> -> vector<8x8xf32>
    %cst_52 = arith.constant 0.353553385 : f32
    %91 = vector.broadcast %cst_52 : f32 to vector<8x8xf32>
    %92 = arith.mulf %90, %91 : vector<8x8xf32>
    %cst_53 = arith.constant dense<0xFF800000> : vector<8xf32>
    %93 = vector.multi_reduction <maximumf>, %92, %cst_53 [1] : vector<8x8xf32> to vector<8xf32>
    %94 = vector.shape_cast %93 : vector<8xf32> to vector<8x1xf32>
    %95 = vector.broadcast %94 : vector<8x1xf32> to vector<8x8xf32>
    %96 = arith.subf %92, %95 : vector<8x8xf32>
    %97 = math.exp %96 : vector<8x8xf32>
    %cst_54 = arith.constant dense<0.000000e+00> : vector<8xf32>
    %98 = vector.multi_reduction <add>, %97, %cst_54 [1] : vector<8x8xf32> to vector<8xf32>
    %99 = vector.shape_cast %98 : vector<8xf32> to vector<8x1xf32>
    %100 = tpu.reciprocal %99 {approx = true} : vector<8x1xf32> -> vector<8x1xf32>
    %101 = vector.broadcast %100 : vector<8x1xf32> to vector<8x8xf32>
    %102 = arith.mulf %97, %101 : vector<8x8xf32>
    %103 = arith.truncf %102 : vector<8x8xf32> to vector<8x8xbf16>
    %cst_55 = arith.constant dense<0.000000e+00> : vector<8x8xf32>
    %104 = tpu.matmul %103, %89, %cst_55 {dimension_numbers = #tpu.dot_dimension_numbers<[1], [0], [0], [1], [0, 0, 1, 1], [], []>} : vector<8x8xbf16>, vector<8x8xbf16>, vector<8x8xf32> -> vector<8x8xf32>
    %c0_56 = arith.constant 0 : index
    %c0_57 = arith.constant 0 : index
    %c24_58 = arith.constant 24 : index
    %105 = vector.load %arg4[%c0_56, %c0_57, %c24_58] : memref<1x8x32xf32, #tpu.memory_space<vmem>>, vector<1x8x8xf32>
    %106 = vector.shape_cast %105 : vector<1x8x8xf32> to vector<8x8xf32>
    %107 = vector.shape_cast %104 : vector<8x8xf32> to vector<1x8x8xf32>
    tpu.vector_store %arg4[%c0_56, %c0_57, %c24_58], %107 {strides = array<i32>} : memref<1x8x32xf32, #tpu.memory_space<vmem>>, vector<1x8x8xf32>,
    return
  }
  func.func @transform_0(%arg0: i32, %arg1: i32) -> (i32, i32, i32) {
    %c0_i32 = arith.constant 0 : i32
    %c0_i32_0 = arith.constant 0 : i32
    return %arg0, %arg1, %c0_i32 : i32, i32, i32
  }
  func.func @transform_1(%arg0: i32, %arg1: i32) -> (i32, i32, i32) {
    %c0_i32 = arith.constant 0 : i32
    %c0_i32_0 = arith.constant 0 : i32
    %c0_i32_1 = arith.constant 0 : i32
    return %arg0, %c0_i32, %c0_i32_0 : i32, i32, i32
  }
  func.func @transform_2(%arg0: i32, %arg1: i32) -> (i32, i32, i32) {
    %c0_i32 = arith.constant 0 : i32
    %c0_i32_0 = arith.constant 0 : i32
    return %arg0, %arg1, %c0_i32 : i32, i32, i32
  }
}

module attributes {stable_mosaic.version = 11 : i64} {
  func.func @_ln_kernel(%arg0: i32, %arg1: memref<16x32xf32, #tpu.memory_space<vmem>>, %arg2: memref<1x32xf32, #tpu.memory_space<vmem>>, %arg3: memref<1x32xf32, #tpu.memory_space<vmem>>, %arg4: memref<16x32xf32, #tpu.memory_space<vmem>>) attributes {dimension_semantics = [#tpu.dimension_semantics<parallel>], iteration_bounds = array<i64: 1>, scalar_prefetch = 0 : i64, scratch_operands = 0 : i64, tpu.core_type = #tpu.core_type<tc>, window_params = [{transform_indices = @transform_0, window_bounds = array<i64: 16, 32>}, {pipeline_mode = #tpu.pipeline_mode<synchronous>, transform_indices = @transform_1, window_bounds = array<i64: 1, 32>}, {pipeline_mode = #tpu.pipeline_mode<synchronous>, transform_indices = @transform_2, window_bounds = array<i64: 1, 32>}, {transform_indices = @transform_3, window_bounds = array<i64: 16, 32>}]} {
    %c0 = arith.constant 0 : index
    %c0_0 = arith.constant 0 : index
    %0 = vector.load %arg1[%c0, %c0_0] : memref<16x32xf32, #tpu.memory_space<vmem>>, vector<16x32xf32>
    %cst = arith.constant dense<0.000000e+00> : vector<16xf32>
    %1 = vector.multi_reduction <add>, %0, %cst [1] : vector<16x32xf32> to vector<16xf32>
    %2 = vector.shape_cast %1 : vector<16xf32> to vector<16x1xf32>
    %cst_1 = arith.constant 3.200000e+01 : f32
    %3 = vector.broadcast %cst_1 : f32 to vector<16x1xf32>
    %4 = arith.divf %2, %3 : vector<16x1xf32>
    %5 = vector.broadcast %4 : vector<16x1xf32> to vector<16x32xf32>
    %6 = arith.subf %0, %5 : vector<16x32xf32>
    %7 = arith.mulf %6, %6 : vector<16x32xf32>
    %cst_2 = arith.constant dense<0.000000e+00> : vector<16xf32>
    %8 = vector.multi_reduction <add>, %7, %cst_2 [1] : vector<16x32xf32> to vector<16xf32>
    %9 = vector.shape_cast %8 : vector<16xf32> to vector<16x1xf32>
    %cst_3 = arith.constant 3.200000e+01 : f32
    %10 = vector.broadcast %cst_3 : f32 to vector<16x1xf32>
    %11 = arith.divf %9, %10 : vector<16x1xf32>
    %cst_4 = arith.constant 9.99999974E-6 : f32
    %12 = vector.broadcast %cst_4 : f32 to vector<16x1xf32>
    %13 = arith.addf %11, %12 : vector<16x1xf32>
    %14 = math.rsqrt %13 : vector<16x1xf32>
    %15 = vector.broadcast %14 : vector<16x1xf32> to vector<16x32xf32>
    %16 = arith.mulf %6, %15 : vector<16x32xf32>
    %c0_5 = arith.constant 0 : index
    %c0_6 = arith.constant 0 : index
    %17 = vector.load %arg2[%c0_5, %c0_6] : memref<1x32xf32, #tpu.memory_space<vmem>>, vector<1x32xf32>
    %18 = vector.broadcast %17 : vector<1x32xf32> to vector<16x32xf32>
    %19 = arith.mulf %16, %18 : vector<16x32xf32>
    %c0_7 = arith.constant 0 : index
    %c0_8 = arith.constant 0 : index
    %20 = vector.load %arg3[%c0_7, %c0_8] : memref<1x32xf32, #tpu.memory_space<vmem>>, vector<1x32xf32>
    %21 = vector.broadcast %20 : vector<1x32xf32> to vector<16x32xf32>
    %22 = arith.addf %19, %21 : vector<16x32xf32>
    %c0_9 = arith.constant 0 : index
    %c0_10 = arith.constant 0 : index
    %23 = vector.load %arg4[%c0_9, %c0_10] : memref<16x32xf32, #tpu.memory_space<vmem>>, vector<16x32xf32>
    tpu.vector_store %arg4[%c0_9, %c0_10], %22 {strides = array<i32>} : memref<16x32xf32, #tpu.memory_space<vmem>>, vector<16x32xf32>,
    return
  }
  func.func @transform_0(%arg0: i32) -> (i32, i32) {
    %c0_i32 = arith.constant 0 : i32
    %c0_i32_0 = arith.constant 0 : i32
    return %arg0, %c0_i32 : i32, i32
  }
  func.func @transform_1(%arg0: i32) -> (i32, i32) {
    %c0_i32 = arith.constant 0 : i32
    %c0_i32_0 = arith.constant 0 : i32
    %c0_i32_1 = arith.constant 0 : i32
    return %c0_i32, %c0_i32_0 : i32, i32
  }
  func.func @transform_2(%arg0: i32) -> (i32, i32) {
    %c0_i32 = arith.constant 0 : i32
    %c0_i32_0 = arith.constant 0 : i32
    %c0_i32_1 = arith.constant 0 : i32
    return %c0_i32, %c0_i32_0 : i32, i32
  }
  func.func @transform_3(%arg0: i32) -> (i32, i32) {
    %c0_i32 = arith.constant 0 : i32
    %c0_i32_0 = arith.constant 0 : i32
    return %arg0, %c0_i32 : i32, i32
  }
}

</mosaic_0001>

<bundles_post_ra>
// kernel: transformer_forward.29
= control target key start
LH: loop header
LB: loop body
LE: loop exit
PB: predicated region body
PF: predicated region fallthrough
CT: control target
= control target key end

     0   :  { %vm19_vm0 = vcmask 785408   ;;  %v96_v1 = vmov 0.0   ;;  %vm43_vm1 = vcmask 261120   ;;  %s168_s1 = inlined_call_operand.vmem [shape: bf16[32,96], index: 1, kind: input, shape index: {}]   ;;  %s169_s0 = inlined_call_operand.vmem [shape: f32[16,32], index: 0, kind: input, shape index: {}]   ;;  %s170_s3 = inlined_call_operand.vmem [shape: f32[16,96], index: 3, kind: output, shape index: {}]   ;;  %s171_s2 = inlined_call_operand.vmem [shape: f32[1,96], index: 2, kind: input, shape index: {}]  }
   0x1   :  { %v93_v0 = vld [vmem:[%s168_s1 + $0x8] sm:$0xff]  ;;  %20 = vst.msk [vmem:[%s170_s3] sm:$0xff] %vm19_vm0, %v96_v1  ;;  %v92_v2 = vld [vmem:[%s168_s1] sm:$0xff] }
   0x2   :  { %21 = vst.msk [vmem:[%s170_s3 + $0x8] sm:$0xff] %vm19_vm0, %v96_v1  ;;  %53 = vmatpush.bf16.msra.mxu0 %v93_v0  ;;  %v24_v3 = vld [vmem:[%s169_s0] sm:$0xff]  ;;  %v25_v4 = vld [vmem:[%s169_s0 + $0x8] sm:$0xff] }
   0x3   :  { %v26_v5 = vpack.c.bf16 %v25_v4, %v24_v3  ;;  %v95_v10 = vld [vmem:[%s171_s2] ss:$0 sm:$0xff] }
   0x6   :  { %54 = vmatpush.bf16.msra.mxu0 %v92_v2 }
   0x8   :  { %v22_v6 = vld [vmem:[%s170_s3] sm:$0xff] }
   0x9   :  { %91 = vmatmul.msk.bf16.vlgmr.msra.gmra.mxu0 %vm43_vm1, %v26_v5  ;;  %v23_v9 = vld [vmem:[%s170_s3 + $0x8] sm:$0xff] }
  0x86   :  { %v56_v7 = vpop.f32.mrf.mxu0 }
  0x87   :  { %v61_v8 = vadd.f32 %v56_v7, %v22_v6 }
  0x89   :  { %64 = vst.msk [vmem:[%s170_s3] sm:$0xff] %vm19_vm0, %v61_v8 }
  0x8e   :  { %v58_v11 = vpop.f32.mrf.mxu0 }
  0x8f   :  { %v62_v12 = vadd.f32 %v58_v11, %v23_v9 }
  0x90   :  { %v69_v13 = vld [vmem:[%s170_s3] sm:$0xff] }
  0x91   :  { %v75_v14 = vadd.f32 %v95_v10, %v69_v13  ;;  %65 = vst.msk [vmem:[%s170_s3 + $0x8] sm:$0xff] %vm19_vm0, %v62_v12 }
  0x93   :  { %77 = vst.msk [vmem:[%s170_s3] sm:$0xff] %vm19_vm0, %v75_v14 }
  0x98   :  { %v70_v15 = vld [vmem:[%s170_s3 + $0x8] sm:$0xff] }
  0x99   :  { %v76_v16 = vadd.f32 %v95_v10, %v70_v15 }
  0x9b   :  { %78 = vst.msk [vmem:[%s170_s3 + $0x8] sm:$0xff] %vm19_vm0, %v76_v16 }

// kernel: transformer_forward.28
= control target key start
LH: loop header
LB: loop body
LE: loop exit
PB: predicated region body
PF: predicated region fallthrough
CT: control target
= control target key end

     0   :  { %s457_s15 = smov 0   ;;  %s459_s16 = smov 0   ;;  %s496_s0 = inlined_call_operand.vmem [shape: f32[2,8,16], index: 0, kind: input, shape index: {}]   ;;  %s497_s1 = inlined_call_operand.vmem [shape: bf16[16,32], index: 1, kind: input, shape index: {}]   ;;  %s498_s2 = inlined_call_operand.vmem [shape: f32[1,32], index: 2, kind: input, shape index: {}]   ;;  %s499_s3 = inlined_call_operand.vmem [shape: f32[8,32], index: 3, kind: input, shape index: {}]   ;;  %s500_s4 = inlined_call_operand.vmem [shape: f32[2,8,32], index: 4, kind: output, shape index: {}]  }
   0x1   :  { %s461_s17 = smov 0  }
   0x2 LB: > { %s26_s18 = sadd.s32 1, %s426_s16  ;;  %p372_p0 = scmp.ge.s32.totalorder %s430_s17, 1  ;;  %s430_s17 = sphi %s461_s17, %s14_s17   ;;  %s426_s16 = sphi %s459_s16, %s502_s16   ;;  %s422_s15 = sphi %s457_s15, %s501_s15  }
   0x3   : > { %p28_p1 = scmp.ge.s32.totalorder %s26_s18, 2  ;;  %p189_p2 = scmp.lt.s32.totalorder %s430_s17, 3 }
   0x5   : > { %s504_s18 = smov (%p28_p1, %s26_s18), 0  ;;  %p190_p3 = pnand %p372_p0, %p189_p2 }
   0x6   : > { %p223_p4 = scmp.lt.s32.totalorder (!%p190_p3), %s422_s15, 1 }
   0x7   : > { %193 = sbr.rel (%p190_p3) target bundleno = 152 (0x98), region = 36 }
   0xc   : > { %v382_v0 = vld [vmem:[%s497_s1] sm:$0xff]  ;;  %s506_s15 = smov (!%p223_p4, %s422_s15), 1  ;;  %vm256_vm0 = vcmask 130048   ;;  %vm275_vm1 = vcmask 261120  }
   0xd   : > { %267 = vmatpush.bf16.msra.mxu0 %v382_v0  ;;  %s373_s21 = sshll.u32 %s506_s15, 3  ;;  %v407_v3 = vld [vmem:[%s498_s2] ss:$0 sm:$0xff] }
   0xe   : > { %s229_s24 = scalar_lea.vmem %s496_s0, %s373_s21  ;;  %v273_v5 = vld [vmem:[%s499_s3] sm:$0xff]  ;;  %s240_s5 = scalar_lea.vmem %s500_s4, %s373_s21 }
   0xf   : > { %v242_v1 = vld [vmem:[%s229_s24] sm:$0xff] }
  0x10   : > { %v243_v2 = vpack.c.bf16 %v242_v1, %v242_v1 }
  0x12   : > { %379 = vmatmul.msk.bf16.vlgmr.msra.gmra.mxu0 %vm256_vm0, %v243_v2 }
  0x8f   : > { %v269_v4 = vpop.f32.mrf.mxu0 }
  0x90   : > { %v270_v6 = vadd.f32 %v407_v3, %v269_v4 }
  0x92   : > { %v274_v7 = vadd.f32 %v273_v5, %v270_v6 }
  0x94   : > { %276 = vst.msk [vmem:[%s240_s5] sm:$0xff] %vm275_vm1, %v274_v7 }
  0x97   : > { %v271_v8 = vpop.f32.mrf.mxu0 }
  0x98 PF: > { %s14_s17 = sadd.s32 1, %s430_s17   ;;  %s501_s15 = smov %s426_s16 }
  0x99   : > { %p11_p5 = scmp.ge.s32.totalorder %s14_s17, 4   ;;  %s502_s16 = smov %s504_s18 }
  0x9b   :  { %13 = sbr.rel (!%p11_p5) target bundleno = 2 (0x2), region = 69 }

// kernel: transformer_forward.30
= control target key start
LH: loop header
LB: loop body
LE: loop exit
PB: predicated region body
PF: predicated region fallthrough
CT: control target
= control target key end

     0   :  { %s669_s9 = smov 0   ;;  %s671_s10 = smov 0   ;;  %s751_s0 = inlined_call_operand.vmem [shape: f32[2,8,96], index: 0, kind: input, shape index: {}, may-alias: {0,1}]   ;;  %s752_s1 = inlined_call_operand.vmem [shape: f32[2,8,96], index: 1, kind: input, shape index: {}, may-alias: {0,1}]   ;;  %s753_s2 = inlined_call_operand.vmem [shape: f32[2,8,32], index: 2, kind: output, shape index: {}]  }
   0x1   :  { %s673_s11 = smov 0  }
   0x2 LB: > { %s24_s12 = sadd.s32 1, %s634_s10  ;;  %p548_p0 = scmp.ge.s32.totalorder %s638_s11, 1  ;;  %s638_s11 = sphi %s673_s11, %s12_s11   ;;  %s634_s10 = sphi %s671_s10, %s755_s10   ;;  %s630_s9 = sphi %s669_s9, %s754_s9  }
   0x3   : > { %p26_p1 = scmp.ge.s32.totalorder %s24_s12, 2  ;;  %p139_p2 = scmp.lt.s32.totalorder %s638_s11, 3 }
   0x5   : > { %s757_s12 = smov (%p26_p1, %s24_s12), 0  ;;  %p140_p3 = pnand %p548_p0, %p139_p2 }
   0x6   : > { %p169_p4 = scmp.lt.s32.totalorder (!%p140_p3), %s630_s9, 1  ;;  %s640_s17 = smov (!%p140_p3), 96  }
   0x7   : > { %143 = sbr.rel (%p140_p3) target bundleno = 1193 (0x4a9), region = 28  ;;  %s641_s18 = smov (!%p140_p3), 88  }
   0x8   : > { %s642_s22 = smov (!%p140_p3), 120   ;;  %s643_s23 = smov (!%p140_p3), 64  }
   0x9   : > { %s644_s24 = smov (!%p140_p3), 80   ;;  %s645_s25 = smov (!%p140_p3), 72  }
   0xa   : > { %s646_s26 = smov (!%p140_p3), 112   ;;  %s647_s27 = smov (!%p140_p3), 104  }
   0xb   : > { %s648_s28 = smov (!%p140_p3), 56   ;;  %s649_s29 = smov (!%p140_p3), 40  }
   0xc   : > { %s759_s9 = smov (!%p169_p4, %s630_s9), 1  ;;  %vm195_vm0 = vcmask 64512   ;;  %vm233_vm1 = vcmask 1043456   ;;  %s650_s5 = smov 48   ;;  %vm318_vm2 = vcmask 130112   ;;  %vm387_vm3 = vcmask 195712  }
   0xd   : > { %s687_s13 = sshll.u32 %s759_s9, 3  ;;  %s651_s6 = smov 8   ;;  %vm456_vm4 = vcmask 261312  }
   0xe   : > { %s179_s16 = scalar_lea.vmem %s752_s1, %s687_s13  ;;  %s175_s21 = scalar_lea.vmem %s751_s0, %s687_s13 }
   0xf   : > { %v190_v0 = vld [vmem:[%s179_s16] sm:$0xff]  ;;  %s724_s4 = scalar_lea.vmem %s753_s2, %s687_s13  ;;  %s652_s7 = smov 16  }
  0x10   : > { %v693_v1 = vpack.c.bf16 %v190_v0, %v190_v0  ;;  %v188_v4 = vld [vmem:[%s175_s21] sm:$0xff]  ;;  %s653_s8 = smov 24  }
  0x11   : > { %v189_v5 = vpack.c.bf16 %v188_v4, %v188_v4 }
  0x12   : > { %193 = vrot.lane.b32.xlu0 %v693_v1, %s640_s17  ;;  %259 = vrot.lane.b32.xlu1 %v693_v1, %s641_s18 }
  0x13   : > { %256 = vrot.lane.b32.xlu2 %v189_v5, %s642_s22 }
  0x1b   : > { %228 = vrot.lane.b32.xlu2 %v693_v1, %s643_s23 }
  0x23   : > { %328 = vrot.lane.b32.xlu2 %v693_v1, %s644_s24 }
  0x2b   : > { %397 = vrot.lane.b32.xlu2 %v693_v1, %s645_s25 }
  0x33   : > { %325 = vrot.lane.b32.xlu2 %v189_v5, %s646_s26 }
  0x3b   : > { %394 = vrot.lane.b32.xlu2 %v189_v5, %s647_s27 }
  0x6d   : > { %v257_v8 = vpop.permute.xlu2 %256 }
  0x75   : > { %v229_v13 = vpop.permute.xlu2 %228 }
  0x76   : > { %v235_v18 = vsel %vm233_vm1, %v229_v13, 0 }
  0x77   : > { %244 = vmatpush.bf16.msra.mxu1 %v235_v18 }
  0x7d   : > { %v329_v14 = vpop.permute.xlu2 %328 }
  0x7e   : > { %v334_v16 = vsel %vm195_vm0, %v329_v14, 0 }
  0x7f   : > { %343 = vmatpush.bf16.xpose.msrb.mxu1 %v334_v16 }
  0x84   : > { %v194_v2 = vpop.permute.xlu0 %193  ;;  %v260_v6 = vpop.permute.xlu1 %259 }
  0x85   : > { %v200_v3 = vsel %vm195_vm0, %v194_v2, 0  ;;  %v265_v7 = vsel %vm195_vm0, %v260_v6, 0  ;;  %v398_v15 = vpop.permute.xlu2 %397 }
  0x86   : > { %209 = vmatpush.bf16.xpose.msra.mxu0 %v200_v3  ;;  %274 = vmatpush.bf16.xpose.msra.mxu2 %v265_v7  ;;  %v403_v17 = vsel %vm195_vm0, %v398_v15, 0 }
  0x8d   : > { %552 = vmatmul.msk.bf16.vlgmr.msra.gmra.mxu0 %vm195_vm0, %v189_v5  ;;  %554 = vmatmul.msk.bf16.vlgmr.msra.gmra.mxu2 %vm195_vm0, %v257_v8  ;;  %v326_v19 = vpop.permute.xlu2 %325 }
  0x8e   : > { %412 = vmatpush.bf16.xpose.msrb.mxu0 %v403_v17 }
  0x95   : > { %v395_v20 = vpop.permute.xlu2 %394 }
  0x9d   : > { %558 = vmatmul.msk.bf16.vlgmr.msrb.gmra.mxu0 %vm195_vm0, %v395_v20 }
 0x10a   : > { %v211_v9 = vpop.f32.mrf.mxu0 }
 0x10b   : > { %v215_v10 = vmul.f32 0.35355338, %v211_v9 }
 0x10d   : > { %v216_v11 = vsel %vm195_vm0, %v215_v10, -inf }
 0x10e   : > { %217 = vmax.xlane.f32.xlu0 %v216_v11 }
 0x110   : > { %v276_v21 = vpop.f32.mrf.mxu2 }
 0x111   : > { %v280_v22 = vmul.f32 0.35355338, %v276_v21 }
 0x112   : > { %v213_v12 = vpop.f32.mrf.mxu0 }
 0x113   : > { %v281_v24 = vsel %vm195_vm0, %v280_v22, -inf }
 0x114   : > { %282 = vmax.xlane.f32.xlu2 %v281_v24 }
 0x118   : > { %v278_v27 = vpop.f32.mrf.mxu2 }
 0x11a   : > { %v414_v30 = vpop.f32.mrf.mxu0 }
 0x11b   : > { %v418_v31 = vmul.f32 0.35355338, %v414_v30 }
 0x11d   : > { %v419_v32 = vsel %vm195_vm0, %v418_v31, -inf }
 0x122   : > { %v416_v34 = vpop.f32.mrf.mxu0 }
 0x181   : > { %v218_v23 = vpop.xlane.xlu0 %217 }
 0x182   : > { %v219_v25 = vsub.f32 %v215_v10, %v218_v23 }
 0x184   : > { %v220_v26 = vmul.f32 1.442695, %v219_v25 }
 0x186   : > { %600 = vpow2.f32 %v220_v26 }
 0x187   : > { %v283_v39 = vpop.xlane.xlu2 %282 }
 0x188   : > { %v284_v41 = vsub.f32 %v280_v22, %v283_v39 }
 0x18a   : > { %v285_v42 = vmul.f32 1.442695, %v284_v41 }
 0x18c   : > { %v601_v28 = vpop.eup %600 }
 0x18d   : > { %v222_v29 = vsel %vm195_vm0, %v601_v28, 0.0 }
 0x18e   : > { %223 = vadd.xlane.f32.xlu1 %v222_v29 }
 0x196   : > { %420 = vmax.xlane.f32.xlu1 %v419_v32 }
 0x1af   : > { %293 = vrot.lane.b32.xlu1 %v693_v1, %s648_s28 }
 0x1b7   : > { %431 = vrot.lane.b32.xlu1 %v693_v1, %s649_s29 }
 0x201   : > { %v224_v33 = vpop.xlane.xlu1 %223 }
 0x202   : > { %602 = vrcp.f32 %v224_v33 }
 0x203   : > { %604 = vpow2.f32 %v285_v42 }
 0x208   : > { %v603_v35 = vpop.eup %602 }
 0x209   : > { %v226_v36 = vmul.f32 %v603_v35, %v601_v28  ;;  %v421_v43 = vpop.xlane.xlu1 %420  ;;  %v605_v49 = vpop.eup %604 }
 0x20a   : > { %v422_v46 = vsub.f32 %v418_v31, %v421_v43  ;;  %v287_v51 = vsel %vm195_vm0, %v605_v49, 0.0 }
 0x20b   : > { %v227_v37 = vpack.c.bf16 %v226_v36, %v226_v36 }
 0x20c   : > { %v423_v48 = vmul.f32 1.442695, %v422_v46 }
 0x20d   : > { %553 = vmatmul.msk.bf16.vlgmr.msra.gmra.mxu1 %vm195_vm0, %v227_v37 }
 0x20e   : > { %606 = vpow2.f32 %v423_v48 }
 0x214   : > { %v607_v52 = vpop.eup %606 }
 0x215   : > { %v425_v53 = vsel %vm195_vm0, %v607_v52, 0.0 }
 0x21d   : > { %556 = vmatmul.msk.bf16.vlgmr.msrb.gmra.mxu1 %vm195_vm0, %v326_v19 }
 0x221   : > { %v294_v54 = vpop.permute.xlu1 %293 }
 0x222   : > { %v299_v55 = vsel %vm233_vm1, %v294_v54, 0 }
 0x223   : > { %308 = vmatpush.bf16.msra.mxu3 %v299_v55 }
 0x229   : > { %v432_v56 = vpop.permute.xlu1 %431 }
 0x22a   : > { %v437_v57 = vsel %vm233_vm1, %v432_v56, 0 }
 0x22b   : > { %446 = vmatpush.bf16.msrb.mxu2 %v437_v57 }
 0x28a   : > { %v246_v38 = vpop.f32.mrf.mxu1 }
 0x28b   : > { %250 = vst.msk [vmem:[%s724_s4] sm:$0xff] %vm195_vm0, %v246_v38 }
 0x292   : > { %v248_v40 = vpop.f32.mrf.mxu1 }
 0x29a   : > { %v345_v44 = vpop.f32.mrf.mxu1 }
 0x29b   : > { %v349_v45 = vmul.f32 0.35355338, %v345_v44 }
 0x29d   : > { %v350_v47 = vsel %vm195_vm0, %v349_v45, -inf }
 0x29e   : > { %351 = vmax.xlane.f32.xlu0 %v350_v47 }
 0x2a2   : > { %v347_v50 = vpop.f32.mrf.mxu1 }
 0x2a6   : > { %288 = vadd.xlane.f32.xlu0 %v287_v51 }
 0x2ae   : > { %426 = vadd.xlane.f32.xlu0 %v425_v53 }
 0x311   : > { %v352_v58 = vpop.xlane.xlu0 %351 }
 0x312   : > { %v353_v59 = vsub.f32 %v349_v45, %v352_v58 }
 0x314   : > { %v354_v60 = vmul.f32 1.442695, %v353_v59 }
 0x316   : > { %608 = vpow2.f32 %v354_v60 }
 0x319   : > { %v289_v61 = vpop.xlane.xlu0 %288 }
 0x31a   : > { %610 = vrcp.f32 %v289_v61 }
 0x31c   : > { %v609_v62 = vpop.eup %608 }
 0x31d   : > { %v356_v63 = vsel %vm195_vm0, %v609_v62, 0.0 }
 0x31e   : > { %357 = vadd.xlane.f32.xlu0 %v356_v63 }
 0x320   : > { %v611_v0 = vpop.eup %610 }
 0x321   : > { %v427_v2 = vpop.xlane.xlu0 %426  ;;  %v291_v3 = vmul.f32 %v611_v0, %v605_v49 }
 0x322   : > { %612 = vrcp.f32 %v427_v2 }
 0x323   : > { %v292_v4 = vpack.c.bf16 %v291_v3, %v291_v3 }
 0x325   : > { %555 = vmatmul.msk.bf16.vlgmr.msra.gmra.mxu3 %vm195_vm0, %v292_v4 }
 0x328   : > { %v613_v5 = vpop.eup %612 }
 0x329   : > { %v429_v6 = vmul.f32 %v613_v5, %v607_v52 }
 0x32b   : > { %v430_v7 = vpack.c.bf16 %v429_v6, %v429_v6 }
 0x32d   : > { %559 = vmatmul.msk.bf16.vlgmr.msrb.gmra.mxu2 %vm195_vm0, %v430_v7 }
 0x332   : > { %362 = vrot.lane.b32.xlu0 %v693_v1, %s650_s5 }
 0x391   : > { %v358_v8 = vpop.xlane.xlu0 %357 }
 0x392   : > { %614 = vrcp.f32 %v358_v8 }
 0x398   : > { %v615_v9 = vpop.eup %614 }
 0x399   : > { %v360_v10 = vmul.f32 %v615_v9, %v609_v62 }
 0x39b   : > { %v361_v13 = vpack.c.bf16 %v360_v10, %v360_v10 }
 0x3a4   : > { %v363_v11 = vpop.permute.xlu0 %362 }
 0x3a5   : > { %v368_v12 = vsel %vm233_vm1, %v363_v11, 0 }
 0x3a6   : > { %377 = vmatpush.bf16.msrb.mxu3 %v368_v12 }
 0x3a8   : > { %v310_v14 = vpop.f32.mrf.mxu3 }
 0x3a9   : > { %557 = vmatmul.msk.bf16.vlgmr.msrb.gmra.mxu3 %vm195_vm0, %v361_v13  ;;  %315 = vrot.lane.b32.xlu2 %v310_v14, %s651_s6 }
 0x3b0   : > { %v312_v15 = vpop.f32.mrf.mxu3  ;;  %v448_v16 = vpop.f32.mrf.mxu2 }
 0x3b8   : > { %v450_v1 = vpop.f32.mrf.mxu2 }
 0x403   : > { %v316_v17 = vpop.permute.xlu2 %315 }
 0x404   : > { %319 = vst.msk [vmem:[%s724_s4] sm:$0xff] %vm318_vm2, %v316_v17 }
 0x42c   : > { %v379_v18 = vpop.f32.mrf.mxu3 }
 0x42d   : > { %384 = vrot.lane.b32.xlu1 %v379_v18, %s652_s7 }
 0x434   : > { %v381_v19 = vpop.f32.mrf.mxu3 }
 0x435   : > { %453 = vrot.lane.b32.xlu1 %v448_v16, %s653_s8 }
 0x49f   : > { %v385_v20 = vpop.permute.xlu1 %384 }
 0x4a0   : > { %388 = vst.msk [vmem:[%s724_s4] sm:$0xff] %vm387_vm3, %v385_v20 }
 0x4a7   : > { %v454_v21 = vpop.permute.xlu1 %453 }
 0x4a8   : > { %457 = vst.msk [vmem:[%s724_s4] sm:$0xff] %vm456_vm4, %v454_v21 }
 0x4a9 PF: > { %s12_s11 = sadd.s32 1, %s638_s11   ;;  %s754_s9 = smov %s634_s10 }
 0x4aa   : > { %p9_p5 = scmp.ge.s32.totalorder %s12_s11, 4   ;;  %s755_s10 = smov %s757_s12 }
 0x4ac   :  { %11 = sbr.rel (!%p9_p5) target bundleno = 2 (0x2), region = 61 }

// kernel: transformer_forward.31
= control target key start
LH: loop header
LB: loop body
LE: loop exit
PB: predicated region body
PF: predicated region fallthrough
CT: control target
= control target key end

     0   :  { %vm28_vm0 = vcmask 261120   ;;  %v180_v1 = vmov 0.0   ;;  %v181_v23 = vmov 32.0   ;;  %s285_s1 = inlined_call_operand.vmem [shape: bf16[32,32], index: 1, kind: input, shape index: {}]   ;;  %s286_s0 = inlined_call_operand.vmem [shape: f32[16,32], index: 0, kind: input, shape index: {}]   ;;  %s287_s6 = inlined_call_operand.vmem [shape: f32[16,32], index: 6, kind: output, shape index: {}]   ;;  %s288_s2 = inlined_call_operand.vmem [shape: f32[1,32], index: 2, kind: input, shape index: {}]   ;;  %s289_s3 = inlined_call_operand.vmem [shape: f32[16,32], index: 3, kind: input, shape index: {}]   ;;  %s290_s4 = inlined_call_operand.vmem [shape: f32[1,32], index: 4, kind: input, shape index: {}]   ;;  %s291_s5 = inlined_call_operand.vmem [shape: f32[1,32], index: 5, kind: input, shape index: {}]  }
   0x1   :  { %v168_v0 = vld [vmem:[%s285_s1 + $0x8] sm:$0xff]  ;;  %29 = vst.msk [vmem:[%s287_s6] sm:$0xff] %vm28_vm0, %v180_v1  ;;  %v167_v2 = vld [vmem:[%s285_s1] sm:$0xff]  ;;  %174 = vrcp.f32 %v181_v23 }
   0x2   :  { %30 = vst.msk [vmem:[%s287_s6 + $0x8] sm:$0xff] %vm28_vm0, %v180_v1  ;;  %62 = vmatpush.bf16.msra.mxu0 %v168_v0  ;;  %v33_v3 = vld [vmem:[%s286_s0] sm:$0xff]  ;;  %v34_v4 = vld [vmem:[%s286_s0 + $0x8] sm:$0xff] }
   0x3   :  { %v35_v5 = vpack.c.bf16 %v34_v4, %v33_v3  ;;  %v171_v10 = vld [vmem:[%s288_s2] ss:$0 sm:$0xff]  ;;  %v86_v19 = vld [vmem:[%s289_s3 + $0x8] sm:$0xff] }
   0x4   :  { %v85_v14 = vld [vmem:[%s289_s3] sm:$0xff] }
   0x5   :  { %v172_v54 = vld [vmem:[%s290_s4] ss:$0 sm:$0xff] }
   0x6   :  { %63 = vmatpush.bf16.msra.mxu0 %v167_v2  ;;  %v173_v57 = vld [vmem:[%s291_s5] ss:$0 sm:$0xff] }
   0x7   :  { %v175_v24 = vpop.eup %174 }
   0x8   :  { %v31_v6 = vld [vmem:[%s287_s6] sm:$0xff]  ;;  %v96_v25 = vmul.f32 32.0, %v175_v24  ;;  %vm100_vm1 = vweird.f32 %v175_v24 }
   0x9   :  { %166 = vmatmul.msk.bf16.vlgmr.msra.gmra.mxu0 %vm28_vm0, %v35_v5  ;;  %v32_v9 = vld [vmem:[%s287_s6 + $0x8] sm:$0xff] }
   0xa   :  { %v97_v26 = vsub.f32 1.0, %v96_v25 }
   0xc   :  { %v98_v27 = vmul.f32 %v175_v24, %v97_v26 }
   0xe   :  { %v99_v28 = vadd.f32 %v175_v24, %v98_v27 }
  0x10   :  { %v101_v29 = vsel %vm100_vm1, %v175_v24, %v99_v28 }
  0x86   :  { %v65_v7 = vpop.f32.mrf.mxu0 }
  0x87   :  { %v70_v8 = vadd.f32 %v65_v7, %v31_v6 }
  0x89   :  { %72 = vst.msk [vmem:[%s287_s6] sm:$0xff] %vm28_vm0, %v70_v8 }
  0x8e   :  { %v67_v11 = vpop.f32.mrf.mxu0 }
  0x8f   :  { %v71_v12 = vadd.f32 %v67_v11, %v32_v9 }
  0x90   :  { %v77_v13 = vld [vmem:[%s287_s6] sm:$0xff] }
  0x91   :  { %73 = vst.msk [vmem:[%s287_s6 + $0x8] sm:$0xff] %vm28_vm0, %v71_v12  ;;  %v83_v15 = vadd.f32 %v171_v10, %v77_v13 }
  0x93   :  { %v87_v16 = vadd.f32 %v85_v14, %v83_v15 }
  0x95   :  { %v89_v17 = vsel %vm28_vm0, %v87_v16, 0.0 }
  0x96   :  { %90 = vadd.xlane.f32.xlu0 %v89_v17 }
  0x98   :  { %v78_v18 = vld [vmem:[%s287_s6 + $0x8] sm:$0xff] }
  0x99   :  { %v84_v20 = vadd.f32 %v171_v10, %v78_v18 }
  0x9b   :  { %v88_v21 = vadd.f32 %v86_v19, %v84_v20 }
  0x9d   :  { %v92_v22 = vsel %vm28_vm0, %v88_v21, 0.0 }
  0x9e   :  { %93 = vadd.xlane.f32.xlu0 %v92_v22 }
 0x109   :  { %v91_v30 = vpop.xlane.xlu0 %90 }
 0x10a   :  { %v102_v31 = vmul.f32 %v101_v29, %v91_v30 }
 0x10c   :  { %v104_v32 = vsub.f32 %v87_v16, %v102_v31 }
 0x10e   :  { %v106_v33 = vmul.f32 %v104_v32, %v104_v32 }
 0x110   :  { %v108_v34 = vsel %vm28_vm0, %v106_v33, 0.0 }
 0x111   :  { %109 = vadd.xlane.f32.xlu1 %v108_v34  ;;  %v94_v35 = vpop.xlane.xlu0 %93 }
 0x112   :  { %v103_v36 = vmul.f32 %v101_v29, %v94_v35 }
 0x114   :  { %v105_v37 = vsub.f32 %v88_v21, %v103_v36 }
 0x116   :  { %v107_v38 = vmul.f32 %v105_v37, %v105_v37 }
 0x118   :  { %v111_v39 = vsel %vm28_vm0, %v107_v38, 0.0 }
 0x119   :  { %112 = vadd.xlane.f32.xlu1 %v111_v39 }
 0x184   :  { %v110_v40 = vpop.xlane.xlu1 %109 }
 0x185   :  { %v114_v41 = vmul.f32 %v110_v40, %v101_v29 }
 0x187   :  { %v116_v42 = vadd.f32 1e-05, %v114_v41 }
 0x189   :  { %176 = vrsqrt.f32 %v116_v42  ;;  %vm124_vm3 = vweird.f32 %v116_v42 }
 0x18c   :  { %v113_v43 = vpop.xlane.xlu1 %112 }
 0x18d   :  { %v115_v44 = vmul.f32 %v113_v43, %v101_v29 }
 0x18f   :  { %v177_v45 = vpop.eup %176  ;;  %v117_v46 = vadd.f32 1e-05, %v115_v44 }
 0x190   :  { %v119_v47 = vmul.f32 %v177_v45, %v116_v42  ;;  %vm125_vm2 = vweird.f32 %v177_v45 }
 0x191   :  { %178 = vrsqrt.f32 %v117_v46  ;;  %vm126_vm4 = vmor %vm124_vm3, %vm125_vm2  ;;  %vm134_vm6 = vweird.f32 %v117_v46 }
 0x192   :  { %v120_v48 = vmul.f32 %v177_v45, %v119_v47 }
 0x194   :  { %v121_v49 = vmul.f32 0.5, %v120_v48 }
 0x196   :  { %v122_v50 = vsub.f32 1.5, %v121_v49 }
 0x197   :  { %v179_v51 = vpop.eup %178 }
 0x198   :  { %v123_v52 = vmul.f32 %v177_v45, %v122_v50  ;;  %v129_v53 = vmul.f32 %v179_v51, %v117_v46  ;;  %vm135_vm5 = vweird.f32 %v179_v51 }
 0x199   :  { %vm136_vm7 = vmor %vm134_vm6, %vm135_vm5 }
 0x19a   :  { %v127_v55 = vsel %vm126_vm4, %v177_v45, %v123_v52  ;;  %v130_v56 = vmul.f32 %v179_v51, %v129_v53 }
 0x19b   :  { %v138_v58 = vmul.f32 %v127_v55, %v104_v32 }
 0x19c   :  { %v131_v59 = vmul.f32 0.5, %v130_v56 }
 0x19d   :  { %v144_v60 = vmul.f32 %v172_v54, %v138_v58 }
 0x19e   :  { %v132_v61 = vsub.f32 1.5, %v131_v59 }
 0x19f   :  { %v150_v62 = vadd.f32 %v173_v57, %v144_v60 }
 0x1a0   :  { %v133_v63 = vmul.f32 %v179_v51, %v132_v61 }
 0x1a1   :  { %152 = vst.msk [vmem:[%s287_s6] sm:$0xff] %vm28_vm0, %v150_v62 }
 0x1a2   :  { %v137_v0 = vsel %vm136_vm7, %v179_v51, %v133_v63 }
 0x1a3   :  { %v139_v1 = vmul.f32 %v137_v0, %v105_v37 }
 0x1a5   :  { %v145_v2 = vmul.f32 %v172_v54, %v139_v1 }
 0x1a7   :  { %v151_v3 = vadd.f32 %v173_v57, %v145_v2 }
 0x1a9   :  { %153 = vst.msk [vmem:[%s287_s6 + $0x8] sm:$0xff] %vm28_vm0, %v151_v3 }

// kernel: transformer_forward.37
= control target key start
LH: loop header
LB: loop body
LE: loop exit
PB: predicated region body
PF: predicated region fallthrough
CT: control target
= control target key end

     0   :  { %vm16_vm0 = vcmask 261120   ;;  %v95_v4 = vmov 32.0   ;;  %s140_s0 = inlined_call_operand.vmem [shape: f32[16,32], index: 0, kind: input, shape index: {}]   ;;  %s141_s1 = inlined_call_operand.vmem [shape: f32[1,32], index: 1, kind: input, shape index: {}]   ;;  %s142_s2 = inlined_call_operand.vmem [shape: f32[1,32], index: 2, kind: input, shape index: {}]   ;;  %s143_s3 = inlined_call_operand.vmem [shape: f32[16,32], index: 3, kind: output, shape index: {}]  }
   0x1   :  { %v14_v0 = vld [vmem:[%s140_s0] sm:$0xff]  ;;  %v15_v2 = vld [vmem:[%s140_s0 + $0x8] sm:$0xff]  ;;  %89 = vrcp.f32 %v95_v4 }
   0x2   :  { %v17_v1 = vsel %vm16_vm0, %v14_v0, 0.0  ;;  %v20_v3 = vsel %vm16_vm0, %v15_v2, 0.0  ;;  %v87_v35 = vld [vmem:[%s141_s1] ss:$0 sm:$0xff] }
   0x3   :  { %18 = vadd.xlane.f32.xlu0 %v17_v1  ;;  %v88_v38 = vld [vmem:[%s142_s2] ss:$0 sm:$0xff] }
   0x7   :  { %v90_v5 = vpop.eup %89 }
   0x8   :  { %v24_v6 = vmul.f32 32.0, %v90_v5  ;;  %vm28_vm1 = vweird.f32 %v90_v5 }
   0xa   :  { %v25_v7 = vsub.f32 1.0, %v24_v6 }
   0xb   :  { %21 = vadd.xlane.f32.xlu0 %v20_v3 }
   0xc   :  { %v26_v8 = vmul.f32 %v90_v5, %v25_v7 }
   0xe   :  { %v27_v9 = vadd.f32 %v90_v5, %v26_v8 }
  0x10   :  { %v29_v10 = vsel %vm28_vm1, %v90_v5, %v27_v9 }
  0x76   :  { %v19_v11 = vpop.xlane.xlu0 %18 }
  0x77   :  { %v30_v12 = vmul.f32 %v29_v10, %v19_v11 }
  0x79   :  { %v32_v13 = vsub.f32 %v14_v0, %v30_v12 }
  0x7b   :  { %v34_v14 = vmul.f32 %v32_v13, %v32_v13 }
  0x7d   :  { %v36_v15 = vsel %vm16_vm0, %v34_v14, 0.0 }
  0x7e   :  { %37 = vadd.xlane.f32.xlu1 %v36_v15  ;;  %v22_v16 = vpop.xlane.xlu0 %21 }
  0x7f   :  { %v31_v17 = vmul.f32 %v29_v10, %v22_v16 }
  0x81   :  { %v33_v18 = vsub.f32 %v15_v2, %v31_v17 }
  0x83   :  { %v35_v19 = vmul.f32 %v33_v18, %v33_v18 }
  0x85   :  { %v39_v20 = vsel %vm16_vm0, %v35_v19, 0.0 }
  0x86   :  { %40 = vadd.xlane.f32.xlu1 %v39_v20 }
  0xf1   :  { %v38_v21 = vpop.xlane.xlu1 %37 }
  0xf2   :  { %v42_v22 = vmul.f32 %v38_v21, %v29_v10 }
  0xf4   :  { %v44_v23 = vadd.f32 1e-05, %v42_v22 }
  0xf6   :  { %91 = vrsqrt.f32 %v44_v23  ;;  %vm52_vm3 = vweird.f32 %v44_v23 }
  0xf9   :  { %v41_v24 = vpop.xlane.xlu1 %40 }
  0xfa   :  { %v43_v25 = vmul.f32 %v41_v24, %v29_v10 }
  0xfc   :  { %v92_v26 = vpop.eup %91  ;;  %v45_v27 = vadd.f32 1e-05, %v43_v25 }
  0xfd   :  { %v47_v28 = vmul.f32 %v92_v26, %v44_v23  ;;  %vm53_vm2 = vweird.f32 %v92_v26 }
  0xfe   :  { %93 = vrsqrt.f32 %v45_v27  ;;  %vm54_vm4 = vmor %vm52_vm3, %vm53_vm2  ;;  %vm62_vm6 = vweird.f32 %v45_v27 }
  0xff   :  { %v48_v29 = vmul.f32 %v92_v26, %v47_v28 }
 0x101   :  { %v49_v30 = vmul.f32 0.5, %v48_v29 }
 0x103   :  { %v50_v31 = vsub.f32 1.5, %v49_v30 }
 0x104   :  { %v94_v32 = vpop.eup %93 }
 0x105   :  { %v51_v33 = vmul.f32 %v92_v26, %v50_v31  ;;  %v57_v34 = vmul.f32 %v94_v32, %v45_v27  ;;  %vm63_vm5 = vweird.f32 %v94_v32 }
 0x106   :  { %vm64_vm7 = vmor %vm62_vm6, %vm63_vm5 }
 0x107   :  { %v55_v36 = vsel %vm54_vm4, %v92_v26, %v51_v33  ;;  %v58_v37 = vmul.f32 %v94_v32, %v57_v34 }
 0x108   :  { %v66_v39 = vmul.f32 %v55_v36, %v32_v13 }
 0x109   :  { %v59_v40 = vmul.f32 0.5, %v58_v37 }
 0x10a   :  { %v72_v41 = vmul.f32 %v87_v35, %v66_v39 }
 0x10b   :  { %v60_v42 = vsub.f32 1.5, %v59_v40 }
 0x10c   :  { %v78_v43 = vadd.f32 %v88_v38, %v72_v41 }
 0x10d   :  { %v61_v44 = vmul.f32 %v94_v32, %v60_v42 }
 0x10e   :  { %80 = vst.msk [vmem:[%s143_s3] sm:$0xff] %vm16_vm0, %v78_v43 }
 0x10f   :  { %v65_v45 = vsel %vm64_vm7, %v94_v32, %v61_v44 }
 0x110   :  { %v67_v46 = vmul.f32 %v65_v45, %v33_v18 }
 0x112   :  { %v73_v47 = vmul.f32 %v87_v35, %v67_v46 }
 0x114   :  { %v79_v48 = vadd.f32 %v88_v38, %v73_v47 }
 0x116   :  { %81 = vst.msk [vmem:[%s143_s3 + $0x8] sm:$0xff] %vm16_vm0, %v79_v48 }

// kernel: transformer_forward.32
= control target key start
LH: loop header
LB: loop body
LE: loop exit
PB: predicated region body
PF: predicated region fallthrough
CT: control target
= control target key end

     0   :  { %s1390_s24 = smov 0   ;;  %s1392_s25 = smov 0   ;;  %s1584_s0 = inlined_call_operand.vmem [shape: f32[16,32], index: 0, kind: input, shape index: {}]   ;;  %s1585_s1 = inlined_call_operand.vmem [shape: bf16[32,2048], index: 1, kind: input, shape index: {}]   ;;  %s1586_s2 = inlined_call_operand.vmem [shape: f32[1,2048], index: 2, kind: input, shape index: {}]   ;;  %s1587_s3 = inlined_call_operand.vmem [shape: bf16[2048,32], index: 3, kind: input, shape index: {}]   ;;  %s1588_s4 = inlined_call_operand.vmem [shape: f32[1,32], index: 4, kind: input, shape index: {}]   ;;  %s1589_s5 = inlined_call_operand.vmem [shape: f32[1,32], index: 5, kind: input, shape index: {}]   ;;  %s1590_s6 = inlined_call_operand.vmem [shape: f32[1,32], index: 6, kind: input, shape index: {}]   ;;  %s1591_s7 = inlined_call_operand.vmem [shape: f32[16,32], index: 7, kind: output, shape index: {}]  }
   0x1   :  { %s1394_s26 = smov 0   ;;  %s1396_s27 = smov 0  }
   0x2   :  { %s1398_s28 = smov 0  }
   0x3 LB: > { %s26_s29 = sadd.s32 1, %s1342_s27  ;;  %p69_p1 = scmp.ne.s32.totalorder %s1334_s25, %s1330_s24  ;;  %s1346_s28 = sphi %s1398_s28, %s17_s28   ;;  %s1342_s27 = sphi %s1396_s27, %s1595_s27   ;;  %s1338_s26 = sphi %s1394_s26, %s1594_s26   ;;  %s1334_s25 = sphi %s1392_s25, %s1593_s25   ;;  %s1330_s24 = sphi %s1390_s24, %s1592_s24  }
   0x4   : > { %p27_p0 = scmp.ge.s32.totalorder %s26_s29, 4  ;;  %p70_p2 = scmp.eq.s32.totalorder %s1346_s28, 0 }
   0x5   : > { %s62_s8 = sadd.s32 1, %s1334_s25  ;;  %p1037_p5 = scmp.ge.s32.totalorder %s1346_s28, 4 }
   0x6   : > { %s1597_s29 = smov (%p27_p0, %s26_s29), 0  ;;  %p71_p3 = por %p70_p2, %p69_p1 }
   0x7   : > { %s59_s30 = ssub.s32 %s1342_s27, %s1597_s29  ;;  %254 = sbr.rel (%p1037_p5) target bundleno = 24 (0x18), region = 32 }
   0x8   : > { %p60_p4 = scmp.eq.s32.totalorder %s59_s30, 0 }
   0xa   : > { %s1425_s9 = scalar_select %p60_p4, %s1334_s25, %s62_s8  }
   0xc   : > { %257 = sbr.rel (!%p71_p3) target bundleno = 24 (0x18), region = 36  ;;  %s259_s10 = sand.u32 (%p71_p3), 1, %s1334_s25  }
   0xd   : > { %s1216_s11 = sshll.u32 (%p71_p3), %s1342_s27, 4  ;;  %s1038_s12 = sshll.u32 (%p71_p3), %s259_s10, 6 }
   0xe   : > { %s264_s15 = scalar_lea.vmem (%p71_p3), %s1585_s1, %s1216_s11  ;;  %s261_s16 = scalar_lea.vmem (%p71_p3), [#allocation2], %s1038_s12 }
   0xf   : > { %v277_v0 = vld [vmem:[%s264_s15] sm:$0xff] (%p71_p3)  ;;  %v279_v1 = vld [vmem:[%s264_s15 + $0x8] sm:$0xff] (%p71_p3) }
  0x10   : > { %v281_v2 = vld [vmem:[%s264_s15 + $0x40] sm:$0xff] (%p71_p3)  ;;  %278 = vst [vmem:[%s261_s16] sm:$0xff] (%p71_p3), %v277_v0  ;;  %v283_v3 = vld [vmem:[%s264_s15 + $0x48] sm:$0xff] (%p71_p3) }
  0x11   : > { %280 = vst [vmem:[%s261_s16 + $0x8] sm:$0xff] %v279_v1  ;;  %v285_v4 = vld [vmem:[%s264_s15 + $0x80] sm:$0xff]  ;;  %v287_v5 = vld [vmem:[%s264_s15 + $0x88] sm:$0xff] }
  0x12   : > { %282 = vst [vmem:[%s261_s16 + $0x10] sm:$0xff] %v281_v2  ;;  %v289_v6 = vld [vmem:[%s264_s15 + $0xc0] sm:$0xff]  ;;  %v291_v7 = vld [vmem:[%s264_s15 + $0xc8] sm:$0xff] }
  0x13   : > { %284 = vst [vmem:[%s261_s16 + $0x18] sm:$0xff] %v283_v3 }
  0x14   : > { %286 = vst [vmem:[%s261_s16 + $0x20] sm:$0xff] %v285_v4 }
  0x15   : > { %288 = vst [vmem:[%s261_s16 + $0x28] sm:$0xff] %v287_v5 }
  0x16   : > { %290 = vst [vmem:[%s261_s16 + $0x30] sm:$0xff] %v289_v6 }
  0x17   : > { %292 = vst [vmem:[%s261_s16 + $0x38] sm:$0xff] %v291_v7 }
  0x18 PF: > { %p1041_p6 = scmp.ge.s32.totalorder %s1346_s28, 1  ;;  %p314_p7 = scmp.lt.s32.totalorder %s1346_s28, 5 }
  0x1a   : > { %p315_p8 = pnand %p1041_p6, %p314_p7 }
  0x1b   : > { %s321_s17 = sand.u32 (!%p315_p8), 1, %s1330_s24   ;;  %s1043_s18 = sshll.u32 (!%p315_p8), %s1338_s26, 2 }
  0x1c   : > { %318 = sbr.rel (%p315_p8) target bundleno = 631 (0x277), region = 67  ;;  %s1042_s19 = sshll.u32 (!%p315_p8), %s321_s17, 6 }
  0x1d   : > { %p374_p9 = scmp.lt.s32.totalorder (!%p315_p8), %s1043_s18, 15  ;;  %s1044_s20 = sshll.u32 (!%p315_p8), %s1338_s26, 6 }
  0x1e   : > { %p379_p10 = scmp.lt.s32.totalorder (!%p315_p8), %s1044_s20, 255  ;;  %s1449_s24 = scalar_lea.vmem (!%p315_p8), [#allocation2], %s1042_s19 }
  0x1f   : > { %p1046_p11 = scmp.ne.s32.totalorder (!%p315_p8), %s1338_s26, 0 }
  0x21   : > { %s1599_s18 = smov (!%p374_p9, %s1043_s18), 15  ;;  %s1601_s20 = smov (!%p379_p10, %s1044_s20), 255 }
  0x22   : > { %s376_s23 = scalar_lea.vmem %s1586_s2, %s1599_s18  ;;  %s1045_s30 = sshll.u32 %s1601_s20, 2 }
  0x23   : > { %s1447_s11 = scalar_lea.vmem %s1587_s3, %s1045_s30  ;;  %394 = sbr.rel (%p1046_p11) target bundleno = 43 (0x2b), region = 75 }
  0x28   : > { %vm395_vm0 = vcmask 261120   ;;  %v1348_v8 = vmov 0.0  }
  0x29   : > { %396 = vst.msk [vmem:[%s1591_s7] sm:$0xff] %vm395_vm0, %v1348_v8 }
  0x2a   : > { %397 = vst.msk [vmem:[%s1591_s7 + $0x8] sm:$0xff] %vm395_vm0, %v1348_v8 }
  0x2b PF: > { %v1065_v9 = vld [vmem:[%s1449_s24 + $0x20] sm:$0xf]  ;;  %v1223_v10 = vld [vmem:[%s1449_s24 + $0x2c] sm:$0xf0]  ;;  %v1221_v11 = vld [vmem:[%s1449_s24 + $0x24] sm:$0xf] }
  0x2c   : > { %v1066_v12 = vor.u32 %v1223_v10, %v1065_v9  ;;  %v1067_v13 = vld [vmem:[%s1449_s24 + $0x30] sm:$0xf0]  ;;  %v1073_v14 = vld [vmem:[%s1449_s24 + $0x28] sm:$0xf]  ;;  %v1224_v15 = vld [vmem:[%s1449_s24 + $0x34] sm:$0xf0] }
  0x2d   : > { %v1070_v16 = vor.u32 %v1221_v11, %v1067_v13  ;;  %v1074_v17 = vor.u32 %v1224_v15, %v1073_v14  ;;  %v1222_v18 = vld [vmem:[%s1449_s24 + $0x2c] sm:$0xf]  ;;  %v1075_v19 = vld [vmem:[%s1449_s24 + $0x38] sm:$0xf0]  ;;  %v1049_v20 = vld [vmem:[%s1449_s24] sm:$0xf] }
  0x2e   : > { %469 = vmatpush.bf16.msra.mxu0 %v1066_v12  ;;  %v1078_v21 = vor.u32 %v1222_v18, %v1075_v19  ;;  %v1219_v22 = vld [vmem:[%s1449_s24 + $0xc] sm:$0xf0]  ;;  %v1217_v23 = vld [vmem:[%s1449_s24 + $0x4] sm:$0xf]  ;;  %v1051_v24 = vld [vmem:[%s1449_s24 + $0x10] sm:$0xf0] }
  0x2f   : > { %483 = vmatpush.bf16.msra.mxu1 %v1070_v16  ;;  %497 = vmatpush.bf16.msra.mxu2 %v1074_v17  ;;  %v1050_v25 = vor.u32 %v1219_v22, %v1049_v20  ;;  %v1054_v26 = vor.u32 %v1217_v23, %v1051_v24  ;;  %v1057_v27 = vld [vmem:[%s1449_s24 + $0x8] sm:$0xf]  ;;  %v1220_v28 = vld [vmem:[%s1449_s24 + $0x14] sm:$0xf0]  ;;  %v1218_v29 = vld [vmem:[%s1449_s24 + $0xc] sm:$0xf] }
  0x30   : > { %511 = vmatpush.bf16.msra.mxu3 %v1078_v21  ;;  %v1058_v30 = vor.u32 %v1220_v28, %v1057_v27  ;;  %v1059_v31 = vld [vmem:[%s1449_s24 + $0x18] sm:$0xf0]  ;;  %v398_v32 = vld [vmem:[%s1584_s0] sm:$0xff]  ;;  %v399_v33 = vld [vmem:[%s1584_s0 + $0x8] sm:$0xff]  ;;  %vm459_vm1 = vcmask 261120   ;;  %p1211_p12 = scmp.ne.s32.totalorder %s1338_s26, 3 }
  0x31   : > { %v1062_v34 = vor.u32 %v1218_v29, %v1059_v31  ;;  %v400_v35 = vpack.c.bf16 %v399_v33, %v398_v32  ;;  %v1232_v36 = vld [vmem:[%s1447_s11 + $0x38] sm:$0xff]  ;;  %v1231_v39 = vld [vmem:[%s1447_s11 + $0x30] sm:$0xff]  ;;  %v1230_v43 = vld [vmem:[%s1447_s11 + $0x28] sm:$0xff] }
  0x32   : > { %v1240_v37 = vld [vmem:[%s1447_s11 + $0x78] sm:$0xff]  ;;  %470 = vmatpush.bf16.msra.mxu0 %v1050_v25  ;;  %v1239_v41 = vld [vmem:[%s1447_s11 + $0x70] sm:$0xff]  ;;  %v1238_v45 = vld [vmem:[%s1447_s11 + $0x68] sm:$0xff] }
  0x33   : > { %484 = vmatpush.bf16.msra.mxu1 %v1054_v26  ;;  %498 = vmatpush.bf16.msra.mxu2 %v1058_v30  ;;  %v1248_v38 = vld [vmem:[%s1447_s11 + $0xb8] sm:$0xff]  ;;  %v1247_v42 = vld [vmem:[%s1447_s11 + $0xb0] sm:$0xff]  ;;  %v1246_v46 = vld [vmem:[%s1447_s11 + $0xa8] sm:$0xff] }
  0x34   : > { %512 = vmatpush.bf16.msra.mxu3 %v1062_v34  ;;  %v1256_v40 = vld [vmem:[%s1447_s11 + $0xf8] sm:$0xff]  ;;  %v1255_v44 = vld [vmem:[%s1447_s11 + $0xf0] sm:$0xff]  ;;  %v1229_v47 = vld [vmem:[%s1447_s11 + $0x20] sm:$0xff] }
  0x35   : > { %1079 = vmatmul.msk.bf16.vlgmr.msra.gmra.mxu0 %vm459_vm1, %v400_v35  ;;  %v1254_v48 = vld [vmem:[%s1447_s11 + $0xe8] sm:$0xff]  ;;  %v1237_v49 = vld [vmem:[%s1447_s11 + $0x60] sm:$0xff]  ;;  %v1228_v50 = vld [vmem:[%s1447_s11 + $0x18] sm:$0xff] }
  0x36   : > { %789 = vmatpush.bf16.msrb.mxu0 %v1232_v36  ;;  %1080 = vmatmul.msk.bf16.vlgmr.msra.gmra.mxu1 %vm459_vm1, %v400_v35  ;;  %v1236_v51 = vld [vmem:[%s1447_s11 + $0x58] sm:$0xff]  ;;  %v1245_v52 = vld [vmem:[%s1447_s11 + $0xa0] sm:$0xff]  ;;  %v1227_v54 = vld [vmem:[%s1447_s11 + $0x10] sm:$0xff] }
  0x37   : > { %803 = vmatpush.bf16.msrb.mxu1 %v1240_v37  ;;  %1081 = vmatmul.msk.bf16.vlgmr.msra.gmra.mxu2 %vm459_vm1, %v400_v35  ;;  %v1253_v53 = vld [vmem:[%s1447_s11 + $0xe0] sm:$0xff]  ;;  %v1235_v55 = vld [vmem:[%s1447_s11 + $0x50] sm:$0xff]  ;;  %v1244_v56 = vld [vmem:[%s1447_s11 + $0x98] sm:$0xff] }
  0x38   : > { %1082 = vmatmul.msk.bf16.vlgmr.msra.gmra.mxu3 %vm459_vm1, %v400_v35  ;;  %817 = vmatpush.bf16.msrb.mxu2 %v1248_v38  ;;  %v1252_v57 = vld [vmem:[%s1447_s11 + $0xd8] sm:$0xff]  ;;  %v1226_v58 = vld [vmem:[%s1447_s11 + $0x8] sm:$0xff]  ;;  %v1243_v60 = vld [vmem:[%s1447_s11 + $0x90] sm:$0xff] }
  0x39   : > { %831 = vmatpush.bf16.msrb.mxu3 %v1256_v40  ;;  %v1234_v59 = vld [vmem:[%s1447_s11 + $0x48] sm:$0xff]  ;;  %v1251_v61 = vld [vmem:[%s1447_s11 + $0xd0] sm:$0xff]  ;;  %v1225_v62 = vld [vmem:[%s1447_s11] sm:$0xff] }
  0x3a   : > { %790 = vmatpush.bf16.msrb.mxu0 %v1231_v39  ;;  %v1233_v63 = vld [vmem:[%s1447_s11 + $0x40] sm:$0xff]  ;;  %v1242_v0 = vld [vmem:[%s1447_s11 + $0x88] sm:$0xff] }
  0x3b   : > { %804 = vmatpush.bf16.msrb.mxu1 %v1239_v41  ;;  %v1250_v1 = vld [vmem:[%s1447_s11 + $0xc8] sm:$0xff]  ;;  %v1241_v2 = vld [vmem:[%s1447_s11 + $0x80] sm:$0xff] }
  0x3c   : > { %818 = vmatpush.bf16.msrb.mxu2 %v1247_v42  ;;  %v1249_v3 = vld [vmem:[%s1447_s11 + $0xc0] sm:$0xff] }
  0x3d   : > { %832 = vmatpush.bf16.msrb.mxu3 %v1255_v44  ;;  %v409_v4 = vld [vmem:[%s376_s23] sm:$0xf] }
  0x3e   : > { %791 = vmatpush.bf16.msrb.mxu0 %v1230_v43  ;;  %v411_v6 = vperm.slane %v409_v4, 0  ;;  %v412_v8 = vperm.slane %v409_v4, 1  ;;  %v413_v18 = vperm.slane %v409_v4, 2  ;;  %v414_v20 = vperm.slane %v409_v4, 3  ;;  %v531_v43 = vld [vmem:[%s1591_s7] sm:$0xff] }
  0x3f   : > { %805 = vmatpush.bf16.msrb.mxu1 %v1238_v45 }
  0x40   : > { %819 = vmatpush.bf16.msrb.mxu2 %v1246_v46 }
  0x41   : > { %833 = vmatpush.bf16.msrb.mxu3 %v1254_v48 }
  0x42   : > { %792 = vmatpush.bf16.msrb.mxu0 %v1229_v47 }
  0x43   : > { %806 = vmatpush.bf16.msrb.mxu1 %v1237_v49 }
  0x44   : > { %820 = vmatpush.bf16.msrb.mxu2 %v1245_v52 }
  0x45   : > { %834 = vmatpush.bf16.msrb.mxu3 %v1253_v53 }
  0x46   : > { %793 = vmatpush.bf16.msrb.mxu0 %v1228_v50 }
  0x47   : > { %807 = vmatpush.bf16.msrb.mxu1 %v1236_v51  ;;  %v532_v51 = vld [vmem:[%s1591_s7 + $0x8] sm:$0xff] }
  0x48   : > { %821 = vmatpush.bf16.msrb.mxu2 %v1244_v56 }
  0x49   : > { %835 = vmatpush.bf16.msrb.mxu3 %v1252_v57 }
  0x4a   : > { %794 = vmatpush.bf16.msrb.mxu0 %v1227_v54 }
  0x4b   : > { %808 = vmatpush.bf16.msrb.mxu1 %v1235_v55 }
  0x4c   : > { %822 = vmatpush.bf16.msrb.mxu2 %v1243_v60 }
  0x4d   : > { %836 = vmatpush.bf16.msrb.mxu3 %v1251_v61 }
  0x4e   : > { %795 = vmatpush.bf16.msrb.mxu0 %v1226_v58 }
  0x4f   : > { %809 = vmatpush.bf16.msrb.mxu1 %v1234_v59 }
  0x50   : > { %823 = vmatpush.bf16.msrb.mxu2 %v1242_v0 }
  0x51   : > { %837 = vmatpush.bf16.msrb.mxu3 %v1250_v1 }
  0x52   : > { %796 = vmatpush.bf16.msrb.mxu0 %v1225_v62 }
  0x53   : > { %810 = vmatpush.bf16.msrb.mxu1 %v1233_v63 }
  0x54   : > { %824 = vmatpush.bf16.msrb.mxu2 %v1241_v2 }
  0x55   : > { %838 = vmatpush.bf16.msrb.mxu3 %v1249_v3 }
  0xb2   : > { %v472_v5 = vpop.f32.mrf.mxu0 }
  0xb3   : > { %v486_v7 = vpop.f32.mrf.mxu1  ;;  %v473_v9 = vadd.f32 %v472_v5, %v411_v6 }
  0xb4   : > { %v487_v10 = vadd.f32 %v486_v7, %v412_v8 }
  0xb5   : > { %v519_v14 = vmax.f32 %v473_v9, 0.0 }
  0xb6   : > { %v520_v17 = vmax.f32 %v487_v10, 0.0 }
  0xba   : > { %v500_v11 = vpop.f32.mrf.mxu2  ;;  %v474_v13 = vpop.f32.mrf.mxu0 }
  0xbb   : > { %v514_v12 = vpop.f32.mrf.mxu3  ;;  %v475_v15 = vadd.f32 %v474_v13, %v411_v6  ;;  %v488_v16 = vpop.f32.mrf.mxu1  ;;  %v501_v24 = vadd.f32 %v500_v11, %v413_v18 }
  0xbc   : > { %v489_v19 = vadd.f32 %v488_v16, %v412_v8  ;;  %v515_v26 = vadd.f32 %v514_v12, %v414_v20 }
  0xbd   : > { %v523_v21 = vmax.f32 %v475_v15, 0.0  ;;  %v521_v31 = vmax.f32 %v501_v24, 0.0 }
  0xbe   : > { %v524_v22 = vmax.f32 %v489_v19, 0.0  ;;  %v522_v33 = vmax.f32 %v515_v26, 0.0 }
  0xbf   : > { %v527_v23 = vpack.c.bf16 %v523_v21, %v519_v14 }
  0xc0   : > { %v528_v25 = vpack.c.bf16 %v524_v22, %v520_v17 }
  0xc1   : > { %797 = vmatmul.bf16.vlgmr.msrb.gmra.mxu0 %v527_v23 }
  0xc2   : > { %v502_v27 = vpop.f32.mrf.mxu2  ;;  %811 = vmatmul.bf16.vlgmr.msrb.gmra.mxu1 %v528_v25 }
  0xc3   : > { %v503_v28 = vadd.f32 %v502_v27, %v413_v18  ;;  %v516_v29 = vpop.f32.mrf.mxu3 }
  0xc4   : > { %v517_v30 = vadd.f32 %v516_v29, %v414_v20 }
  0xc5   : > { %v525_v32 = vmax.f32 %v503_v28, 0.0 }
  0xc6   : > { %v526_v34 = vmax.f32 %v517_v30, 0.0 }
  0xc7   : > { %v529_v35 = vpack.c.bf16 %v525_v32, %v521_v31 }
  0xc8   : > { %v530_v36 = vpack.c.bf16 %v526_v34, %v522_v33 }
  0xc9   : > { %825 = vmatmul.bf16.vlgmr.msrb.gmra.mxu2 %v529_v35 }
  0xca   : > { %839 = vmatmul.bf16.vlgmr.msrb.gmra.mxu3 %v530_v36 }
 0x13e   : > { %v798_v37 = vpop.f32.mrf.mxu0 }
 0x13f   : > { %v812_v38 = vpop.f32.mrf.mxu1 }
 0x140   : > { %v813_v39 = vadd.f32 %v812_v38, %v798_v37 }
 0x146   : > { %v800_v45 = vpop.f32.mrf.mxu0 }
 0x147   : > { %v814_v46 = vpop.f32.mrf.mxu1 }
 0x148   : > { %v815_v48 = vadd.f32 %v814_v46, %v800_v45 }
 0x14c   : > { %v826_v40 = vpop.f32.mrf.mxu2 }
 0x14d   : > { %v827_v41 = vadd.f32 %v826_v40, %v813_v39  ;;  %v840_v42 = vpop.f32.mrf.mxu3 }
 0x14f   : > { %v841_v44 = vadd.f32 %v840_v42, %v827_v41 }
 0x151   : > { %v845_v47 = vadd.f32 %v841_v44, %v531_v43 }
 0x153   : > { %847 = vst.msk [vmem:[%s1591_s7] sm:$0xff] %vm459_vm1, %v845_v47 }
 0x154   : > { %v828_v49 = vpop.f32.mrf.mxu2 }
 0x155   : > { %v829_v50 = vadd.f32 %v828_v49, %v815_v48  ;;  %v842_v52 = vpop.f32.mrf.mxu3 }
 0x157   : > { %v843_v53 = vadd.f32 %v842_v52, %v829_v50  ;;  %852 = sbr.rel (%p1211_p12) target bundleno = 631 (0x277), region = 79 }
 0x159   : > { %v846_v54 = vadd.f32 %v843_v53, %v532_v51 }
 0x15b   : > { %848 = vst.msk [vmem:[%s1591_s7 + $0x8] sm:$0xff] %vm459_vm1, %v846_v54 }
 0x15c   : > { %v853_v55 = vld [vmem:[%s1591_s7] sm:$0xff]  ;;  %v862_v62 = vld [vmem:[%s1584_s0 + $0x8] sm:$0xff]  ;;  %v1349_v2 = vmov 32.0  }
 0x15d   : > { %v1299_v56 = vld [vmem:[%s1588_s4] ss:$0 sm:$0xff]  ;;  %1302 = vrcp.f32 %v1349_v2 }
 0x15e   : > { %v861_v57 = vld [vmem:[%s1584_s0] sm:$0xff]  ;;  %v859_v59 = vadd.f32 %v1299_v56, %v853_v55 }
 0x15f   : > { %v1300_v33 = vld [vmem:[%s1589_s5] ss:$0 sm:$0xff] }
 0x160   : > { %v863_v60 = vadd.f32 %v861_v57, %v859_v59  ;;  %v1301_v36 = vld [vmem:[%s1590_s6] ss:$0 sm:$0xff] }
 0x162   : > { %v854_v58 = vld [vmem:[%s1591_s7 + $0x8] sm:$0xff]  ;;  %v865_v63 = vsel %vm459_vm1, %v863_v60, 0.0 }
 0x163   : > { %v860_v61 = vadd.f32 %v1299_v56, %v854_v58  ;;  %866 = vadd.xlane.f32.xlu0 %v865_v63  ;;  %v1303_v3 = vpop.eup %1302 }
 0x164   : > { %v872_v4 = vmul.f32 32.0, %v1303_v3  ;;  %vm876_vm2 = vweird.f32 %v1303_v3 }
 0x165   : > { %v864_v0 = vadd.f32 %v862_v62, %v860_v61 }
 0x166   : > { %v873_v5 = vsub.f32 1.0, %v872_v4 }
 0x167   : > { %v868_v1 = vsel %vm459_vm1, %v864_v0, 0.0 }
 0x168   : > { %v874_v6 = vmul.f32 %v1303_v3, %v873_v5 }
 0x16a   : > { %v875_v7 = vadd.f32 %v1303_v3, %v874_v6 }
 0x16b   : > { %869 = vadd.xlane.f32.xlu0 %v868_v1 }
 0x16c   : > { %v877_v8 = vsel %vm876_vm2, %v1303_v3, %v875_v7 }
 0x1d6   : > { %v867_v9 = vpop.xlane.xlu0 %866 }
 0x1d7   : > { %v878_v10 = vmul.f32 %v877_v8, %v867_v9 }
 0x1d9   : > { %v880_v11 = vsub.f32 %v863_v60, %v878_v10 }
 0x1db   : > { %v882_v12 = vmul.f32 %v880_v11, %v880_v11 }
 0x1dd   : > { %v884_v13 = vsel %vm459_vm1, %v882_v12, 0.0 }
 0x1de   : > { %885 = vadd.xlane.f32.xlu1 %v884_v13  ;;  %v870_v14 = vpop.xlane.xlu0 %869 }
 0x1df   : > { %v879_v15 = vmul.f32 %v877_v8, %v870_v14 }
 0x1e1   : > { %v881_v16 = vsub.f32 %v864_v0, %v879_v15 }
 0x1e3   : > { %v883_v17 = vmul.f32 %v881_v16, %v881_v16 }
 0x1e5   : > { %v887_v18 = vsel %vm459_vm1, %v883_v17, 0.0 }
 0x1e6   : > { %888 = vadd.xlane.f32.xlu1 %v887_v18 }
 0x251   : > { %v886_v19 = vpop.xlane.xlu1 %885 }
 0x252   : > { %v890_v20 = vmul.f32 %v886_v19, %v877_v8 }
 0x254   : > { %v892_v21 = vadd.f32 1e-05, %v890_v20 }
 0x256   : > { %1304 = vrsqrt.f32 %v892_v21  ;;  %vm900_vm4 = vweird.f32 %v892_v21 }
 0x259   : > { %v889_v22 = vpop.xlane.xlu1 %888 }
 0x25a   : > { %v891_v23 = vmul.f32 %v889_v22, %v877_v8 }
 0x25c   : > { %v1305_v24 = vpop.eup %1304  ;;  %v893_v25 = vadd.f32 1e-05, %v891_v23 }
 0x25d   : > { %v895_v26 = vmul.f32 %v1305_v24, %v892_v21  ;;  %vm901_vm3 = vweird.f32 %v1305_v24 }
 0x25e   : > { %1306 = vrsqrt.f32 %v893_v25  ;;  %vm902_vm5 = vmor %vm900_vm4, %vm901_vm3  ;;  %vm910_vm7 = vweird.f32 %v893_v25 }
 0x25f   : > { %v896_v27 = vmul.f32 %v1305_v24, %v895_v26 }
 0x261   : > { %v897_v28 = vmul.f32 0.5, %v896_v27 }
 0x263   : > { %v898_v29 = vsub.f32 1.5, %v897_v28 }
 0x264   : > { %v1307_v30 = vpop.eup %1306 }
 0x265   : > { %v899_v31 = vmul.f32 %v1305_v24, %v898_v29  ;;  %v905_v32 = vmul.f32 %v1307_v30, %v893_v25  ;;  %vm911_vm6 = vweird.f32 %v1307_v30 }
 0x266   : > { %vm912_vm8 = vmor %vm910_vm7, %vm911_vm6 }
 0x267   : > { %v903_v34 = vsel %vm902_vm5, %v1305_v24, %v899_v31  ;;  %v906_v35 = vmul.f32 %v1307_v30, %v905_v32 }
 0x268   : > { %v914_v37 = vmul.f32 %v903_v34, %v880_v11 }
 0x269   : > { %v907_v38 = vmul.f32 0.5, %v906_v35 }
 0x26a   : > { %v920_v39 = vmul.f32 %v1300_v33, %v914_v37 }
 0x26b   : > { %v908_v40 = vsub.f32 1.5, %v907_v38 }
 0x26c   : > { %v926_v41 = vadd.f32 %v1301_v36, %v920_v39 }
 0x26d   : > { %v909_v42 = vmul.f32 %v1307_v30, %v908_v40 }
 0x26e   : > { %928 = vst.msk [vmem:[%s1591_s7] sm:$0xff] %vm459_vm1, %v926_v41 }
 0x26f   : > { %v913_v43 = vsel %vm912_vm8, %v1307_v30, %v909_v42 }
 0x270   : > { %v915_v44 = vmul.f32 %v913_v43, %v881_v16 }
 0x272   : > { %v921_v45 = vmul.f32 %v1300_v33, %v915_v44 }
 0x274   : > { %v927_v46 = vadd.f32 %v1301_v36, %v921_v45 }
 0x276   : > { %929 = vst.msk [vmem:[%s1591_s7 + $0x8] sm:$0xff] %vm459_vm1, %v927_v46 }
 0x277 PF: > { %s17_s28 = sadd.s32 1, %s1346_s28   ;;  %s1592_s24 = smov %s1334_s25 }
 0x278   : > { %p14_p13 = scmp.ge.s32.totalorder %s17_s28, 6   ;;  %s1593_s25 = smov %s1425_s9 }
 0x279   : > { %s1594_s26 = smov %s1342_s27  ;;  %s1595_s27 = smov %s1597_s29 }
 0x27a   :  { %16 = sbr.rel (!%p14_p13) target bundleno = 3 (0x3), region = 123 }

// kernel: transformer_forward.43
= control target key start
LH: loop header
LB: loop body
LE: loop exit
PB: predicated region body
PF: predicated region fallthrough
CT: control target
= control target key end

     0   :  { %vm19_vm0 = vcmask 523264   ;;  %v96_v1 = vmov 0.0   ;;  %vm43_vm1 = vcmask 261120   ;;  %s168_s1 = inlined_call_operand.vmem [shape: bf16[32,64], index: 1, kind: input, shape index: {}]   ;;  %s169_s0 = inlined_call_operand.vmem [shape: f32[16,32], index: 0, kind: input, shape index: {}]   ;;  %s170_s3 = inlined_call_operand.vmem [shape: f32[16,64], index: 3, kind: output, shape index: {}]   ;;  %s171_s2 = inlined_call_operand.vmem [shape: f32[1,64], index: 2, kind: input, shape index: {}]  }
   0x1   :  { %v93_v0 = vld [vmem:[%s168_s1 + $0x8] sm:$0xff]  ;;  %20 = vst.msk [vmem:[%s170_s3] sm:$0xff] %vm19_vm0, %v96_v1  ;;  %v92_v2 = vld [vmem:[%s168_s1] sm:$0xff] }
   0x2   :  { %21 = vst.msk [vmem:[%s170_s3 + $0x8] sm:$0xff] %vm19_vm0, %v96_v1  ;;  %53 = vmatpush.bf16.msra.mxu0 %v93_v0  ;;  %v24_v3 = vld [vmem:[%s169_s0] sm:$0xff]  ;;  %v25_v4 = vld [vmem:[%s169_s0 + $0x8] sm:$0xff] }
   0x3   :  { %v26_v5 = vpack.c.bf16 %v25_v4, %v24_v3  ;;  %v95_v10 = vld [vmem:[%s171_s2] ss:$0 sm:$0xff] }
   0x6   :  { %54 = vmatpush.bf16.msra.mxu0 %v92_v2 }
   0x8   :  { %v22_v6 = vld [vmem:[%s170_s3] sm:$0xff] }
   0x9   :  { %91 = vmatmul.msk.bf16.vlgmr.msra.gmra.mxu0 %vm43_vm1, %v26_v5  ;;  %v23_v9 = vld [vmem:[%s170_s3 + $0x8] sm:$0xff] }
  0x86   :  { %v56_v7 = vpop.f32.mrf.mxu0 }
  0x87   :  { %v61_v8 = vadd.f32 %v56_v7, %v22_v6 }
  0x89   :  { %64 = vst.msk [vmem:[%s170_s3] sm:$0xff] %vm19_vm0, %v61_v8 }
  0x8e   :  { %v58_v11 = vpop.f32.mrf.mxu0 }
  0x8f   :  { %v62_v12 = vadd.f32 %v58_v11, %v23_v9 }
  0x90   :  { %v69_v13 = vld [vmem:[%s170_s3] sm:$0xff] }
  0x91   :  { %v75_v14 = vadd.f32 %v95_v10, %v69_v13  ;;  %65 = vst.msk [vmem:[%s170_s3 + $0x8] sm:$0xff] %vm19_vm0, %v62_v12 }
  0x93   :  { %77 = vst.msk [vmem:[%s170_s3] sm:$0xff] %vm19_vm0, %v75_v14 }
  0x98   :  { %v70_v15 = vld [vmem:[%s170_s3 + $0x8] sm:$0xff] }
  0x99   :  { %v76_v16 = vadd.f32 %v95_v10, %v70_v15 }
  0x9b   :  { %78 = vst.msk [vmem:[%s170_s3 + $0x8] sm:$0xff] %vm19_vm0, %v76_v16 }

// kernel: transformer_forward.42
= control target key start
LH: loop header
LB: loop body
LE: loop exit
PB: predicated region body
PF: predicated region fallthrough
CT: control target
= control target key end

     0   :  { %vm19_vm0 = vcmask 261120   ;;  %v95_v1 = vmov 0.0   ;;  %s168_s1 = inlined_call_operand.vmem [shape: bf16[32,32], index: 1, kind: input, shape index: {}]   ;;  %s169_s0 = inlined_call_operand.vmem [shape: f32[16,32], index: 0, kind: input, shape index: {}]   ;;  %s170_s3 = inlined_call_operand.vmem [shape: f32[16,32], index: 3, kind: output, shape index: {}]   ;;  %s171_s2 = inlined_call_operand.vmem [shape: f32[1,32], index: 2, kind: input, shape index: {}]  }
   0x1   :  { %v92_v0 = vld [vmem:[%s168_s1 + $0x8] sm:$0xff]  ;;  %20 = vst.msk [vmem:[%s170_s3] sm:$0xff] %vm19_vm0, %v95_v1  ;;  %v91_v2 = vld [vmem:[%s168_s1] sm:$0xff] }
   0x2   :  { %21 = vst.msk [vmem:[%s170_s3 + $0x8] sm:$0xff] %vm19_vm0, %v95_v1  ;;  %53 = vmatpush.bf16.msra.mxu0 %v92_v0  ;;  %v24_v3 = vld [vmem:[%s169_s0] sm:$0xff]  ;;  %v25_v4 = vld [vmem:[%s169_s0 + $0x8] sm:$0xff] }
   0x3   :  { %v26_v5 = vpack.c.bf16 %v25_v4, %v24_v3  ;;  %v94_v10 = vld [vmem:[%s171_s2] ss:$0 sm:$0xff] }
   0x6   :  { %54 = vmatpush.bf16.msra.mxu0 %v91_v2 }
   0x8   :  { %v22_v6 = vld [vmem:[%s170_s3] sm:$0xff] }
   0x9   :  { %90 = vmatmul.msk.bf16.vlgmr.msra.gmra.mxu0 %vm19_vm0, %v26_v5  ;;  %v23_v9 = vld [vmem:[%s170_s3 + $0x8] sm:$0xff] }
  0x86   :  { %v56_v7 = vpop.f32.mrf.mxu0 }
  0x87   :  { %v61_v8 = vadd.f32 %v56_v7, %v22_v6 }
  0x89   :  { %63 = vst.msk [vmem:[%s170_s3] sm:$0xff] %vm19_vm0, %v61_v8 }
  0x8e   :  { %v58_v11 = vpop.f32.mrf.mxu0 }
  0x8f   :  { %v62_v12 = vadd.f32 %v58_v11, %v23_v9 }
  0x90   :  { %v68_v13 = vld [vmem:[%s170_s3] sm:$0xff] }
  0x91   :  { %v74_v14 = vadd.f32 %v94_v10, %v68_v13  ;;  %64 = vst.msk [vmem:[%s170_s3 + $0x8] sm:$0xff] %vm19_vm0, %v62_v12 }
  0x93   :  { %76 = vst.msk [vmem:[%s170_s3] sm:$0xff] %vm19_vm0, %v74_v14 }
  0x98   :  { %v69_v15 = vld [vmem:[%s170_s3 + $0x8] sm:$0xff] }
  0x99   :  { %v75_v16 = vadd.f32 %v94_v10, %v69_v15 }
  0x9b   :  { %77 = vst.msk [vmem:[%s170_s3 + $0x8] sm:$0xff] %vm19_vm0, %v75_v16 }

// kernel: transformer_forward.55
= control target key start
LH: loop header
LB: loop body
LE: loop exit
PB: predicated region body
PF: predicated region fallthrough
CT: control target
= control target key end

     0   :  { %vm17_vm0 = vcmask 261120   ;;  %s184_s0 = inlined_call_operand.vmem [shape: f32[16,32], index: 0, kind: input, shape index: {}]   ;;  %s185_s1 = inlined_call_operand.vmem [shape: f32[1,32], index: 1, kind: input, shape index: {}]   ;;  %s186_s2 = inlined_call_operand.vmem [shape: f32[1,32], index: 2, kind: input, shape index: {}]   ;;  %s187_s3 = inlined_call_operand.hbm [shape: f32[16,32], index: 3, kind: output, shape index: {}]  }
   0x1   :  { %v15_v0 = vld [vmem:[%s184_s0] sm:$0xff] }
   0x2   :  { %v18_v1 = vsel %vm17_vm0, %v15_v0, 0.0 }
   0x3   :  { %8 = vsyncpa [#allocation3], 0  ;;  %19 = vadd.xlane.f32.xlu0 %v18_v1  ;;  %v16_v2 = vld [vmem:[%s184_s0 + $0x8] sm:$0xff]  ;;  %v139_v4 = vmov 32.0   ;;  %v105_v35 = vld [vmem:[%s185_s1] ss:$0 sm:$0xff] }
   0x4   :  { %v21_v3 = vsel %vm17_vm0, %v16_v2, 0.0  ;;  %107 = vrcp.f32 %v139_v4  ;;  %v106_v39 = vld [vmem:[%s186_s2] ss:$0 sm:$0xff]  ;;  %s140_s1 = smov [#allocation2]   ;;  %s89_s22 = sshll.u32 %s187_s3, 4  ;;  %s90_s22 = int_to_ptr.hbm [resolvable:$true] %s89_s22 }
   0x5   :  { %s87_s19 = sshll.u32 %s140_s1, 4  ;;  %s141_s2 = smov 128   ;;  %s88_s19 = int_to_ptr.vmem [resolvable:$true] %s87_s19 }
   0x6   :  { %s142_s23 = smov 8  }
   0xa   :  { %v108_v5 = vpop.eup %107 }
   0xb   :  { %22 = vadd.xlane.f32.xlu0 %v21_v3  ;;  %v25_v6 = vmul.f32 32.0, %v108_v5  ;;  %vm29_vm1 = vweird.f32 %v108_v5 }
   0xd   :  { %v26_v7 = vsub.f32 1.0, %v25_v6 }
   0xf   :  { %v27_v8 = vmul.f32 %v108_v5, %v26_v7 }
  0x11   :  { %v28_v9 = vadd.f32 %v108_v5, %v27_v8 }
  0x13   :  { %v30_v10 = vsel %vm29_vm1, %v108_v5, %v28_v9 }
  0x76   :  { %v20_v11 = vpop.xlane.xlu0 %19 }
  0x77   :  { %v31_v12 = vmul.f32 %v30_v10, %v20_v11 }
  0x79   :  { %v33_v13 = vsub.f32 %v15_v0, %v31_v12 }
  0x7b   :  { %v35_v14 = vmul.f32 %v33_v13, %v33_v13 }
  0x7d   :  { %v37_v15 = vsel %vm17_vm0, %v35_v14, 0.0 }
  0x7e   :  { %38 = vadd.xlane.f32.xlu1 %v37_v15  ;;  %v23_v16 = vpop.xlane.xlu0 %22 }
  0x7f   :  { %v32_v17 = vmul.f32 %v30_v10, %v23_v16 }
  0x81   :  { %v34_v18 = vsub.f32 %v16_v2, %v32_v17 }
  0x83   :  { %v36_v19 = vmul.f32 %v34_v18, %v34_v18 }
  0x85   :  { %v40_v20 = vsel %vm17_vm0, %v36_v19, 0.0 }
  0x86   :  { %41 = vadd.xlane.f32.xlu1 %v40_v20 }
  0xf1   :  { %v39_v21 = vpop.xlane.xlu1 %38 }
  0xf2   :  { %v43_v22 = vmul.f32 %v39_v21, %v30_v10 }
  0xf4   :  { %v45_v23 = vadd.f32 1e-05, %v43_v22 }
  0xf6   :  { %109 = vrsqrt.f32 %v45_v23  ;;  %vm53_vm3 = vweird.f32 %v45_v23 }
  0xf9   :  { %v42_v24 = vpop.xlane.xlu1 %41 }
  0xfa   :  { %v44_v25 = vmul.f32 %v42_v24, %v30_v10 }
  0xfc   :  { %v110_v26 = vpop.eup %109  ;;  %v46_v27 = vadd.f32 1e-05, %v44_v25 }
  0xfd   :  { %v48_v28 = vmul.f32 %v110_v26, %v45_v23  ;;  %vm54_vm2 = vweird.f32 %v110_v26 }
  0xfe   :  { %111 = vrsqrt.f32 %v46_v27  ;;  %vm55_vm4 = vmor %vm53_vm3, %vm54_vm2  ;;  %vm63_vm6 = vweird.f32 %v46_v27 }
  0xff   :  { %v49_v29 = vmul.f32 %v110_v26, %v48_v28 }
 0x101   :  { %v50_v30 = vmul.f32 0.5, %v49_v29 }
 0x103   :  { %v51_v31 = vsub.f32 1.5, %v50_v30 }
 0x104   :  { %v112_v32 = vpop.eup %111 }
 0x105   :  { %v52_v33 = vmul.f32 %v110_v26, %v51_v31  ;;  %v58_v34 = vmul.f32 %v112_v32, %v46_v27  ;;  %vm64_vm5 = vweird.f32 %v112_v32 }
 0x106   :  { %vm65_vm7 = vmor %vm63_vm6, %vm64_vm5 }
 0x107   :  { %v56_v36 = vsel %vm55_vm4, %v110_v26, %v52_v33  ;;  %v59_v37 = vmul.f32 %v112_v32, %v58_v34 }
 0x108   :  { %v67_v38 = vmul.f32 %v56_v36, %v33_v13 }
 0x109   :  { %v60_v40 = vmul.f32 0.5, %v59_v37 }
 0x10a   :  { %v73_v41 = vmul.f32 %v105_v35, %v67_v38 }
 0x10b   :  { %v61_v42 = vsub.f32 1.5, %v60_v40 }
 0x10c   :  { %v79_v43 = vadd.f32 %v106_v39, %v73_v41 }
 0x10d   :  { %v62_v44 = vmul.f32 %v112_v32, %v61_v42 }
 0x10e   :  { %81 = vst.msk [vmem:[#allocation2] sm:$0xff] %vm17_vm0, %v79_v43 }
 0x10f   :  { %v66_v45 = vsel %vm65_vm7, %v112_v32, %v62_v44 }
 0x110   :  { %v68_v46 = vmul.f32 %v66_v45, %v34_v18 }
 0x112   :  { %v74_v47 = vmul.f32 %v105_v35, %v68_v46 }
 0x114   :  { %v80_v48 = vadd.f32 %v106_v39, %v74_v47 }
 0x116   :  { %82 = vst.msk [vmem:[#allocation2 + $0x8] sm:$0xff] %vm17_vm0, %v80_v48 }
 0x117   :  { %95 = dma.vmem_to_hbm [thread:$0]  %s88_s19, 256, %s90_s22, [#allocation3], %s141_s2, %s141_s2, %s142_s23  }
 0x118   :  { %137 = dma.done.wait [#allocation3], 256  }
 0x119   :  { %138 = vsyncadd [#allocation3], 4294967040 }
 0x11a   :  { %100 = vsyncpa [#allocation3], 1 }

// kernel: transformer_forward.44
= control target key start
LH: loop header
LB: loop body
LE: loop exit
PB: predicated region body
PF: predicated region fallthrough
CT: control target
= control target key end

     0   :  { %s659_s9 = smov 0   ;;  %s661_s10 = smov 0   ;;  %s741_s0 = inlined_call_operand.vmem [shape: f32[2,8,32], index: 0, kind: input, shape index: {}]   ;;  %s742_s1 = inlined_call_operand.vmem [shape: f32[2,8,64], index: 1, kind: input, shape index: {}]   ;;  %s743_s2 = inlined_call_operand.vmem [shape: f32[2,8,32], index: 2, kind: output, shape index: {}]  }
   0x1   :  { %s663_s11 = smov 0  }
   0x2 LB: > { %s24_s12 = sadd.s32 1, %s628_s10  ;;  %p546_p0 = scmp.ge.s32.totalorder %s632_s11, 1  ;;  %s632_s11 = sphi %s663_s11, %s12_s11   ;;  %s628_s10 = sphi %s661_s10, %s745_s10   ;;  %s624_s9 = sphi %s659_s9, %s744_s9  }
   0x3   : > { %p26_p1 = scmp.ge.s32.totalorder %s24_s12, 2  ;;  %p139_p2 = scmp.lt.s32.totalorder %s632_s11, 3 }
   0x5   : > { %s747_s12 = smov (%p26_p1, %s24_s12), 0  ;;  %p140_p3 = pnand %p546_p0, %p139_p2 }
   0x6   : > { %p169_p4 = scmp.lt.s32.totalorder (!%p140_p3), %s624_s9, 1  ;;  %s634_s20 = smov (!%p140_p3), 96  }
   0x7   : > { %143 = sbr.rel (%p140_p3) target bundleno = 1078 (0x436), region = 28  ;;  %s635_s21 = smov (!%p140_p3), 112  }
   0x8   : > { %s636_s22 = smov (!%p140_p3), 104   ;;  %s637_s23 = smov (!%p140_p3), 120  }
   0x9   : > { %s638_s27 = smov (!%p140_p3), 88   ;;  %s639_s28 = smov (!%p140_p3), 80  }
   0xa   : > { %s640_s29 = smov (!%p140_p3), 72   ;;  %s641_s30 = smov (!%p140_p3), 8  }
   0xb   : > { %s642_s3 = smov (!%p140_p3), 24   ;;  %s643_s4 = smov (!%p140_p3), 16  }
   0xc   : > { %s749_s9 = smov (!%p169_p4, %s624_s9), 1  ;;  %vm192_vm0 = vcmask 64512   ;;  %vm231_vm1 = vcmask 1043456   ;;  %vm316_vm2 = vcmask 130112   ;;  %vm385_vm3 = vcmask 195712  }
   0xd   : > { %s677_s13 = sshll.u32 %s749_s9, 3  ;;  %vm454_vm4 = vcmask 261312  }
   0xe   : > { %s179_s16 = scalar_lea.vmem %s742_s1, %s677_s13  ;;  %s175_s19 = scalar_lea.vmem %s741_s0, %s677_s13 }
   0xf   : > { %v190_v0 = vld [vmem:[%s179_s16] sm:$0xff]  ;;  %s711_s26 = scalar_lea.vmem %s743_s2, %s677_s13 }
  0x10   : > { %v683_v1 = vpack.c.bf16 %v190_v0, %v190_v0  ;;  %v188_v3 = vld [vmem:[%s175_s19] sm:$0xff] }
  0x11   : > { %v189_v4 = vpack.c.bf16 %v188_v3, %v188_v3 }
  0x12   : > { %v197_v2 = vsel %vm192_vm0, %v683_v1, 0  ;;  %226 = vrot.lane.b32.xlu2 %v683_v1, %s634_s20 }
  0x13   : > { %206 = vmatpush.bf16.xpose.msra.mxu0 %v197_v2 }
  0x1a   : > { %550 = vmatmul.msk.bf16.vlgmr.msra.gmra.mxu0 %vm192_vm0, %v189_v4  ;;  %326 = vrot.lane.b32.xlu2 %v683_v1, %s635_s21 }
  0x22   : > { %395 = vrot.lane.b32.xlu2 %v683_v1, %s636_s22 }
  0x2a   : > { %323 = vrot.lane.b32.xlu2 %v189_v4, %s635_s21 }
  0x6c   : > { %v227_v9 = vpop.permute.xlu2 %226 }
  0x6d   : > { %v233_v20 = vsel %vm231_vm1, %v227_v9, 0 }
  0x6e   : > { %242 = vmatpush.bf16.msra.mxu1 %v233_v20 }
  0x74   : > { %v327_v10 = vpop.permute.xlu2 %326 }
  0x75   : > { %v332_v21 = vsel %vm192_vm0, %v327_v10, 0 }
  0x76   : > { %341 = vmatpush.bf16.xpose.msrb.mxu1 %v332_v21 }
  0x7c   : > { %v396_v14 = vpop.permute.xlu2 %395 }
  0x7d   : > { %v401_v15 = vsel %vm192_vm0, %v396_v14, 0 }
  0x7e   : > { %410 = vmatpush.bf16.xpose.msrb.mxu0 %v401_v15 }
  0x84   : > { %v324_v28 = vpop.permute.xlu2 %323 }
  0x97   : > { %v208_v5 = vpop.f32.mrf.mxu0 }
  0x98   : > { %v212_v6 = vmul.f32 0.35355338, %v208_v5 }
  0x9a   : > { %v213_v7 = vsel %vm192_vm0, %v212_v6, -inf }
  0x9b   : > { %214 = vmax.xlane.f32.xlu0 %v213_v7 }
  0x9f   : > { %v210_v8 = vpop.f32.mrf.mxu0 }
  0xaf   : > { %257 = vrot.lane.b32.xlu0 %v683_v1, %s637_s23 }
  0xb7   : > { %392 = vrot.lane.b32.xlu0 %v189_v4, %s636_s22 }
 0x10e   : > { %v215_v11 = vpop.xlane.xlu0 %214 }
 0x10f   : > { %v216_v12 = vsub.f32 %v212_v6, %v215_v11 }
 0x111   : > { %v217_v13 = vmul.f32 1.442695, %v216_v12 }
 0x113   : > { %594 = vpow2.f32 %v217_v13 }
 0x119   : > { %v595_v16 = vpop.eup %594 }
 0x11a   : > { %v219_v17 = vsel %vm192_vm0, %v595_v16, 0.0 }
 0x11b   : > { %220 = vadd.xlane.f32.xlu1 %v219_v17 }
 0x121   : > { %v258_v18 = vpop.permute.xlu0 %257 }
 0x122   : > { %v263_v22 = vsel %vm192_vm0, %v258_v18, 0 }
 0x123   : > { %272 = vmatpush.bf16.xpose.msra.mxu2 %v263_v22 }
 0x129   : > { %v393_v19 = vpop.permute.xlu0 %392 }
 0x12a   : > { %556 = vmatmul.msk.bf16.vlgmr.msrb.gmra.mxu0 %vm192_vm0, %v393_v19 }
 0x134   : > { %254 = vrot.lane.b32.xlu1 %v189_v4, %s637_s23 }
 0x18e   : > { %v221_v23 = vpop.xlane.xlu1 %220 }
 0x18f   : > { %596 = vrcp.f32 %v221_v23 }
 0x195   : > { %v597_v24 = vpop.eup %596 }
 0x196   : > { %v223_v25 = vmul.f32 %v597_v24, %v595_v16 }
 0x198   : > { %v224_v26 = vpack.c.bf16 %v223_v25, %v223_v25 }
 0x19a   : > { %551 = vmatmul.msk.bf16.vlgmr.msra.gmra.mxu1 %vm192_vm0, %v224_v26 }
 0x1a6   : > { %v255_v27 = vpop.permute.xlu1 %254 }
 0x1a7   : > { %552 = vmatmul.msk.bf16.vlgmr.msra.gmra.mxu2 %vm192_vm0, %v255_v27  ;;  %v412_v29 = vpop.f32.mrf.mxu0 }
 0x1a8   : > { %v416_v30 = vmul.f32 0.35355338, %v412_v29 }
 0x1aa   : > { %554 = vmatmul.msk.bf16.vlgmr.msrb.gmra.mxu1 %vm192_vm0, %v324_v28  ;;  %v417_v31 = vsel %vm192_vm0, %v416_v30, -inf }
 0x1ab   : > { %418 = vmax.xlane.f32.xlu0 %v417_v31 }
 0x1af   : > { %v414_v32 = vpop.f32.mrf.mxu0 }
 0x217   : > { %v244_v33 = vpop.f32.mrf.mxu1 }
 0x218   : > { %248 = vst.msk [vmem:[%s711_s26] sm:$0xff] %vm192_vm0, %v244_v33 }
 0x21e   : > { %v419_v45 = vpop.xlane.xlu0 %418 }
 0x21f   : > { %v246_v34 = vpop.f32.mrf.mxu1  ;;  %v420_v49 = vsub.f32 %v416_v30, %v419_v45 }
 0x221   : > { %v421_v51 = vmul.f32 1.442695, %v420_v49 }
 0x227   : > { %v343_v35 = vpop.f32.mrf.mxu1 }
 0x228   : > { %v347_v36 = vmul.f32 0.35355338, %v343_v35 }
 0x22a   : > { %v274_v37 = vpop.f32.mrf.mxu2  ;;  %v348_v38 = vsel %vm192_vm0, %v347_v36, -inf }
 0x22b   : > { %v278_v39 = vmul.f32 0.35355338, %v274_v37  ;;  %349 = vmax.xlane.f32.xlu1 %v348_v38 }
 0x22d   : > { %v279_v40 = vsel %vm192_vm0, %v278_v39, -inf }
 0x22e   : > { %280 = vmax.xlane.f32.xlu2 %v279_v40 }
 0x22f   : > { %v345_v41 = vpop.f32.mrf.mxu1 }
 0x232   : > { %v276_v42 = vpop.f32.mrf.mxu2 }
 0x244   : > { %291 = vrot.lane.b32.xlu1 %v683_v1, %s638_s27 }
 0x29e   : > { %v350_v43 = vpop.xlane.xlu1 %349 }
 0x29f   : > { %v351_v44 = vsub.f32 %v347_v36, %v350_v43 }
 0x2a1   : > { %v352_v46 = vmul.f32 1.442695, %v351_v44  ;;  %v281_v47 = vpop.xlane.xlu2 %280 }
 0x2a2   : > { %v282_v48 = vsub.f32 %v278_v39, %v281_v47 }
 0x2a3   : > { %598 = vpow2.f32 %v352_v46 }
 0x2a4   : > { %v283_v50 = vmul.f32 1.442695, %v282_v48 }
 0x2a6   : > { %600 = vpow2.f32 %v283_v50 }
 0x2a7   : > { %602 = vpow2.f32 %v421_v51 }
 0x2a9   : > { %v599_v52 = vpop.eup %598 }
 0x2aa   : > { %v354_v53 = vsel %vm192_vm0, %v599_v52, 0.0 }
 0x2ab   : > { %355 = vadd.xlane.f32.xlu0 %v354_v53 }
 0x2ac   : > { %v601_v54 = vpop.eup %600 }
 0x2ad   : > { %v285_v55 = vsel %vm192_vm0, %v601_v54, 0.0  ;;  %v603_v56 = vpop.eup %602 }
 0x2ae   : > { %286 = vadd.xlane.f32.xlu2 %v285_v55  ;;  %v423_v57 = vsel %vm192_vm0, %v603_v56, 0.0 }
 0x2b6   : > { %424 = vadd.xlane.f32.xlu2 %v423_v57  ;;  %v292_v58 = vpop.permute.xlu1 %291 }
 0x2b7   : > { %v297_v59 = vsel %vm231_vm1, %v292_v58, 0 }
 0x2b8   : > { %306 = vmatpush.bf16.msra.mxu3 %v297_v59 }
 0x2bf   : > { %360 = vrot.lane.b32.xlu0 %v683_v1, %s639_s28 }
 0x2ce   : > { %429 = vrot.lane.b32.xlu2 %v683_v1, %s640_s29 }
 0x31e   : > { %v356_v62 = vpop.xlane.xlu0 %355 }
 0x321   : > { %v287_v60 = vpop.xlane.xlu2 %286 }
 0x322   : > { %604 = vrcp.f32 %v287_v60 }
 0x328   : > { %v605_v61 = vpop.eup %604 }
 0x329   : > { %v425_v63 = vpop.xlane.xlu2 %424  ;;  %v289_v0 = vmul.f32 %v605_v61, %v601_v54 }
 0x32a   : > { %606 = vrcp.f32 %v425_v63 }
 0x32b   : > { %v290_v2 = vpack.c.bf16 %v289_v0, %v289_v0  ;;  %608 = vrcp.f32 %v356_v62 }
 0x32d   : > { %553 = vmatmul.msk.bf16.vlgmr.msra.gmra.mxu3 %vm192_vm0, %v290_v2 }
 0x330   : > { %v607_v3 = vpop.eup %606 }
 0x331   : > { %v427_v4 = vmul.f32 %v607_v3, %v603_v56  ;;  %v430_v5 = vpop.permute.xlu2 %429  ;;  %v361_v6 = vpop.permute.xlu0 %360 }
 0x332   : > { %v366_v1 = vsel %vm231_vm1, %v361_v6, 0  ;;  %v435_v7 = vsel %vm231_vm1, %v430_v5, 0  ;;  %v609_v9 = vpop.eup %608 }
 0x333   : > { %375 = vmatpush.bf16.msrb.mxu3 %v366_v1  ;;  %444 = vmatpush.bf16.msrb.mxu2 %v435_v7  ;;  %v428_v8 = vpack.c.bf16 %v427_v4, %v427_v4  ;;  %v358_v10 = vmul.f32 %v609_v9, %v599_v52 }
 0x335   : > { %v359_v11 = vpack.c.bf16 %v358_v10, %v358_v10 }
 0x336   : > { %557 = vmatmul.msk.bf16.vlgmr.msrb.gmra.mxu2 %vm192_vm0, %v428_v8 }
 0x33d   : > { %555 = vmatmul.msk.bf16.vlgmr.msrb.gmra.mxu3 %vm192_vm0, %v359_v11 }
 0x3b0   : > { %v308_v12 = vpop.f32.mrf.mxu3 }
 0x3b1   : > { %313 = vrot.lane.b32.xlu1 %v308_v12, %s641_s30 }
 0x3b8   : > { %v310_v13 = vpop.f32.mrf.mxu3 }
 0x3b9   : > { %v446_v14 = vpop.f32.mrf.mxu2 }
 0x3ba   : > { %451 = vrot.lane.b32.xlu1 %v446_v14, %s642_s3 }
 0x3c0   : > { %v377_v15 = vpop.f32.mrf.mxu3 }
 0x3c1   : > { %v448_v16 = vpop.f32.mrf.mxu2  ;;  %382 = vrot.lane.b32.xlu0 %v377_v15, %s643_s4 }
 0x3c8   : > { %v379_v17 = vpop.f32.mrf.mxu3 }
 0x423   : > { %v314_v18 = vpop.permute.xlu1 %313 }
 0x424   : > { %317 = vst.msk [vmem:[%s711_s26] sm:$0xff] %vm316_vm2, %v314_v18 }
 0x42c   : > { %v452_v20 = vpop.permute.xlu1 %451 }
 0x433   : > { %v383_v19 = vpop.permute.xlu0 %382 }
 0x434   : > { %386 = vst.msk [vmem:[%s711_s26] sm:$0xff] %vm385_vm3, %v383_v19 }
 0x435   : > { %455 = vst.msk [vmem:[%s711_s26] sm:$0xff] %vm454_vm4, %v452_v20 }
 0x436 PF: > { %s12_s11 = sadd.s32 1, %s632_s11   ;;  %s744_s9 = smov %s628_s10 }
 0x437   : > { %p9_p5 = scmp.ge.s32.totalorder %s12_s11, 4   ;;  %s745_s10 = smov %s747_s12 }
 0x439   :  { %11 = sbr.rel (!%p9_p5) target bundleno = 2 (0x2), region = 61 }

</bundles_post_ra>
